<compile_context>
chip_gen: v6e
topology: v6e:2x2x1
jax: 0.10.0
libtpu: 0.0.40
codegen_flags: <defaults>
</compile_context>

<pallas_src>
import functools

import jax
import jax.numpy as jnp
from jax import lax
from jax.experimental import pallas as pl
from jax.experimental.pallas import tpu as pltpu

LRELU_SLOPE = 0.1
KSIZE = 3
DILATIONS = (1, 3, 5)        # convs1 dilations; convs2 all use dilation 1
HALO = 16                    # >= total receptive-field radius 12, sublane aligned
LANE = 128


def _round_up(x, m):
    return (x + m - 1) // m * m


def _leaky_relu(x):
    return jnp.where(x >= 0, x, LRELU_SLOPE * x)


def _resblock1_kernel(xw_ref, w_ref, b_ref, o_ref, col_ref, *,
                      tile_t, halo, seq_len):
    # xw_ref : (1, 1, W, Cp) f32   input window (tile + halo), zero padded
    # w_ref  : (6, 3*Cp, Cp) bf16  weights, tap-major rows; conv order
    #                              c1_0, c2_0, c1_1, c2_1, c1_2, c2_2
    # b_ref  : (6, Cp)       f32   biases
    # o_ref  : (1, tile_t, Cp)     output tile (halo rows are discarded)
    # col_ref: (W, 3*Cp)     f32   im2col scratch (3 row-shifted activation copies)
    W = tile_t + 2 * halo
    Cp = o_ref.shape[-1]
    t_idx = pl.program_id(1)

    # Rows outside the real sequence [0, seq_len) are zeroed before every conv,
    # which reproduces PyTorch's per-conv zero ('same') padding exactly.
    row = lax.broadcasted_iota(jnp.int32, (W, 1), 0)
    g = row + (t_idx * tile_t - halo)
    valid = jnp.logical_and(g >= 0, g < seq_len)

    # Cheap one-time zeroing of the halo edge rows of the scratch so the few
    # rows the shifted stores below never touch hold finite data (their values
    # are irrelevant for correctness: over the whole chain, edge garbage can
    # propagate at most 12 rows inward, and the 16-row halo is discarded).
    zeros_edge = jnp.zeros((halo, KSIZE * Cp), jnp.float32)
    col_ref[0:halo, :] = zeros_edge
    col_ref[W - halo:W, :] = zeros_edge

    bias_all = b_ref[...]                              # (6, Cp), loaded once

    def conv(xt, j, d):
        # Fused 3-tap dilated conv: column block k of the im2col scratch holds
        # the activation shifted by (k-1)*d rows, so the 3 taps collapse into a
        # single MXU matmul of contraction depth 3*Cp (bf16 operands, f32 acc).
        col_ref[d:W, 0:Cp] = xt[:W - d]               # tap 0 reads in[t - d]
        col_ref[0:W, Cp:2 * Cp] = xt                  # tap 1 reads in[t]
        col_ref[0:W - d, 2 * Cp:3 * Cp] = xt[d:]      # tap 2 reads in[t + d]
        y = jnp.dot(col_ref[...].astype(jnp.bfloat16), w_ref[j],
                    preferred_element_type=jnp.float32)
        return y + bias_all[j][None, :]

    x = xw_ref[0, 0]                                   # (W, Cp) residual stream, f32
    for i, d in enumerate(DILATIONS):
        xt = jnp.where(valid, _leaky_relu(x), 0.0)
        xt = conv(xt, 2 * i, d)                        # convs1[i], dilation d
        xt = jnp.where(valid, _leaky_relu(xt), 0.0)
        xt = conv(xt, 2 * i + 1, 1)                    # convs2[i], dilation 1
        x = xt + x
    # halo = 16 -> sublane-aligned slice of the residual stream.
    o_ref[0] = x[halo:halo + tile_t, :].astype(o_ref.dtype)


def resblock1_forward(x_btc, weights, biases, *, tile_t=None):
    """ResBlock1 forward.

    x_btc   : (B, T, C) float32   activations, time-major layout
    weights : (6, 3, C, C)        per-conv weights, (tap, C_in, C_out), ordered
                                  c1_0, c2_0, c1_1, c2_1, c1_2, c2_2
    biases  : (6, C)
    """
    B, T, C = x_btc.shape
    Cp = _round_up(C, LANE)        # lane-dense channels (unmasked vst, full MXU width)

    if tile_t is None:
        # Keep the per-tile working set modest so the pipeline also fits v7x's
        # smaller (64 MiB) VMEM; larger C -> smaller time tile.
        tile_t = max(128, min(512, (1 << 20) // (Cp * 4)))
    tile_t = _round_up(max(8, min(tile_t, T)), 8)
    n_t = -(-T // tile_t)
    T_pad = n_t * tile_t
    W = tile_t + 2 * HALO

    # Zero-pad time (halo + tail) and channels, then materialize overlapping
    # per-tile windows so every grid step is independent (halo is recomputed).
    x_p = jnp.pad(x_btc.astype(jnp.float32),
                  ((0, 0), (HALO, HALO + T_pad - T), (0, Cp - C)))
    starts = jnp.arange(n_t) * tile_t
    win_idx = starts[:, None] + jnp.arange(W)[None, :]
    xw = x_p[:, win_idx, :]                                    # (B, n_t, W, Cp)

    # Weights: pad channels, cast to bf16 (MXU-native, halves resident VMEM),
    # flatten the tap axis so each conv is one (W, 3Cp) @ (3Cp, Cp) matmul.
    w_p = jnp.pad(weights, ((0, 0), (0, 0), (0, Cp - C), (0, Cp - C)))
    w2d = w_p.astype(jnp.bfloat16).reshape(6, KSIZE * Cp, Cp)
    b_p = jnp.pad(biases, ((0, 0), (0, Cp - C))).astype(jnp.float32)

    # VMEM budget: double-buffered in/out blocks + resident weights + scratch,
    # plus headroom for compiler temporaries.  Capped at 64 MiB (v7x physical).
    est = (2 * W * Cp * 4 + 2 * tile_t * Cp * 4
           + 6 * KSIZE * Cp * Cp * 2 + 6 * Cp * 4 + W * 3 * Cp * 4)
    vmem_limit = int(min(64 << 20, max(32 << 20, est + (16 << 20))))

    kernel = functools.partial(_resblock1_kernel,
                               tile_t=tile_t, halo=HALO, seq_len=T)
    out = pl.pallas_call(
        kernel,
        out_shape=jax.ShapeDtypeStruct((B, T_pad, Cp), x_btc.dtype),
        grid_spec=pltpu.PrefetchScalarGridSpec(
            num_scalar_prefetch=0,
            grid=(B, n_t),
            in_specs=[
                pl.BlockSpec((1, 1, W, Cp), lambda b, t: (b, t, 0, 0)),
                pl.BlockSpec((6, KSIZE * Cp, Cp), lambda b, t: (0, 0, 0)),
                pl.BlockSpec((6, Cp), lambda b, t: (0, 0)),
            ],
            out_specs=pl.BlockSpec((1, tile_t, Cp), lambda b, t: (b, t, 0)),
            scratch_shapes=[pltpu.VMEM((W, 3 * Cp), jnp.float32)],
        ),
        compiler_params=pltpu.CompilerParams(
            dimension_semantics=("parallel", "parallel"),
            vmem_limit_bytes=vmem_limit),
    )(xw, w2d, b_p)
    return out[:, :T, :C]


def resblock1_reference(x_btc, weights, biases):
    """Pure-JAX reference (mirrors the kernel's bf16 matmul operands)."""
    dn = ('NWC', 'WIO', 'NWC')
    w = weights.astype(jnp.bfloat16).astype(jnp.float32)

    def conv(x, j, d):
        xb = x.astype(jnp.bfloat16).astype(jnp.float32)
        y = lax.conv_general_dilated(
            xb, w[j], window_strides=(1,), padding=[(d, d)],
            rhs_dilation=(d,), dimension_numbers=dn,
            precision=lax.Precision.HIGHEST)
        return y + biases[j][None, None, :]

    x = x_btc
    for i, d in enumerate(DILATIONS):
        xt = _leaky_relu(x)
        xt = conv(xt, 2 * i, d)
        xt = _leaky_relu(xt)
        xt = conv(xt, 2 * i + 1, 1)
        x = xt + x
    return x


if __name__ == "__main__":
    B, C, T = 2, 32, 200                         # small shapes; multi-tile path
    key = jax.random.PRNGKey(0)
    kx, kw, kb = jax.random.split(key, 3)

    # PyTorch-layout input (B, C, T)
    x_bct = jax.random.normal(kx, (B, C, T), jnp.float32)

    # Deterministic synthetic parameters:
    #   init_weights -> Normal(0, 0.01); Conv1d default bias -> U(-1/sqrt(fan_in), +)
    weights = 0.01 * jax.random.normal(kw, (6, KSIZE, C, C), jnp.float32)
    bound = 1.0 / (C * KSIZE) ** 0.5
    biases = jax.random.uniform(kb, (6, C), jnp.float32, minval=-bound, maxval=bound)

    # layout: transpose PyTorch (B, C, T) -> kernel layout (B, T, C)
    x_btc = jnp.transpose(x_bct, (0, 2, 1))

    # tile_t=64 exercises multiple time tiles, halo recompute and tail masking.
    out = resblock1_forward(x_btc, weights, biases, tile_t=64)
    out = jax.block_until_ready(out)

    ref = resblock1_reference(x_btc, weights, biases)
    max_err = float(jnp.max(jnp.abs(out - ref)))
    assert jnp.allclose(out, ref, atol=2e-3, rtol=2e-3), f"max abs err {max_err}"

    _ = jnp.transpose(out, (0, 2, 1))            # back to PyTorch (B, C, T) if needed
    print("KERNEL_OK")
</pallas_src>

<mosaic_0001>
module attributes {stable_mosaic.version = 11 : i64} {
  func.func @_resblock1_kernel(%arg0: i32, %arg1: i32, %arg2: memref<1x1x96x128xf32, #tpu.memory_space<vmem>>, %arg3: memref<6x384x128xbf16, #tpu.memory_space<vmem>>, %arg4: memref<6x128xf32, #tpu.memory_space<vmem>>, %arg5: memref<1x64x128xf32, #tpu.memory_space<vmem>>, %arg6: memref<96x384xf32, #tpu.memory_space<vmem>>) attributes {dimension_semantics = [#tpu.dimension_semantics<parallel>, #tpu.dimension_semantics<parallel>], iteration_bounds = array<i64: 2, 4>, scalar_prefetch = 0 : i64, scratch_operands = 1 : i64, tpu.core_type = #tpu.core_type<tc>, window_params = [{transform_indices = @transform_0, window_bounds = array<i64: 1, 1, 96, 128>}, {pipeline_mode = #tpu.pipeline_mode<synchronous>, transform_indices = @transform_1, window_bounds = array<i64: 6, 384, 128>}, {pipeline_mode = #tpu.pipeline_mode<synchronous>, transform_indices = @transform_2, window_bounds = array<i64: 6, 128>}, {transform_indices = @transform_3, window_bounds = array<i64: 1, 64, 128>}]} {
    %0 = tpu.iota {dimensions = array<i32: 0>} : vector<96x1xi32>
    %c64_i32 = arith.constant 64 : i32
    %1 = arith.muli %arg1, %c64_i32 : i32
    %c16_i32 = arith.constant 16 : i32
    %2 = arith.subi %1, %c16_i32 : i32
    %3 = vector.broadcast %2 : i32 to vector<96x1xi32>
    %4 = arith.addi %0, %3 : vector<96x1xi32>
    %c0_i32 = arith.constant 0 : i32
    %5 = vector.broadcast %c0_i32 : i32 to vector<96x1xi32>
    %6 = arith.cmpi sge, %4, %5 : vector<96x1xi32>
    %c200_i32 = arith.constant 200 : i32
    %7 = vector.broadcast %c200_i32 : i32 to vector<96x1xi32>
    %8 = arith.cmpi slt, %4, %7 : vector<96x1xi32>
    %9 = arith.andi %6, %8 : vector<96x1xi1>
    %cst = arith.constant 0.000000e+00 : f32
    %10 = vector.broadcast %cst : f32 to vector<16x384xf32>
    %c0 = arith.constant 0 : index
    %c0_0 = arith.constant 0 : index
    %11 = vector.load %arg6[%c0, %c0_0] : memref<96x384xf32, #tpu.memory_space<vmem>>, vector<16x384xf32>
    tpu.vector_store %arg6[%c0, %c0_0], %10 {strides = array<i32>} : memref<96x384xf32, #tpu.memory_space<vmem>>, vector<16x384xf32>,
    %c80 = arith.constant 80 : index
    %c0_1 = arith.constant 0 : index
    %12 = vector.load %arg6[%c80, %c0_1] : memref<96x384xf32, #tpu.memory_space<vmem>>, vector<16x384xf32>
    tpu.vector_store %arg6[%c80, %c0_1], %10 {strides = array<i32>} : memref<96x384xf32, #tpu.memory_space<vmem>>, vector<16x384xf32>,
    %c0_2 = arith.constant 0 : index
    %c0_3 = arith.constant 0 : index
    %13 = vector.load %arg4[%c0_2, %c0_3] : memref<6x128xf32, #tpu.memory_space<vmem>>, vector<6x128xf32>
    %c0_4 = arith.constant 0 : index
    %c0_5 = arith.constant 0 : index
    %c0_6 = arith.constant 0 : index
    %c0_7 = arith.constant 0 : index
    %14 = vector.load %arg2[%c0_4, %c0_5, %c0_6, %c0_7] : memref<1x1x96x128xf32, #tpu.memory_space<vmem>>, vector<1x1x96x128xf32>
    %15 = vector.shape_cast %14 : vector<1x1x96x128xf32> to vector<96x128xf32>
    %cst_8 = arith.constant 0.000000e+00 : f32
    %16 = vector.broadcast %cst_8 : f32 to vector<96x128xf32>
    %17 = arith.cmpf oge, %15, %16 : vector<96x128xf32>
    %cst_9 = arith.constant 1.000000e-01 : f32
    %18 = vector.broadcast %cst_9 : f32 to vector<96x128xf32>
    %19 = arith.mulf %18, %15 : vector<96x128xf32>
    %20 = arith.select %17, %15, %19 : vector<96x128xi1>, vector<96x128xf32>
    %cst_10 = arith.constant 0.000000e+00 : f32
    %21 = vector.shape_cast %9 : vector<96x1xi1> to vector<96x1xi1>
    %22 = vector.broadcast %21 : vector<96x1xi1> to vector<96x128xi1>
    %23 = vector.broadcast %cst_10 : f32 to vector<96x128xf32>
    %24 = arith.select %22, %20, %23 : vector<96x128xi1>, vector<96x128xf32>
    %25 = vector.extract_strided_slice %24 {offsets = [0, 0], sizes = [95, 128], strides = [1, 1]} : vector<96x128xf32> to vector<95x128xf32>
    %c1 = arith.constant 1 : index
    %c0_11 = arith.constant 0 : index
    %26 = vector.load %arg6[%c1, %c0_11] : memref<96x384xf32, #tpu.memory_space<vmem>>, vector<95x128xf32>
    tpu.vector_store %arg6[%c1, %c0_11], %25 {strides = array<i32>} : memref<96x384xf32, #tpu.memory_space<vmem>>, vector<95x128xf32>,
    %c0_12 = arith.constant 0 : index
    %c128 = arith.constant 128 : index
    %27 = vector.load %arg6[%c0_12, %c128] : memref<96x384xf32, #tpu.memory_space<vmem>>, vector<96x128xf32>
    tpu.vector_store %arg6[%c0_12, %c128], %24 {strides = array<i32>} : memref<96x384xf32, #tpu.memory_space<vmem>>, vector<96x128xf32>,
    %28 = vector.extract_strided_slice %24 {offsets = [1, 0], sizes = [95, 128], strides = [1, 1]} : vector<96x128xf32> to vector<95x128xf32>
    %c0_13 = arith.constant 0 : index
    %c256 = arith.constant 256 : index
    %29 = vector.load %arg6[%c0_13, %c256] : memref<96x384xf32, #tpu.memory_space<vmem>>, vector<95x128xf32>
    tpu.vector_store %arg6[%c0_13, %c256], %28 {strides = array<i32>} : memref<96x384xf32, #tpu.memory_space<vmem>>, vector<95x128xf32>,
    %c0_14 = arith.constant 0 : index
    %c0_15 = arith.constant 0 : index
    %30 = vector.load %arg6[%c0_14, %c0_15] : memref<96x384xf32, #tpu.memory_space<vmem>>, vector<96x384xf32>
    %31 = arith.truncf %30 : vector<96x384xf32> to vector<96x384xbf16>
    %c0_16 = arith.constant 0 : index
    %c0_17 = arith.constant 0 : index
    %c0_18 = arith.constant 0 : index
    %32 = vector.load %arg3[%c0_16, %c0_17, %c0_18] : memref<6x384x128xbf16, #tpu.memory_space<vmem>>, vector<1x384x128xbf16>
    %33 = vector.shape_cast %32 : vector<1x384x128xbf16> to vector<384x128xbf16>
    %cst_19 = arith.constant dense<0.000000e+00> : vector<96x128xf32>
    %34 = tpu.matmul %31, %33, %cst_19 {dimension_numbers = #tpu.dot_dimension_numbers<[1], [0], [0], [1], [0, 0, 1, 1], [], []>} : vector<96x384xbf16>, vector<384x128xbf16>, vector<96x128xf32> -> vector<96x128xf32>
    %35 = vector.extract_strided_slice %13 {offsets = [0, 0], sizes = [1, 128], strides = [1, 1]} : vector<6x128xf32> to vector<1x128xf32>
    %36 = vector.shape_cast %35 : vector<1x128xf32> to vector<128xf32>
    %37 = vector.shape_cast %36 : vector<128xf32> to vector<1x128xf32>
    %38 = vector.broadcast %37 : vector<1x128xf32> to vector<96x128xf32>
    %39 = arith.addf %34, %38 : vector<96x128xf32>
    %cst_20 = arith.constant 0.000000e+00 : f32
    %40 = vector.broadcast %cst_20 : f32 to vector<96x128xf32>
    %41 = arith.cmpf oge, %39, %40 : vector<96x128xf32>
    %cst_21 = arith.constant 1.000000e-01 : f32
    %42 = vector.broadcast %cst_21 : f32 to vector<96x128xf32>
    %43 = arith.mulf %42, %39 : vector<96x128xf32>
    %44 = arith.select %41, %39, %43 : vector<96x128xi1>, vector<96x128xf32>
    %cst_22 = arith.constant 0.000000e+00 : f32
    %45 = vector.shape_cast %9 : vector<96x1xi1> to vector<96x1xi1>
    %46 = vector.broadcast %45 : vector<96x1xi1> to vector<96x128xi1>
    %47 = vector.broadcast %cst_22 : f32 to vector<96x128xf32>
    %48 = arith.select %46, %44, %47 : vector<96x128xi1>, vector<96x128xf32>
    %49 = vector.extract_strided_slice %48 {offsets = [0, 0], sizes = [95, 128], strides = [1, 1]} : vector<96x128xf32> to vector<95x128xf32>
    %c1_23 = arith.constant 1 : index
    %c0_24 = arith.constant 0 : index
    %50 = vector.load %arg6[%c1_23, %c0_24] : memref<96x384xf32, #tpu.memory_space<vmem>>, vector<95x128xf32>
    tpu.vector_store %arg6[%c1_23, %c0_24], %49 {strides = array<i32>} : memref<96x384xf32, #tpu.memory_space<vmem>>, vector<95x128xf32>,
    %c0_25 = arith.constant 0 : index
    %c128_26 = arith.constant 128 : index
    %51 = vector.load %arg6[%c0_25, %c128_26] : memref<96x384xf32, #tpu.memory_space<vmem>>, vector<96x128xf32>
    tpu.vector_store %arg6[%c0_25, %c128_26], %48 {strides = array<i32>} : memref<96x384xf32, #tpu.memory_space<vmem>>, vector<96x128xf32>,
    %52 = vector.extract_strided_slice %48 {offsets = [1, 0], sizes = [95, 128], strides = [1, 1]} : vector<96x128xf32> to vector<95x128xf32>
    %c0_27 = arith.constant 0 : index
    %c256_28 = arith.constant 256 : index
    %53 = vector.load %arg6[%c0_27, %c256_28] : memref<96x384xf32, #tpu.memory_space<vmem>>, vector<95x128xf32>
    tpu.vector_store %arg6[%c0_27, %c256_28], %52 {strides = array<i32>} : memref<96x384xf32, #tpu.memory_space<vmem>>, vector<95x128xf32>,
    %c0_29 = arith.constant 0 : index
    %c0_30 = arith.constant 0 : index
    %54 = vector.load %arg6[%c0_29, %c0_30] : memref<96x384xf32, #tpu.memory_space<vmem>>, vector<96x384xf32>
    %55 = arith.truncf %54 : vector<96x384xf32> to vector<96x384xbf16>
    %c1_31 = arith.constant 1 : index
    %c0_32 = arith.constant 0 : index
    %c0_33 = arith.constant 0 : index
    %56 = vector.load %arg3[%c1_31, %c0_32, %c0_33] : memref<6x384x128xbf16, #tpu.memory_space<vmem>>, vector<1x384x128xbf16>
    %57 = vector.shape_cast %56 : vector<1x384x128xbf16> to vector<384x128xbf16>
    %cst_34 = arith.constant dense<0.000000e+00> : vector<96x128xf32>
    %58 = tpu.matmul %55, %57, %cst_34 {dimension_numbers = #tpu.dot_dimension_numbers<[1], [0], [0], [1], [0, 0, 1, 1], [], []>} : vector<96x384xbf16>, vector<384x128xbf16>, vector<96x128xf32> -> vector<96x128xf32>
    %59 = vector.extract_strided_slice %13 {offsets = [1, 0], sizes = [1, 128], strides = [1, 1]} : vector<6x128xf32> to vector<1x128xf32>
    %60 = vector.shape_cast %59 : vector<1x128xf32> to vector<128xf32>
    %61 = vector.shape_cast %60 : vector<128xf32> to vector<1x128xf32>
    %62 = vector.broadcast %61 : vector<1x128xf32> to vector<96x128xf32>
    %63 = arith.addf %58, %62 : vector<96x128xf32>
    %64 = arith.addf %63, %15 : vector<96x128xf32>
    %cst_35 = arith.constant 0.000000e+00 : f32
    %65 = vector.broadcast %cst_35 : f32 to vector<96x128xf32>
    %66 = arith.cmpf oge, %64, %65 : vector<96x128xf32>
    %cst_36 = arith.constant 1.000000e-01 : f32
    %67 = vector.broadcast %cst_36 : f32 to vector<96x128xf32>
    %68 = arith.mulf %67, %64 : vector<96x128xf32>
    %69 = arith.select %66, %64, %68 : vector<96x128xi1>, vector<96x128xf32>
    %cst_37 = arith.constant 0.000000e+00 : f32
    %70 = vector.shape_cast %9 : vector<96x1xi1> to vector<96x1xi1>
    %71 = vector.broadcast %70 : vector<96x1xi1> to vector<96x128xi1>
    %72 = vector.broadcast %cst_37 : f32 to vector<96x128xf32>
    %73 = arith.select %71, %69, %72 : vector<96x128xi1>, vector<96x128xf32>
    %74 = vector.extract_strided_slice %73 {offsets = [0, 0], sizes = [93, 128], strides = [1, 1]} : vector<96x128xf32> to vector<93x128xf32>
    %c3 = arith.constant 3 : index
    %c0_38 = arith.constant 0 : index
    %75 = vector.load %arg6[%c3, %c0_38] : memref<96x384xf32, #tpu.memory_space<vmem>>, vector<93x128xf32>
    tpu.vector_store %arg6[%c3, %c0_38], %74 {strides = array<i32>} : memref<96x384xf32, #tpu.memory_space<vmem>>, vector<93x128xf32>,
    %c0_39 = arith.constant 0 : index
    %c128_40 = arith.constant 128 : index
    %76 = vector.load %arg6[%c0_39, %c128_40] : memref<96x384xf32, #tpu.memory_space<vmem>>, vector<96x128xf32>
    tpu.vector_store %arg6[%c0_39, %c128_40], %73 {strides = array<i32>} : memref<96x384xf32, #tpu.memory_space<vmem>>, vector<96x128xf32>,
    %77 = vector.extract_strided_slice %73 {offsets = [3, 0], sizes = [93, 128], strides = [1, 1]} : vector<96x128xf32> to vector<93x128xf32>
    %c0_41 = arith.constant 0 : index
    %c256_42 = arith.constant 256 : index
    %78 = vector.load %arg6[%c0_41, %c256_42] : memref<96x384xf32, #tpu.memory_space<vmem>>, vector<93x128xf32>
    tpu.vector_store %arg6[%c0_41, %c256_42], %77 {strides = array<i32>} : memref<96x384xf32, #tpu.memory_space<vmem>>, vector<93x128xf32>,
    %c0_43 = arith.constant 0 : index
    %c0_44 = arith.constant 0 : index
    %79 = vector.load %arg6[%c0_43, %c0_44] : memref<96x384xf32, #tpu.memory_space<vmem>>, vector<96x384xf32>
    %80 = arith.truncf %79 : vector<96x384xf32> to vector<96x384xbf16>
    %c2 = arith.constant 2 : index
    %c0_45 = arith.constant 0 : index
    %c0_46 = arith.constant 0 : index
    %81 = vector.load %arg3[%c2, %c0_45, %c0_46] : memref<6x384x128xbf16, #tpu.memory_space<vmem>>, vector<1x384x128xbf16>
    %82 = vector.shape_cast %81 : vector<1x384x128xbf16> to vector<384x128xbf16>
    %cst_47 = arith.constant dense<0.000000e+00> : vector<96x128xf32>
    %83 = tpu.matmul %80, %82, %cst_47 {dimension_numbers = #tpu.dot_dimension_numbers<[1], [0], [0], [1], [0, 0, 1, 1], [], []>} : vector<96x384xbf16>, vector<384x128xbf16>, vector<96x128xf32> -> vector<96x128xf32>
    %84 = vector.extract_strided_slice %13 {offsets = [2, 0], sizes = [1, 128], strides = [1, 1]} : vector<6x128xf32> to vector<1x128xf32>
    %85 = vector.shape_cast %84 : vector<1x128xf32> to vector<128xf32>
    %86 = vector.shape_cast %85 : vector<128xf32> to vector<1x128xf32>
    %87 = vector.broadcast %86 : vector<1x128xf32> to vector<96x128xf32>
    %88 = arith.addf %83, %87 : vector<96x128xf32>
    %cst_48 = arith.constant 0.000000e+00 : f32
    %89 = vector.broadcast %cst_48 : f32 to vector<96x128xf32>
    %90 = arith.cmpf oge, %88, %89 : vector<96x128xf32>
    %cst_49 = arith.constant 1.000000e-01 : f32
    %91 = vector.broadcast %cst_49 : f32 to vector<96x128xf32>
    %92 = arith.mulf %91, %88 : vector<96x128xf32>
    %93 = arith.select %90, %88, %92 : vector<96x128xi1>, vector<96x128xf32>
    %cst_50 = arith.constant 0.000000e+00 : f32
    %94 = vector.shape_cast %9 : vector<96x1xi1> to vector<96x1xi1>
    %95 = vector.broadcast %94 : vector<96x1xi1> to vector<96x128xi1>
    %96 = vector.broadcast %cst_50 : f32 to vector<96x128xf32>
    %97 = arith.select %95, %93, %96 : vector<96x128xi1>, vector<96x128xf32>
    %98 = vector.extract_strided_slice %97 {offsets = [0, 0], sizes = [95, 128], strides = [1, 1]} : vector<96x128xf32> to vector<95x128xf32>
    %c1_51 = arith.constant 1 : index
    %c0_52 = arith.constant 0 : index
    %99 = vector.load %arg6[%c1_51, %c0_52] : memref<96x384xf32, #tpu.memory_space<vmem>>, vector<95x128xf32>
    tpu.vector_store %arg6[%c1_51, %c0_52], %98 {strides = array<i32>} : memref<96x384xf32, #tpu.memory_space<vmem>>, vector<95x128xf32>,
    %c0_53 = arith.constant 0 : index
    %c128_54 = arith.constant 128 : index
    %100 = vector.load %arg6[%c0_53, %c128_54] : memref<96x384xf32, #tpu.memory_space<vmem>>, vector<96x128xf32>
    tpu.vector_store %arg6[%c0_53, %c128_54], %97 {strides = array<i32>} : memref<96x384xf32, #tpu.memory_space<vmem>>, vector<96x128xf32>,
    %101 = vector.extract_strided_slice %97 {offsets = [1, 0], sizes = [95, 128], strides = [1, 1]} : vector<96x128xf32> to vector<95x128xf32>
    %c0_55 = arith.constant 0 : index
    %c256_56 = arith.constant 256 : index
    %102 = vector.load %arg6[%c0_55, %c256_56] : memref<96x384xf32, #tpu.memory_space<vmem>>, vector<95x128xf32>
    tpu.vector_store %arg6[%c0_55, %c256_56], %101 {strides = array<i32>} : memref<96x384xf32, #tpu.memory_space<vmem>>, vector<95x128xf32>,
    %c0_57 = arith.constant 0 : index
    %c0_58 = arith.constant 0 : index
    %103 = vector.load %arg6[%c0_57, %c0_58] : memref<96x384xf32, #tpu.memory_space<vmem>>, vector<96x384xf32>
    %104 = arith.truncf %103 : vector<96x384xf32> to vector<96x384xbf16>
    %c3_59 = arith.constant 3 : index
    %c0_60 = arith.constant 0 : index
    %c0_61 = arith.constant 0 : index
    %105 = vector.load %arg3[%c3_59, %c0_60, %c0_61] : memref<6x384x128xbf16, #tpu.memory_space<vmem>>, vector<1x384x128xbf16>
    %106 = vector.shape_cast %105 : vector<1x384x128xbf16> to vector<384x128xbf16>
    %cst_62 = arith.constant dense<0.000000e+00> : vector<96x128xf32>
    %107 = tpu.matmul %104, %106, %cst_62 {dimension_numbers = #tpu.dot_dimension_numbers<[1], [0], [0], [1], [0, 0, 1, 1], [], []>} : vector<96x384xbf16>, vector<384x128xbf16>, vector<96x128xf32> -> vector<96x128xf32>
    %108 = vector.extract_strided_slice %13 {offsets = [3, 0], sizes = [1, 128], strides = [1, 1]} : vector<6x128xf32> to vector<1x128xf32>
    %109 = vector.shape_cast %108 : vector<1x128xf32> to vector<128xf32>
    %110 = vector.shape_cast %109 : vector<128xf32> to vector<1x128xf32>
    %111 = vector.broadcast %110 : vector<1x128xf32> to vector<96x128xf32>
    %112 = arith.addf %107, %111 : vector<96x128xf32>
    %113 = arith.addf %112, %64 : vector<96x128xf32>
    %cst_63 = arith.constant 0.000000e+00 : f32
    %114 = vector.broadcast %cst_63 : f32 to vector<96x128xf32>
    %115 = arith.cmpf oge, %113, %114 : vector<96x128xf32>
    %cst_64 = arith.constant 1.000000e-01 : f32
    %116 = vector.broadcast %cst_64 : f32 to vector<96x128xf32>
    %117 = arith.mulf %116, %113 : vector<96x128xf32>
    %118 = arith.select %115, %113, %117 : vector<96x128xi1>, vector<96x128xf32>
    %cst_65 = arith.constant 0.000000e+00 : f32
    %119 = vector.shape_cast %9 : vector<96x1xi1> to vector<96x1xi1>
    %120 = vector.broadcast %119 : vector<96x1xi1> to vector<96x128xi1>
    %121 = vector.broadcast %cst_65 : f32 to vector<96x128xf32>
    %122 = arith.select %120, %118, %121 : vector<96x128xi1>, vector<96x128xf32>
    %123 = vector.extract_strided_slice %122 {offsets = [0, 0], sizes = [91, 128], strides = [1, 1]} : vector<96x128xf32> to vector<91x128xf32>
    %c5 = arith.constant 5 : index
    %c0_66 = arith.constant 0 : index
    %124 = vector.load %arg6[%c5, %c0_66] : memref<96x384xf32, #tpu.memory_space<vmem>>, vector<91x128xf32>
    tpu.vector_store %arg6[%c5, %c0_66], %123 {strides = array<i32>} : memref<96x384xf32, #tpu.memory_space<vmem>>, vector<91x128xf32>,
    %c0_67 = arith.constant 0 : index
    %c128_68 = arith.constant 128 : index
    %125 = vector.load %arg6[%c0_67, %c128_68] : memref<96x384xf32, #tpu.memory_space<vmem>>, vector<96x128xf32>
    tpu.vector_store %arg6[%c0_67, %c128_68], %122 {strides = array<i32>} : memref<96x384xf32, #tpu.memory_space<vmem>>, vector<96x128xf32>,
    %126 = vector.extract_strided_slice %122 {offsets = [5, 0], sizes = [91, 128], strides = [1, 1]} : vector<96x128xf32> to vector<91x128xf32>
    %c0_69 = arith.constant 0 : index
    %c256_70 = arith.constant 256 : index
    %127 = vector.load %arg6[%c0_69, %c256_70] : memref<96x384xf32, #tpu.memory_space<vmem>>, vector<91x128xf32>
    tpu.vector_store %arg6[%c0_69, %c256_70], %126 {strides = array<i32>} : memref<96x384xf32, #tpu.memory_space<vmem>>, vector<91x128xf32>,
    %c0_71 = arith.constant 0 : index
    %c0_72 = arith.constant 0 : index
    %128 = vector.load %arg6[%c0_71, %c0_72] : memref<96x384xf32, #tpu.memory_space<vmem>>, vector<96x384xf32>
    %129 = arith.truncf %128 : vector<96x384xf32> to vector<96x384xbf16>
    %c4 = arith.constant 4 : index
    %c0_73 = arith.constant 0 : index
    %c0_74 = arith.constant 0 : index
    %130 = vector.load %arg3[%c4, %c0_73, %c0_74] : memref<6x384x128xbf16, #tpu.memory_space<vmem>>, vector<1x384x128xbf16>
    %131 = vector.shape_cast %130 : vector<1x384x128xbf16> to vector<384x128xbf16>
    %cst_75 = arith.constant dense<0.000000e+00> : vector<96x128xf32>
    %132 = tpu.matmul %129, %131, %cst_75 {dimension_numbers = #tpu.dot_dimension_numbers<[1], [0], [0], [1], [0, 0, 1, 1], [], []>} : vector<96x384xbf16>, vector<384x128xbf16>, vector<96x128xf32> -> vector<96x128xf32>
    %133 = vector.extract_strided_slice %13 {offsets = [4, 0], sizes = [1, 128], strides = [1, 1]} : vector<6x128xf32> to vector<1x128xf32>
    %134 = vector.shape_cast %133 : vector<1x128xf32> to vector<128xf32>
    %135 = vector.shape_cast %134 : vector<128xf32> to vector<1x128xf32>
    %136 = vector.broadcast %135 : vector<1x128xf32> to vector<96x128xf32>
    %137 = arith.addf %132, %136 : vector<96x128xf32>
    %cst_76 = arith.constant 0.000000e+00 : f32
    %138 = vector.broadcast %cst_76 : f32 to vector<96x128xf32>
    %139 = arith.cmpf oge, %137, %138 : vector<96x128xf32>
    %cst_77 = arith.constant 1.000000e-01 : f32
    %140 = vector.broadcast %cst_77 : f32 to vector<96x128xf32>
    %141 = arith.mulf %140, %137 : vector<96x128xf32>
    %142 = arith.select %139, %137, %141 : vector<96x128xi1>, vector<96x128xf32>
    %cst_78 = arith.constant 0.000000e+00 : f32
    %143 = vector.shape_cast %9 : vector<96x1xi1> to vector<96x1xi1>
    %144 = vector.broadcast %143 : vector<96x1xi1> to vector<96x128xi1>
    %145 = vector.broadcast %cst_78 : f32 to vector<96x128xf32>
    %146 = arith.select %144, %142, %145 : vector<96x128xi1>, vector<96x128xf32>
    %147 = vector.extract_strided_slice %146 {offsets = [0, 0], sizes = [95, 128], strides = [1, 1]} : vector<96x128xf32> to vector<95x128xf32>
    %c1_79 = arith.constant 1 : index
    %c0_80 = arith.constant 0 : index
    %148 = vector.load %arg6[%c1_79, %c0_80] : memref<96x384xf32, #tpu.memory_space<vmem>>, vector<95x128xf32>
    tpu.vector_store %arg6[%c1_79, %c0_80], %147 {strides = array<i32>} : memref<96x384xf32, #tpu.memory_space<vmem>>, vector<95x128xf32>,
    %c0_81 = arith.constant 0 : index
    %c128_82 = arith.constant 128 : index
    %149 = vector.load %arg6[%c0_81, %c128_82] : memref<96x384xf32, #tpu.memory_space<vmem>>, vector<96x128xf32>
    tpu.vector_store %arg6[%c0_81, %c128_82], %146 {strides = array<i32>} : memref<96x384xf32, #tpu.memory_space<vmem>>, vector<96x128xf32>,
    %150 = vector.extract_strided_slice %146 {offsets = [1, 0], sizes = [95, 128], strides = [1, 1]} : vector<96x128xf32> to vector<95x128xf32>
    %c0_83 = arith.constant 0 : index
    %c256_84 = arith.constant 256 : index
    %151 = vector.load %arg6[%c0_83, %c256_84] : memref<96x384xf32, #tpu.memory_space<vmem>>, vector<95x128xf32>
    tpu.vector_store %arg6[%c0_83, %c256_84], %150 {strides = array<i32>} : memref<96x384xf32, #tpu.memory_space<vmem>>, vector<95x128xf32>,
    %c0_85 = arith.constant 0 : index
    %c0_86 = arith.constant 0 : index
    %152 = vector.load %arg6[%c0_85, %c0_86] : memref<96x384xf32, #tpu.memory_space<vmem>>, vector<96x384xf32>
    %153 = arith.truncf %152 : vector<96x384xf32> to vector<96x384xbf16>
    %c5_87 = arith.constant 5 : index
    %c0_88 = arith.constant 0 : index
    %c0_89 = arith.constant 0 : index
    %154 = vector.load %arg3[%c5_87, %c0_88, %c0_89] : memref<6x384x128xbf16, #tpu.memory_space<vmem>>, vector<1x384x128xbf16>
    %155 = vector.shape_cast %154 : vector<1x384x128xbf16> to vector<384x128xbf16>
    %cst_90 = arith.constant dense<0.000000e+00> : vector<96x128xf32>
    %156 = tpu.matmul %153, %155, %cst_90 {dimension_numbers = #tpu.dot_dimension_numbers<[1], [0], [0], [1], [0, 0, 1, 1], [], []>} : vector<96x384xbf16>, vector<384x128xbf16>, vector<96x128xf32> -> vector<96x128xf32>
    %157 = vector.extract_strided_slice %13 {offsets = [5, 0], sizes = [1, 128], strides = [1, 1]} : vector<6x128xf32> to vector<1x128xf32>
    %158 = vector.shape_cast %157 : vector<1x128xf32> to vector<128xf32>
    %159 = vector.shape_cast %158 : vector<128xf32> to vector<1x128xf32>
    %160 = vector.broadcast %159 : vector<1x128xf32> to vector<96x128xf32>
    %161 = arith.addf %156, %160 : vector<96x128xf32>
    %162 = arith.addf %161, %113 : vector<96x128xf32>
    %163 = vector.extract_strided_slice %162 {offsets = [16, 0], sizes = [64, 128], strides = [1, 1]} : vector<96x128xf32> to vector<64x128xf32>
    %c0_91 = arith.constant 0 : index
    %c0_92 = arith.constant 0 : index
    %c0_93 = arith.constant 0 : index
    %164 = vector.load %arg5[%c0_91, %c0_92, %c0_93] : memref<1x64x128xf32, #tpu.memory_space<vmem>>, vector<1x64x128xf32>
    %165 = vector.shape_cast %164 : vector<1x64x128xf32> to vector<64x128xf32>
    %166 = vector.shape_cast %163 : vector<64x128xf32> to vector<1x64x128xf32>
    tpu.vector_store %arg5[%c0_91, %c0_92, %c0_93], %166 {strides = array<i32>} : memref<1x64x128xf32, #tpu.memory_space<vmem>>, vector<1x64x128xf32>,
    return
  }
  func.func @transform_0(%arg0: i32, %arg1: i32) -> (i32, i32, i32, i32) {
    %c0_i32 = arith.constant 0 : i32
    %c0_i32_0 = arith.constant 0 : i32
    %c0_i32_1 = arith.constant 0 : i32
    return %arg0, %arg1, %c0_i32, %c0_i32_0 : i32, i32, i32, i32
  }
  func.func @transform_1(%arg0: i32, %arg1: i32) -> (i32, i32, i32) {
    %c0_i32 = arith.constant 0 : i32
    %c0_i32_0 = arith.constant 0 : i32
    %c0_i32_1 = arith.constant 0 : i32
    %c0_i32_2 = arith.constant 0 : i32
    return %c0_i32, %c0_i32_0, %c0_i32_1 : i32, i32, i32
  }
  func.func @transform_2(%arg0: i32, %arg1: i32) -> (i32, i32) {
    %c0_i32 = arith.constant 0 : i32
    %c0_i32_0 = arith.constant 0 : i32
    %c0_i32_1 = arith.constant 0 : i32
    return %c0_i32, %c0_i32_0 : i32, i32
  }
  func.func @transform_3(%arg0: i32, %arg1: i32) -> (i32, i32, i32) {
    %c0_i32 = arith.constant 0 : i32
    %c0_i32_0 = arith.constant 0 : i32
    return %arg0, %arg1, %c0_i32 : i32, i32, i32
  }
}

</mosaic_0001>

<bundles_post_ra>
// kernel: tpu_custom_call.1
= control target key start
LH: loop header
LB: loop body
LE: loop exit
PB: predicated region body
PF: predicated region fallthrough
CT: control target
= control target key end

     0   :  { %s6499_s0 = inlined_call_operand.hbm [shape: f32[2,4,96,128], index: 0, kind: input, shape index: {}]   ;;  %s6500_s1 = inlined_call_operand.hbm [shape: bf16[6,384,128], index: 1, kind: input, shape index: {}]   ;;  %s6501_s2 = inlined_call_operand.hbm [shape: f32[6,128], index: 2, kind: input, shape index: {}]   ;;  %s6502_s3 = inlined_call_operand.hbm [shape: f32[2,256,128], index: 3, kind: output, shape index: {}]  }
   0x1   :  { %6555 = sst [smem:[#allocation19_spill]] %s6500_s1 }
   0x2   :  { %6556 = sst [smem:[#allocation20_spill]] %s6501_s2 }
   0x3   :  { %8 = vsyncpa [#allocation4], 0 }
   0x4   :  { %10 = vsyncpa [#allocation4 + $0x1], 0 }
   0x5   :  { %11 = vsyncpa [#allocation7], 0 }
   0x6   :  { %12 = vsyncpa [#allocation5], 0 }
   0x7   :  { %14 = vsyncpa [#allocation5 + $0x1], 0  ;;  %s5299_s12 = smov 0   ;;  %s5301_s13 = smov 0  }
   0x8   :  { %s5303_s14 = smov 0   ;;  %s5305_s15 = smov 0  }
   0x9   :  { %s5307_s16 = smov 0   ;;  %s5309_s17 = smov 0  }
   0xa   :  { %s5311_s18 = smov 0   ;;  %s5313_s19 = smov 0  }
   0xb LB: > { %6557 = sst [smem:[#allocation13_spill]] %s5238_s12  ;;  %s3983_s20 = sadd.s32 4294967295, %s5266_s19   ;;  %s5266_s19 = sphi %s5313_s19, %s20_s19   ;;  %s5262_s18 = sphi %s5311_s18, %s6784_s18   ;;  %s5258_s17 = sphi %s5309_s17, %s6783_s17   ;;  %s5254_s16 = sphi %s5307_s16, %s6782_s16   ;;  %s5250_s15 = sphi %s5305_s15, %s6781_s15   ;;  %s5246_s14 = sphi %s5303_s14, %s6780_s14   ;;  %s5242_s13 = sphi %s5301_s13, %s6779_s13   ;;  %s5238_s12 = sphi %s5299_s12, %s6778_s12  }
   0xc   : > { %s3984_s21 = sadd.s32 4294967294, %s5266_s19   ;;  %p54_p0 = scmp.ne.s32.totalorder %s5242_s13, %s5238_s12 }
   0xd   : > { %p5343_p1 = scmp.eq.s32.totalorder %s3983_s20, 0  ;;  %p5347_p2 = scmp.eq.s32.totalorder %s3983_s20, 7 }
   0xe   : > { %p128_p3 = scmp.eq.s32.totalorder %s3984_s21, 7  ;;  %p3985_p5 = scmp.ge.s32.totalorder %s5266_s19, 1 }
   0xf   : > { %s6558_s22 = scalar_select %p5343_p1, 1, 0 }
  0x10   : > { %p5353_p4 = por %p5343_p1, %p54_p0  ;;  %p5358_p6 = por %p128_p3, %p54_p0 }
  0x11   : > { %p135_p7 = scmp.lt.s32.totalorder %s5266_s19, 9  ;;  %s5268_s27 = smov [#allocation6]  }
  0x12   : > { %s6560_s24 = scalar_select %p5353_p4, 1, 0 }
  0x13   : > { %s6561_s25 = scalar_select %p5358_p6, 1, 0 }
  0x14   : > { %p5363_p8 = pnand %p3985_p5, %p135_p7  ;;  %s147_s28 = sshll.u32 %s5268_s27, 4  ;;  %s148_s28 = int_to_ptr.vmem [resolvable:$true] %s147_s28 }
  0x15   : > { %6562 = sst [smem:[#allocation14_spill]] %s6561_s25  ;;  %s5269_s30 = smov [#allocation8]  }
  0x16   : > { %p4726_p9 = pneg %p5363_p8  ;;  %s161_s4 = sshll.u32 %s5269_s30, 4  ;;  %s162_s4 = int_to_ptr.vmem [resolvable:$true] %s161_s4 }
  0x17   : > { %s5097_s5 = scalar_lea.vmem %s148_s28, 18432  ;;  %p5105_p3 = scmp.lt.s32.totalorder %s148_s28, %s148_s28 }
  0x18   : > { %p5371_p10 = pnand %p4726_p9, %p5343_p1  ;;  %p5098_p12 = scmp.ne.s32.totalorder %s148_s28, %s5097_s5 }
  0x19   : > { %p5106_p5 = scmp.lt.s32.totalorder %s5097_s5, %s5097_s5 }
  0x1a   : > { %p5088_p11 = pneg %p5371_p10 }
  0x1b   : > { %p5107_p7 = por %p5106_p5, %p5105_p3 }
  0x1c   : > { %p5100_p13 = pnand %p5098_p12, %p5088_p11 }
  0x1e   : > { %p5101_p0 = pneg %p5100_p13 }
  0x20   : > { %p5108_p9 = pnand %p5107_p7, %p5101_p0 }
  0x22   : > { %5111 = shalt.err (!%p5108_p9)
}
  0x23   : > { %s5270_s6 = smov 64   ;;  %s5271_s7 = smov 4  }
  0x24   : > { %s6565_s1 = sld [smem:[#allocation19_spill]]  ;;  %s5123_s10 = scalar_lea.vmem %s162_s4, 128 }
  0x25   : > { %p5124_p6 = scmp.ne.s32.totalorder %s162_s4, %s5123_s10  ;;  %p5131_p1 = scmp.lt.s32.totalorder %s162_s4, %s162_s4 }
  0x26   : > { %p5132_p4 = scmp.lt.s32.totalorder %s5123_s10, %s5123_s10 }
  0x27   : > { %p5126_p12 = pnand %p5124_p6, %p5088_p11 }
  0x28   : > { %p5133_p3 = por %p5132_p4, %p5131_p1 }
  0x29   : > { %p5127_p13 = pneg %p5126_p12 }
  0x2a   : > { %4729 = dma.hbm_to_vmem [thread:$0]  (!%p5371_p10), %s6565_s1, 18432, %s148_s28, [#allocation7], %s5270_s6, %s5270_s6, %s5271_s7  }
  0x2b   : > { %p5134_p0 = pnand %p5133_p3, %p5127_p13 }
  0x2d   : > { %5137 = shalt.err (!%p5134_p0)
}
  0x2e   : > { %s6566_s2 = sld [smem:[#allocation20_spill]]  ;;  %s29_s21 = sadd.s32 1, %s5258_s17 }
  0x2f   : > { %s32_s27 = sadd.s32 1, %s5262_s18  ;;  %p30_p1 = scmp.ge.s32.totalorder %s29_s21, 4 }
  0x30   : > { %s41_s28 = sadd.s32 1, %s5246_s14  ;;  %p48_p4 = scmp.ne.s32.totalorder %s5246_s14, %s5242_s13 }
  0x31   : > { %p49_p6 = scmp.eq.s32.totalorder %s5266_s19, 0  ;;  %s6786_s21 = smov (%p30_p1, %s29_s21), 0 }
  0x32   : > { %6567 = sst [smem:[#allocation15_spill]] %s6786_s21  ;;  %s6788_s27 = smov (!%p30_p1, %s32_s27), %s5262_s18 }
  0x33   : > { %s37_s29 = ssub.s32 %s5258_s17, %s6786_s21  ;;  %p5404_p11 = por %p49_p6, %p48_p4 }
  0x34   : > { %4732 = dma.hbm_to_vmem [thread:$0]  (!%p5371_p10), %s6566_s2, 128, %s162_s4, [#allocation7]  }
  0x35   : > { %p34_p10 = scmp.ge.s32.totalorder %s6788_s27, 2  ;;  %p5410_p5 = por %p5347_p2, %p48_p4 }
  0x36   : > { %p4743_p7 = scmp.lt.s32.totalorder %s5266_s19, 8  ;;  %s172_s5 = sand.u32 1, %s5246_s14  }
  0x37   : > { %s6790_s27 = smov (%p34_p10, %s6788_s27), 0  ;;  %s4710_s6 = smul.u32 96, %s172_s5 }
  0x38   : > { %6570 = sst [smem:[#allocation16_spill]] %s6790_s27  ;;  %s36_s7 = ssub.s32 %s5262_s18, %s6790_s27 }
  0x39   : > { %s4711_s8 = smul.u32 12, %s5258_s17  ;;  %s38_s9 = sor.u32 %s37_s29, %s36_s7 }
  0x3a   : > { %p39_p9 = scmp.eq.s32.totalorder %s38_s9, 0  ;;  %s4712_s10 = smul.u32 48, %s5262_s18 }
  0x3b   : > { %s176_s11 = scalar_lea.vmem [#allocation3], %s4710_s6  ;;  %p5424_p12 = pnand %p4743_p7, %p5404_p11 }
  0x3c   : > { %s185_s20 = sshll.u32 %s176_s11, 4  ;;  %s182_s2 = sadd.s32 %s4712_s10, %s4711_s8  ;;  %s186_s20 = int_to_ptr.vmem [resolvable:$true] %s185_s20 }
  0x3d   : > { %s5429_s1 = scalar_select %p39_p9, %s5246_s14, %s41_s28  }
  0x3e   : > { %s3989_s21 = sshll.u32 %s182_s2, 7  ;;  %s173_s29 = scalar_lea.sflag [#allocation4], %s172_s5 }
  0x3f   : > { %s184_s27 = scalar_lea.hbm %s6499_s0, %s3989_s21  ;;  %p5140_p2 = pneg %p5424_p12 }
  0x40   : > { %s5151_s6 = scalar_lea.vmem %s186_s20, 1536  ;;  %s5272_s30 = smov [#allocation3]  }
  0x41   : > { %p5152_p13 = scmp.ne.s32.totalorder %s186_s20, %s5151_s6  ;;  %s5156_s7 = sshll.u32 %s5272_s30, 4  ;;  %s5157_s7 = int_to_ptr.vmem [resolvable:$false] %s5156_s7 }
  0x42   : > { %s5158_s9 = scalar_lea.vmem %s5157_s7, 3072  ;;  %p5159_p1 = scmp.lt.s32.totalorder %s186_s20, %s5157_s7 }
  0x43   : > { %p5154_p3 = pnand %p5152_p13, %p5140_p2  ;;  %p5160_p4 = scmp.lt.s32.totalorder %s5158_s9, %s5151_s6 }
  0x45   : > { %p5155_p0 = pneg %p5154_p3  ;;  %p5161_p6 = por %p5160_p4, %p5159_p1 }
  0x47   : > { %p5162_p11 = pnand %p5161_p6, %p5155_p0 }
  0x49   : > { %5165 = shalt.err (!%p5162_p11)
}
  0x4a   : > { %s5273_s2 = smov 128   ;;  %s5274_s12 = smov 8  }
  0x4b   : > { %4736 = dma.hbm_to_vmem [thread:$0]  (!%p5424_p12), %s184_s27, 1536, %s186_s20, %s173_s29, %s5273_s2, %s5273_s2, %s5274_s12  }
  0x4c   : > { %197 = sbr.rel (%p5363_p8) target bundleno = 1491 (0x5d3), region = 32 }
  0x51   : > { %s5441_s25 = sand.u32 1, %s5242_s13   ;;  %p6572_p10 = scmp.ne.s32.totalorder %s6560_s24, 0 }
  0x52   : > { %s4713_s21 = smul.u32 96, %s5441_s25  ;;  %s200_s28 = scalar_lea.sflag [#allocation4], %s5441_s25 }
  0x54   : > { %s5445_s5 = scalar_lea.vmem [#allocation3], %s4713_s21 }
  0x55   : > { %5225 = dma.done.wait (%p6572_p10), %s200_s28, 1536  }
  0x56   : > { %5227 = vsyncadd (%p6572_p10), %s200_s28, 4294965760  ;;  %p6573_p7 = scmp.ne.s32.totalorder %s6558_s22, 0 }
  0x58   : > { %5229 = dma.done.wait (%p6573_p7), [#allocation7], 18560  }
  0x59   : > { %5231 = vsyncadd (%p6573_p7), [#allocation7], 4294948736  ;;  %v5275_v0 = vmov 0.0   ;;  %v4820_v1 = vld [vmem:[#allocation6 + $0x78] sm:$0xff]   ;;  %s3994_s26 = sshll.u32 %s5250_s15, 6  ;;  %v236_v3 = vlaneseq  ;;  %v4823_v5 = vld [vmem:[#allocation6 + $0x70] sm:$0xff]  }
  0x5a   : > { %300 = vst [vmem:[#allocation2 + $0x68] sm:$0xff] %v5275_v0  ;;  %311 = vst [vmem:[#allocation2 + $0xd8] sm:$0xff] %v5275_v0  ;;  %v4821_v2 = vld [vmem:[#allocation6 + $0x38] sm:$0xff]   ;;  %4146 = vmatprep.subr.bf16.mxu0 %v4820_v1  ;;  %s3995_s24 = sadd.s32 4294967280, %s3994_s26  ;;  %v4824_v6 = vld [vmem:[#allocation6 + $0x30] sm:$0xff]   ;;  %vm6518_vm8 = vcmask 1046528  }
  0x5b   : > { %v4822_v4 = vld [vmem:[#allocation6 + $0xb8] sm:$0xff]   ;;  %4147 = vmatpush3.bf16.msra.mxu0 %v4821_v2  ;;  %v4825_v7 = vld [vmem:[#allocation6 + $0xb0] sm:$0xff]   ;;  %v5456_v8 = vshrl.u32 %v236_v3, 7  ;;  %v4826_v9 = vld [vmem:[#allocation6 + $0x68] sm:$0xff]   ;;  %v5458_v10 = vstv %s3995_s24  ;;  %v6574_v43 = vmov 0  ;;  %v6576_v48 = vmov 0 }
  0x5c   : > { %4542 = vmatprep.subr.bf16.mxu1 %v4822_v4  ;;  %4148 = vmatprep.subr.bf16.mxu0 %v4823_v5  ;;  %v4827_v11 = vld [vmem:[#allocation6 + $0x28] sm:$0xff]   ;;  %v4829_v15 = vld [vmem:[#allocation6 + $0x60] sm:$0xff]   ;;  %v4832_v23 = vld [vmem:[#allocation6 + $0x58] sm:$0xff]   ;;  %v6578_v63 = vmov 0  ;;  %vm6589_vm13 = vcmask 1040384   ;;  %s3993_s22 = sshll.u32 %s5441_s25, 6 }
  0x5d   : > { %4543 = vmatpush3.bf16.msra.mxu1 %v4822_v4  ;;  %v238_v12 = vadd.s32 8, %v5456_v8  ;;  %v4828_v13 = vld [vmem:[#allocation6 + $0xa8] sm:$0xff]   ;;  %v239_v14 = vadd.s32 16, %v5456_v8  ;;  %v252_v16 = vadd.s32 %v5458_v10, %v5456_v8  ;;  %v240_v17 = vadd.s32 24, %v5456_v8  ;;  %v4830_v18 = vld [vmem:[#allocation6 + $0x20] sm:$0xff]   ;;  %v4834_v27 = vld [vmem:[#allocation6 + $0x98] sm:$0xff]  }
  0x5e   : > { %4544 = vmatprep.subr.bf16.mxu1 %v4825_v7  ;;  %v241_v19 = vadd.s32 32, %v5456_v8  ;;  %v4831_v20 = vld [vmem:[#allocation6 + $0xa0] sm:$0xff]   ;;  %v242_v22 = vadd.s32 40, %v5456_v8  ;;  %v243_v24 = vadd.s32 48, %v5456_v8  ;;  %v244_v26 = vadd.s32 56, %v5456_v8  ;;  %v4833_v29 = vld [vmem:[#allocation6 + $0x18] sm:$0xff]  }
  0x5f   : > { %4149 = vmatpush3.bf16.msra.mxu0 %v4824_v6  ;;  %v253_v21 = vadd.s32 %v5458_v10, %v238_v12  ;;  %vm264_vm0 = vcmp.ge.s32.totalorder %v252_v16, 0  ;;  %v5470_v25 = vadd.s32 %v5458_v10, %v239_v14  ;;  %vm276_vm1 = vcmp.lt.s32.totalorder %v252_v16, 200  ;;  %v4835_v31 = vld [vmem:[#allocation6 + $0x50] sm:$0xff]   ;;  %v4838_v34 = vld [vmem:[#allocation6 + $0x48] sm:$0xff]   ;;  %v4841_v41 = vld [vmem:[#allocation6 + $0x40] sm:$0xff]   ;;  %s6415_s27 = scalar_lea.vmem [#allocation9], %s3993_s22 }
  0x60   : > { %4150 = vmatprep.subr.bf16.mxu0 %v4826_v9  ;;  %v5474_v28 = vadd.s32 %v5458_v10, %v240_v17  ;;  %v5477_v30 = vadd.s32 %v5458_v10, %v241_v19  ;;  %v4837_v32 = vld [vmem:[#allocation6 + $0x90] sm:$0xff]   ;;  %v5484_v35 = vadd.s32 %v5458_v10, %v242_v22  ;;  %v5487_v36 = vadd.s32 %v5458_v10, %v243_v24  ;;  %v4839_v38 = vld [vmem:[#allocation6 + $0x8] sm:$0xff]   ;;  %vm5498_vm11 = vmand %vm264_vm0, %vm276_vm1  ;;  %s4141_s8 = sshll.u32 %s5250_s15, 3  ;;  %s4142_s10 = sshll.u32 %s5254_s16, 5 }
  0x61   : > { %4545 = vmatpush3.bf16.msra.mxu1 %v4825_v7  ;;  %vm265_vm2 = vcmp.ge.s32.totalorder %v253_v21, 0  ;;  %vm277_vm3 = vcmp.lt.s32.totalorder %v253_v21, 200  ;;  %vm266_vm4 = vcmp.ge.s32.totalorder %v5470_v25, 0  ;;  %vm278_vm5 = vcmp.lt.s32.totalorder %v5470_v25, 200  ;;  %v4836_v33 = vld [vmem:[#allocation6 + $0x10] sm:$0xff]   ;;  %v4840_v39 = vld [vmem:[#allocation6 + $0x88] sm:$0xff]   ;;  %s3871_s11 = sadd.s32 %s4142_s10, %s4141_s8 }
  0x62   : > { %4546 = vmatprep.subr.bf16.mxu1 %v4828_v13  ;;  %vm267_vm6 = vcmp.ge.s32.totalorder %v5474_v28, 0  ;;  %vm268_vm7 = vcmp.ge.s32.totalorder %v5477_v30, 0  ;;  %v245_v37 = vadd.s32 64, %v5456_v8  ;;  %vm279_vm9 = vcmp.lt.s32.totalorder %v5474_v28, 200  ;;  %v313_v44 = vld [vmem:[%s5445_s5] sm:$0xff]  ;;  %v314_v45 = vld [vmem:[%s5445_s5 + $0x8] sm:$0xff]  ;;  %vm5512_vm15 = vmand %vm265_vm2, %vm277_vm3 }
  0x63   : > { %4151 = vmatpush3.bf16.msra.mxu0 %v4827_v11  ;;  %v246_v40 = vadd.s32 72, %v5456_v8  ;;  %vm280_vm10 = vcmp.lt.s32.totalorder %v5477_v30, 200  ;;  %v5494_v42 = vadd.s32 %v5458_v10, %v244_v26  ;;  %v6575_v43 = vsel %vm5498_vm11, 4294967295, %v6574_v43  ;;  %v4843_v51 = vld [vmem:[#allocation6 + $0x80] sm:$0xff]   ;;  %v315_v52 = vld [vmem:[%s5445_s5 + $0x10] sm:$0xff]  ;;  %v316_v53 = vld [vmem:[%s5445_s5 + $0x18] sm:$0xff] }
  0x64   : > { %4152 = vmatprep.subr.bf16.mxu0 %v4829_v15  ;;  %v5507_v46 = vadd.s32 %v5458_v10, %v245_v37  ;;  %v247_v47 = vadd.s32 80, %v5456_v8  ;;  %v6577_v48 = vsel %vm5512_vm15, 4294967295, %v6576_v48  ;;  %vm325_vm0 = vcmp.ge.f32.partialorder %v313_v44, 0.0  ;;  %v4842_v56 = vld [vmem:[#allocation6] sm:$0xff]   ;;  %v318_v5 = vld [vmem:[%s5445_s5 + $0x28] sm:$0xff]  ;;  %vm5563_vm3 = vmand %vm268_vm7, %vm280_vm10  ;;  %s3874_s20 = sshll.u32 %s6415_s27, 4  ;;  %s6438_s20 = int_to_ptr.vmem [resolvable:$true] %s3874_s20 }
  0x65   : > { %4547 = vmatpush3.bf16.msra.mxu1 %v4828_v13  ;;  %vm326_vm1 = vcmp.ge.f32.partialorder %v314_v45, 0.0  ;;  %v337_v49 = vmul.f32 0.1, %v313_v44  ;;  %v338_v50 = vmul.f32 0.1, %v314_v45  ;;  %vm281_vm14 = vcmp.lt.s32.totalorder %v5484_v35, 200 }
  0x66   : > { %4548 = vmatprep.subr.bf16.mxu1 %v4831_v20  ;;  %vm282_vm12 = vcmp.lt.s32.totalorder %v5487_v36, 200  ;;  %v5521_v54 = vadd.s32 %v5458_v10, %v246_v40  ;;  %v248_v55 = vadd.s32 88, %v5456_v8  ;;  %vm327_vm2 = vcmp.ge.f32.partialorder %v315_v52, 0.0  ;;  %v317_v60 = vld [vmem:[%s5445_s5 + $0x20] sm:$0xff]  ;;  %v319_v12 = vld [vmem:[%s5445_s5 + $0x30] sm:$0xff]  ;;  %v320_v21 = vld [vmem:[%s5445_s5 + $0x38] sm:$0xff] }
  0x67   : > { %4153 = vmatpush3.bf16.msra.mxu0 %v4830_v18  ;;  %v349_v57 = vsel %vm325_vm0, %v313_v44, %v337_v49  ;;  %v350_v58 = vsel %vm326_vm1, %v314_v45, %v338_v50  ;;  %v339_v59 = vmul.f32 0.1, %v315_v52  ;;  %vm5537_vm0 = vmand %vm266_vm4, %vm278_vm5  ;;  %vm328_vm1 = vcmp.ge.f32.partialorder %v316_v53, 0.0  ;;  %v5596_v22 = vld [vmem:[#allocation6 + $0x178] sm:$0xff]   ;;  %v321_v37 = vld [vmem:[%s5445_s5 + $0x40] sm:$0xff]  ;;  %s4143_s15 = sshll.u32 %s3871_s11, 7 }
  0x68   : > { %4154 = vmatprep.subr.bf16.mxu0 %v4832_v23  ;;  %v385_v61 = vsel %vm5498_vm11, %v349_v57, 0.0  ;;  %v5531_v62 = vsel %vm5512_vm15, %v350_v58, 0.0  ;;  %v6579_v63 = vsel %vm5537_vm0, 4294967295, %v6578_v63  ;;  %v5544_v0 = vadd.s32 %v5458_v10, %v247_v47  ;;  %vm5551_vm4 = vmand %vm267_vm6, %vm279_vm9  ;;  %v4845_v26 = vld [vmem:[#allocation6 + $0x138] sm:$0xff]   ;;  %s6445_s29 = scalar_lea.hbm %s6502_s3, %s4143_s15  ;;  %s3859_s6 = scalar_lea.sflag [#allocation5], %s5441_s25 }
  0x69   : > { %4549 = vmatpush3.bf16.msra.mxu1 %v4831_v20  ;;  %v410_v1 = vrot.slane %v385_v61, 7  ;;  %v470_v2 = vrot.slane %v385_v61, 1  ;;  %v471_v3 = vrot.slane %v5531_v62, 1  ;;  %v6580_v4 = vmov 0  ;;  %vm5582_vm6 = vmpackc.low %vm5512_vm15, %vm5498_vm11  ;;  %s5166_s30 = scalar_lea.vmem %s6438_s20, 1024  ;;  %s5276_s7 = smov [#allocation9]  }
  0x6a   : > { %4550 = vmatprep.subr.bf16.mxu1 %v4834_v27  ;;  %v6581_v4 = vsel %vm5551_vm4, 4294967295, %v6580_v4  ;;  %vm329_vm5 = vcmp.ge.f32.partialorder %v317_v60, 0.0  ;;  %v5557_v6 = vsel %vm327_vm2, %v315_v52, %v339_v59  ;;  %v6582_v7 = vmov 0  ;;  %v4847_v59 = vld [vmem:[#allocation6 + $0x170] sm:$0xff]   ;;  %p5167_p8 = scmp.ne.s32.totalorder %s6438_s20, %s5166_s30  ;;  %s5170_s9 = sshll.u32 %s5276_s7, 4  ;;  %s5171_s9 = int_to_ptr.vmem [resolvable:$false] %s5170_s9 }
  0x6b   : > { %4155 = vmatpush3.bf16.msra.mxu0 %v4833_v29  ;;  %v6583_v7 = vsel %vm5563_vm3, 4294967295, %v6582_v7  ;;  %v340_v9 = vmul.f32 0.1, %v316_v53  ;;  %v341_v11 = vmul.f32 0.1, %v317_v60  ;;  %v411_v13 = vrot.slane %v5531_v62, 7  ;;  %p5173_p2 = scmp.lt.s32.totalorder %s6438_s20, %s5171_s9 }
  0x6c   : > { %4156 = vmatprep.subr.bf16.mxu0 %v4835_v31  ;;  %445 = vst [vmem:[#allocation2 + $0x68] sm:$0xfe] %v410_v1  ;;  %v5572_v14 = vsel %vm5537_vm0, %v5557_v6, 0.0  ;;  %v472_v15 = vsel %vm6518_vm8, %v470_v2, %v471_v3  ;;  %v5576_v16 = vadd.s32 %v5458_v10, %v248_v55  ;;  %v6584_v17 = vmov 0  ;;  %v323_v62 = vld [vmem:[%s5445_s5 + $0x50] sm:$0xff]  ;;  %p5168_p9 = pnand %p5167_p8, %p5410_p5  ;;  %s5172_s2 = scalar_lea.vmem %s5171_s9, 2048 }
  0x6d   : > { %4551 = vmatpush3.bf16.msra.mxu1 %v4834_v27  ;;  %v6585_v17 = vsel %vm5582_vm6, 4294967295, %v6584_v17  ;;  %v4979_v18 = vpack.c.bf16 %v350_v58, %v349_v57  ;;  %v473_v19 = vrot.slane %v5572_v14, 1  ;;  %v5590_v20 = vsel %vm328_vm1, %v316_v53, %v340_v9  ;;  %v322_v58 = vld [vmem:[%s5445_s5 + $0x48] sm:$0xff]  ;;  %p5174_p13 = scmp.lt.s32.totalorder %s5172_s2, %s5166_s30 }
  0x6e   : > { %4552 = vmatprep.subr.bf16.mxu1 %v4837_v32  ;;  %v5593_v10 = vsel %vm329_vm5, %v317_v60, %v341_v11  ;;  %v5601_v23 = vsel %vm5551_vm4, %v5590_v20, 0.0  ;;  %v342_v25 = vmul.f32 0.1, %v318_v5  ;;  %vm6586_vm10 = vcmp.ge.s32.totalorder %v5484_v35, 0  ;;  %p5169_p12 = pneg %p5168_p9 }
  0x6f   : > { %4157 = vmatpush3.bf16.msra.mxu0 %v4836_v33  ;;  %4980 = vmatprep.mubr.msk.bf16.mxu0 %vm5582_vm6, %v4979_v18  ;;  %v5606_v24 = vsel %vm5563_vm3, %v5593_v10, 0.0  ;;  %v474_v27 = vsel %vm6518_vm8, %v471_v3, %v473_v19  ;;  %v475_v28 = vrot.slane %v5601_v23, 1  ;;  %vm5615_vm2 = vmand %vm6586_vm10, %vm281_vm14  ;;  %v412_v31 = vsel %vm6589_vm13, %v410_v1, %v411_v13  ;;  %p5175_p3 = por %p5174_p13, %p5173_p2 }
  0x70   : > { %4158 = vmatprep.subr.bf16.mxu0 %v4838_v34  ;;  %v477_v29 = vrot.slane %v5606_v24, 1  ;;  %v413_v33 = vrot.slane %v5572_v14, 7  ;;  %vm6590_vm9 = vcmp.ge.s32.totalorder %v5487_v36, 0  ;;  %v343_v35 = vmul.f32 0.1, %v319_v12  ;;  %v4846_v36 = vld [vmem:[#allocation6 + $0xf8] sm:$0xff]  }
  0x71   : > { %4553 = vmatpush3.bf16.msra.mxu1 %v4837_v32  ;;  %v555_v32 = vpack.c.bf16 %v474_v27, %v472_v15  ;;  %vm5628_vm7 = vmand %vm6590_vm9, %vm282_vm12  ;;  %v415_v40 = vrot.slane %v5601_v23, 7  ;;  %vm6593_vm13 = vcmp.ge.f32.partialorder %v318_v5, 0.0  ;;  %vm6594_vm9 = vcmp.ge.f32.partialorder %v319_v12, 0.0  ;;  %p5176_p0 = pnand %p5175_p3, %p5169_p12 }
  0x72   : > { %4554 = vmatprep.subr.bf16.mxu1 %v4840_v39  ;;  %v5643_v45 = vsel %vm6594_vm9, %v319_v12, %v343_v35  ;;  %vm6596_vm9 = vcmp.ge.s32.totalorder %v5494_v42, 0  ;;  %vm6599_vm1 = vcmp.lt.s32.totalorder %v5507_v46, 200  ;;  %vm6600_vm5 = vcmp.ge.s32.totalorder %v5507_v46, 0 }
  0x73   : > { %4159 = vmatpush3.bf16.msra.mxu0 %v4839_v38  ;;  %v476_v38 = vsel %vm6518_vm8, %v473_v19, %v475_v28  ;;  %4558 = vmatprep.mubr.bf16.mxu1 %v555_v32  ;;  %v517_v49 = vld [vmem:[#allocation2 + $0x68] sm:$0xff]  ;;  %v5653_v50 = vsel %vm5628_vm7, %v5643_v45, 0.0  ;;  %vm5669_vm14 = vmand %vm6600_vm5, %vm6599_vm1  ;;  %v344_v57 = vmul.f32 0.1, %v320_v21  ;;  %vm6605_vm1 = vcmp.ge.f32.partialorder %v320_v21, 0.0 }
  0x74   : > { %4160 = vmatprep.subr.bf16.mxu0 %v4841_v41  ;;  %v5639_v41 = vsel %vm6593_vm13, %v318_v5, %v342_v25  ;;  %vm6595_vm13 = vcmp.lt.s32.totalorder %v5494_v42, 200  ;;  %v553_v53 = vpack.c.bf16 %v412_v31, %v517_v49  ;;  %v481_v55 = vrot.slane %v5653_v50, 1  ;;  %v324_v5 = vld [vmem:[%s5445_s5 + $0x58] sm:$0xff] }
  0x75   : > { %4555 = vmatpush3.bf16.msra.mxu1 %v4840_v39  ;;  %v478_v39 = vsel %vm6518_vm8, %v475_v28, %v477_v29  ;;  %v5648_v47 = vsel %vm5615_vm2, %v5639_v41, 0.0  ;;  %vm5660_vm12 = vmand %vm6596_vm9, %vm6595_vm13  ;;  %v345_v42 = vmul.f32 0.1, %v321_v37  ;;  %vm6603_vm13 = vcmask 1040384  }
  0x76   : > { %4556 = vmatprep.subr.bf16.mxu1 %v4843_v51  ;;  %v558_v44 = vpack.c.bf16 %v478_v39, %v476_v38  ;;  %v414_v60 = vsel %vm6603_vm13, %v411_v13, %v413_v33  ;;  %vm6604_vm10 = vmmov %vm6603_vm13  ;;  %v356_v2 = vsel %vm6605_vm1, %v320_v21, %v344_v57  ;;  %vm6606_vm5 = vcmp.ge.f32.partialorder %v321_v37, 0.0 }
  0x77   : > { %4161 = vmatpush3.bf16.msra.mxu0 %v4842_v56  ;;  %v6601_v56 = vmov 0  ;;  %v416_v46 = vsel %vm6604_vm10, %v413_v33, %v415_v40  ;;  %v5684_v3 = vsel %vm6606_vm5, %v321_v37, %v345_v42  ;;  %vm5691_vm13 = vmpackc.low %vm5551_vm4, %vm5537_vm0  ;;  %v6607_v9 = vmov 0 }
  0x78   : > { %4570 = vmatprep.subr.bf16.mxu0 %v5596_v22  ;;  %v6602_v56 = vsel %vm5669_vm14, 4294967295, %v6601_v56  ;;  %v6608_v9 = vsel %vm5691_vm13, 4294967295, %v6607_v9  ;;  %v4982_v11 = vpack.c.bf16 %v5590_v20, %v5557_v6  ;;  %v5701_v13 = vsel %vm5660_vm12, %v356_v2, 0.0 }
  0x79   : > { %4557 = vmatpush3.bf16.msra.mxu1 %v4843_v51  ;;  %v479_v51 = vrot.slane %v5648_v47, 1  ;;  %v5706_v14 = vsel %vm5669_vm14, %v5684_v3, 0.0  ;;  %v483_v15 = vrot.slane %v5701_v13, 1  ;;  %v556_v6 = vpack.c.bf16 %v416_v46, %v414_v60 }
  0x7a   : > { %4212 = vmatprep.subr.bf16.mxu1 %v4845_v26  ;;  %800 = vmatmul.mubr.bf16.vlgmr.msra.gmra.mxu0 %v553_v53  ;;  %v485_v18 = vrot.slane %v5706_v14, 1  ;;  %v417_v19 = vrot.slane %v5606_v24, 7  ;;  %vm334_vm10 = vcmp.ge.f32.partialorder %v322_v58, 0.0  ;;  %vm6609_vm1 = vcmp.lt.s32.totalorder %v5521_v54, 200 }
  0x7b   : > { %v480_v61 = vsel %vm6518_vm8, %v477_v29, %v479_v51  ;;  %v482_v1 = vsel %vm6518_vm8, %v479_v51, %v481_v55  ;;  %4983 = vmatprep.mubr.msk.bf16.mxu0 %vm5691_vm13, %v4982_v11  ;;  %4571 = vmatpush3.bf16.msra.mxu0 %v5596_v22  ;;  %v484_v20 = vsel %vm6518_vm8, %v481_v55, %v483_v15  ;;  %vm6610_vm5 = vcmp.ge.s32.totalorder %v5521_v54, 0 }
  0x7c   : > { %4559 = vmatmul.mubr.bf16.vlgmr.msra.gmra.mxu1 %v558_v44  ;;  %v561_v12 = vpack.c.bf16 %v482_v1, %v480_v61  ;;  %4572 = vmatprep.subr.bf16.mxu0 %v4847_v59  ;;  %v486_v21 = vsel %vm6518_vm8, %v483_v15, %v485_v18  ;;  %vm5718_vm9 = vmand %vm6610_vm5, %vm6609_vm1  ;;  %v6611_v22 = vmov 0  ;;  %vm335_vm13 = vcmp.ge.f32.partialorder %v323_v62, 0.0 }
  0x7d   : > { %4213 = vmatpush3.bf16.msra.mxu1 %v4846_v36  ;;  %v6612_v22 = vsel %vm5718_vm9, 4294967295, %v6611_v22  ;;  %v346_v25 = vmul.f32 0.1, %v322_v58  ;;  %v564_v26 = vpack.c.bf16 %v486_v21, %v484_v20  ;;  %v419_v27 = vrot.slane %v5648_v47, 7  ;;  %v4849_v20 = vld [vmem:[#allocation6 + $0xf0] sm:$0xff]   ;;  %v4851_v21 = vld [vmem:[#allocation6 + $0x128] sm:$0xff]  }
  0x7e   : > { %4562 = vmatprep.mubr.bf16.mxu1 %v561_v12  ;;  %vm6613_vm4 = vcmp.lt.s32.totalorder %v5544_v0, 200  ;;  %vm6614_vm0 = vcmp.ge.s32.totalorder %v5544_v0, 0  ;;  %v6615_v24 = vmov 0  ;;  %v347_v28 = vmul.f32 0.1, %v323_v62 }
  0x7f   : > { %vm5727_vm6 = vmand %vm6614_vm0, %vm6613_vm4  ;;  %vm336_vm8 = vcmp.ge.f32.partialorder %v324_v5, 0.0  ;;  %4573 = vmatpush3.bf16.msra.mxu0 %v4847_v59  ;;  %v358_v54 = vsel %vm334_vm10, %v322_v58, %v346_v25  ;;  %vm6617_vm1 = vcmp.lt.s32.totalorder %v5576_v16, 200  ;;  %vm6618_vm5 = vcmp.ge.s32.totalorder %v5576_v16, 0  ;;  %v4852_v25 = vld [vmem:[#allocation6 + $0xe8] sm:$0xff]  }
  0x80   : > { %v6616_v24 = vsel %vm5727_vm6, 4294967295, %v6615_v24  ;;  %vm5735_vm15 = vmand %vm6618_vm5, %vm6617_vm1  ;;  %v6619_v29 = vmov 0  ;;  %v348_v31 = vmul.f32 0.1, %v324_v5  ;;  %v421_v0 = vrot.slane %v5653_v50, 7 }
  0x81   : > { %v6620_v29 = vsel %vm5735_vm15, 4294967295, %v6619_v29  ;;  %v359_v32 = vsel %vm335_vm13, %v323_v62, %v347_v28  ;;  %v394_v33 = vsel %vm5718_vm9, %v358_v54, 0.0  ;;  %vm6621_vm0 = vcmask 1040384   ;;  %vm5751_vm4 = vmpackc.low %vm5615_vm2, %vm5563_vm3  ;;  %v4850_v28 = vld [vmem:[#allocation6 + $0x168] sm:$0xff]  }
  0x82   : > { %808 = vmatmul.mubr.bf16.gmra.mxu0 %v556_v6  ;;  %v418_v35 = vsel %vm6621_vm0, %v415_v40, %v417_v19  ;;  %v395_v16 = vsel %vm5727_vm6, %v359_v32, 0.0  ;;  %v487_v37 = vrot.slane %v394_v33, 1  ;;  %v360_v38 = vsel %vm336_vm8, %v324_v5, %v348_v31  ;;  %vm6624_vm13 = vmmov %vm6621_vm0  ;;  %v4857_v31 = vld [vmem:[#allocation6 + $0xd8] sm:$0xff]   ;;  %4574 = vmatprep.subr.bf16.mxu0 %v4850_v28 }
  0x83   : > { %v6622_v39 = vmov 0  ;;  %v4985_v36 = vpack.c.bf16 %v5639_v41, %v5593_v10  ;;  %v420_v23 = vsel %vm6624_vm13, %v417_v19, %v419_v27  ;;  %v423_v40 = vrot.slane %v5701_v13, 7  ;;  %vm5770_vm1 = vmpackc.low %vm5660_vm12, %vm5628_vm7  ;;  %v4848_v19 = vld [vmem:[#allocation6 + $0x130] sm:$0xff]   ;;  %4575 = vmatpush3.bf16.msra.mxu0 %v4850_v28 }
  0x84   : > { %4563 = vmatmul.mubr.bf16.gmra.mxu1 %v564_v26  ;;  %v6623_v39 = vsel %vm5751_vm4, 4294967295, %v6622_v39  ;;  %v489_v44 = vrot.slane %v395_v16, 1  ;;  %v396_v47 = vsel %vm5735_vm15, %v360_v38, 0.0  ;;  %vm6625_vm8 = vcmask 1046528   ;;  %vm6629_vm5 = vmmov %vm6621_vm0  ;;  %4214 = vmatprep.subr.bf16.mxu1 %v4848_v19  ;;  %v4853_v26 = vld [vmem:[#allocation6 + $0x120] sm:$0xff]  }
  0x85   : > { %4986 = vmatprep.mubr.msk.bf16.mxu0 %vm5751_vm4, %v4985_v36  ;;  %v488_v49 = vsel %vm6625_vm8, %v485_v18, %v487_v37  ;;  %v491_v50 = vrot.slane %v396_v47, 1  ;;  %v425_v51 = vrot.slane %v5706_v14, 7  ;;  %vm6626_vm10 = vmmov %vm6625_vm8  ;;  %v427_v55 = vrot.slane %v394_v33, 7  ;;  %4215 = vmatpush3.bf16.msra.mxu1 %v4849_v20  ;;  %v4860_v33 = vld [vmem:[#allocation6 + $0xd0] sm:$0xff]  }
  0x86   : > { %v490_v53 = vsel %vm6626_vm10, %v487_v37, %v489_v44  ;;  %v429_v10 = vrot.slane %v395_v16, 7  ;;  %v559_v41 = vpack.c.bf16 %v420_v23, %v418_v35  ;;  %v6627_v42 = vmov 0  ;;  %vm6630_vm13 = vmmov %vm6625_vm8  ;;  %4216 = vmatprep.subr.bf16.mxu1 %v4851_v21  ;;  %v4861_v35 = vld [vmem:[#allocation6 + $0x108] sm:$0xff]   ;;  %v4858_v16 = vld [vmem:[#allocation6 + $0x158] sm:$0xff]  }
  0x87   : > { %v567_v57 = vpack.c.bf16 %v490_v53, %v488_v49  ;;  %516 = vst [vmem:[#allocation2 + $0xd8] sm:$0x7f] %v491_v50  ;;  %v6628_v42 = vsel %vm5770_vm1, 4294967295, %v6627_v42  ;;  %v4988_v58 = vpack.c.bf16 %v356_v2, %v5643_v45  ;;  %v422_v59 = vsel %vm6629_vm5, %v419_v27, %v421_v0  ;;  %vm5784_vm8 = vmpackc.low %vm5718_vm9, %vm5669_vm14  ;;  %v4854_v27 = vld [vmem:[#allocation6 + $0xe0] sm:$0xff]   ;;  %v4862_v37 = vld [vmem:[#allocation6 + $0xc8] sm:$0xff]  }
  0x88   : > { %v424_v60 = vsel %vm6621_vm0, %v421_v0, %v423_v40  ;;  %v492_v61 = vsel %vm6630_vm13, %v489_v44, %v491_v50  ;;  %v431_v46 = vrot.slane %v396_v47, 7  ;;  %v6631_v45 = vmov 0  ;;  %vm6633_vm10 = vmmov %vm6621_vm0  ;;  %v4859_v0 = vld [vmem:[#allocation6 + $0x110] sm:$0xff]   ;;  %v4865_v23 = vld [vmem:[#allocation6 + $0xc0] sm:$0xff]  }
  0x89   : > { %4566 = vmatprep.mubr.bf16.mxu1 %v567_v57  ;;  %v562_v1 = vpack.c.bf16 %v424_v60, %v422_v59  ;;  %v6632_v45 = vsel %vm5784_vm8, 4294967295, %v6631_v45  ;;  %v4991_v2 = vpack.c.bf16 %v358_v54, %v5684_v3  ;;  %v426_v11 = vsel %vm6633_vm10, %v423_v40, %v425_v51  ;;  %vm6634_vm5 = vmmov %vm6621_vm0  ;;  %4217 = vmatpush3.bf16.msra.mxu1 %v4852_v25  ;;  %v4856_v54 = vld [vmem:[#allocation6 + $0x118] sm:$0xff]   ;;  %v4863_v36 = vld [vmem:[#allocation6 + $0x150] sm:$0xff]  }
  0x8a   : > { %816 = vmatmul.mubr.bf16.gmra.mxu0 %v559_v41  ;;  %v428_v12 = vsel %vm6634_vm5, %v425_v51, %v427_v55  ;;  %vm5797_vm0 = vmpackc.low %vm5735_vm15, %vm5727_vm6  ;;  %v6635_v14 = vmov 0  ;;  %v4994_v15 = vpack.c.bf16 %v360_v38, %v359_v32  ;;  %4218 = vmatprep.subr.bf16.mxu1 %v4853_v26  ;;  %v4855_v32 = vld [vmem:[#allocation6 + $0x160] sm:$0xff]   ;;  %v4866_v40 = vld [vmem:[#allocation6 + $0x148] sm:$0xff]   ;;  %v621_v47 = vsub.s32 0, %v5456_v8 }
  0x8b   : > { %4989 = vmatprep.mubr.msk.bf16.mxu0 %vm5770_vm1, %v4988_v58  ;;  %v565_v13 = vpack.c.bf16 %v428_v12, %v426_v11  ;;  %v6636_v14 = vsel %vm5797_vm0, 4294967295, %v6635_v14  ;;  %vm6637_vm13 = vmmov %vm6634_vm5  ;;  %4576 = vmatprep.subr.bf16.mxu0 %v4855_v32  ;;  %v4864_v38 = vld [vmem:[#allocation6 + $0x100] sm:$0xff]  }
  0x8c   : > { %v430_v3 = vsel %vm6637_vm13, %v427_v55, %v429_v10  ;;  %4577 = vmatpush3.bf16.msra.mxu0 %v4855_v32  ;;  %v4867_v44 = vld [vmem:[#allocation6 + $0x140] sm:$0xff]  }
  0x8d   : > { %4219 = vmatpush3.bf16.msra.mxu1 %v4854_v27  ;;  %4578 = vmatprep.subr.bf16.mxu0 %v4858_v16  ;;  %v5806_v50 = vld [vmem:[#allocation8] sm:$0x3f] }
  0x8e   : > { %v552_v62 = vld [vmem:[#allocation2 + $0xd8] sm:$0xff]  ;;  %4220 = vmatprep.subr.bf16.mxu1 %v4856_v54  ;;  %v5809_v55 = vrot.slane %v5806_v50, %v621_v47 }
  0x8f   : > { %v570_v5 = vpack.c.bf16 %v552_v62, %v492_v61 }
  0x90   : > { %4579 = vmatpush3.bf16.msra.mxu0 %v4858_v16 }
  0x91   : > { %4567 = vmatmul.mubr.bf16.gmra.mxu1 %v570_v5  ;;  %4580 = vmatprep.subr.bf16.mxu0 %v4863_v36 }
  0x92   : > { %824 = vmatmul.mubr.bf16.gmra.mxu0 %v562_v1  ;;  %4221 = vmatpush3.bf16.msra.mxu1 %v4857_v31 }
  0x93   : > { %4992 = vmatprep.mubr.msk.bf16.mxu0 %vm5784_vm8, %v4991_v2  ;;  %vm6638_vm8 = vmmov %vm6634_vm5  ;;  %4222 = vmatprep.subr.bf16.mxu1 %v4859_v0  ;;  %vm6639_vm5 = vnez %v6577_v48 }
  0x94   : > { %v432_v18 = vsel %vm6638_vm8, %v429_v10, %v431_v46  ;;  %4581 = vmatpush3.bf16.msra.mxu0 %v4863_v36 }
  0x95   : > { %v568_v6 = vpack.c.bf16 %v432_v18, %v430_v3  ;;  %4582 = vmatprep.subr.bf16.mxu0 %v4866_v40 }
  0x96   : > { %4223 = vmatpush3.bf16.msra.mxu1 %v4860_v33 }
  0x97   : > { %4224 = vmatprep.subr.bf16.mxu1 %v4861_v35 }
  0x98   : > { %4583 = vmatpush3.bf16.msra.mxu0 %v4866_v40 }
  0x99   : > { %4584 = vmatprep.subr.bf16.mxu0 %v4867_v44 }
  0x9a   : > { %832 = vmatmul.mubr.bf16.gmra.mxu0 %v565_v13  ;;  %4225 = vmatpush3.bf16.msra.mxu1 %v4862_v37 }
  0x9b   : > { %4995 = vmatprep.mubr.msk.bf16.mxu0 %vm5797_vm0, %v4994_v15  ;;  %4226 = vmatprep.subr.bf16.mxu1 %v4864_v38 }
  0x9c   : > { %4585 = vmatpush3.bf16.msra.mxu0 %v4867_v44 }
  0x9e   : > { %4227 = vmatpush3.bf16.msra.mxu1 %v4865_v23 }
  0xa2   : > { %840 = vmatmul.mubr.bf16.gmra.mxu0 %v568_v6 }
 0x13a   : > { %v4162_v51 = vpop.f32.mrf.mxu0 }
 0x13c   : > { %v4560_v49 = vpop.f32.mrf.mxu1  ;;  %v4163_v10 = vpop.f32.mrf.mxu0 }
 0x13d   : > { %v4164_v41 = vadd.f32 %v4163_v10, %v4162_v51 }
 0x13e   : > { %v882_v53 = vpop.f32.mrf.mxu1  ;;  %v4165_v57 = vpop.f32.mrf.mxu0 }
 0x13f   : > { %v802_v59 = vadd.f32 %v4164_v41, %v5809_v55 }
 0x140   : > { %v4561_v58 = vpop.f32.mrf.mxu1  ;;  %v4166_v60 = vpop.f32.mrf.mxu0 }
 0x141   : > { %v883_v61 = vadd.f32 %v882_v53, %v802_v59  ;;  %v4167_v62 = vadd.f32 %v4166_v60, %v4165_v57 }
 0x142   : > { %v4168_v46 = vpop.f32.mrf.mxu0  ;;  %v885_v1 = vpop.f32.mrf.mxu1 }
 0x143   : > { %vm929_vm8 = vcmp.ge.f32.partialorder %v883_v61, 0.0  ;;  %v941_v5 = vmul.f32 0.1, %v883_v61  ;;  %v805_v2 = vadd.f32 %v4167_v62, %v5809_v55 }
 0x144   : > { %v4169_v11 = vpop.f32.mrf.mxu0  ;;  %v5815_v20 = vpop.f32.mrf.mxu1 }
 0x145   : > { %v953_v12 = vsel %vm929_vm8, %v883_v61, %v941_v5  ;;  %v886_v13 = vadd.f32 %v885_v1, %v805_v2  ;;  %v4170_v15 = vadd.f32 %v4169_v11, %v4168_v46  ;;  %vm6640_vm8 = vnez %v6585_v17 }
 0x146   : > { %v965_v3 = vsel %vm5498_vm11, %v953_v12, 0.0  ;;  %v4171_v18 = vpop.f32.mrf.mxu0  ;;  %v898_v32 = vpop.f32.mrf.mxu1  ;;  %vm6642_vm11 = vcmask 1040384  }
 0x147   : > { %v989_v6 = vrot.slane %v965_v3, 7  ;;  %vm930_vm10 = vcmp.ge.f32.partialorder %v886_v13, 0.0  ;;  %v942_v19 = vmul.f32 0.1, %v886_v13  ;;  %v810_v21 = vadd.f32 %v4170_v15, %v5809_v55 }
 0x148   : > { %v4172_v25 = vpop.f32.mrf.mxu0  ;;  %v4565_v53 = vpop.f32.mrf.mxu1  ;;  %v1048_v10 = vrot.slane %v965_v3, 1 }
 0x149   : > { %1024 = vst [vmem:[#allocation2 + $0x68] sm:$0xfe] %v989_v6  ;;  %v954_v26 = vsel %vm930_vm10, %v886_v13, %v942_v19  ;;  %v4173_v27 = vadd.f32 %v4172_v25, %v4171_v18  ;;  %v891_v54 = vadd.f32 %v4560_v49, %v810_v21  ;;  %vm6641_vm10 = vnez %v6579_v63 }
 0x14a   : > { %v966_v28 = vsel %vm6639_vm5, %v954_v26, 0.0  ;;  %v4174_v31 = vpop.f32.mrf.mxu0  ;;  %v4997_v36 = vpack.c.bf16 %v954_v26, %v953_v12  ;;  %v901_v3 = vpop.f32.mrf.mxu1 }
 0x14b   : > { %v813_v0 = vadd.f32 %v4173_v27, %v5809_v55  ;;  %v990_v33 = vrot.slane %v966_v28, 7  ;;  %vm931_vm13 = vcmp.ge.f32.partialorder %v891_v54, 0.0  ;;  %v943_v35 = vmul.f32 0.1, %v891_v54 }
 0x14c   : > { %v4175_v16 = vpop.f32.mrf.mxu0  ;;  %4998 = vmatprep.mubr.msk.bf16.mxu1 %vm6640_vm8, %v4997_v36  ;;  %v1049_v23 = vrot.slane %v966_v28, 1 }
 0x14d   : > { %v894_v37 = vadd.f32 %v4561_v58, %v813_v0  ;;  %v4176_v38 = vadd.f32 %v4175_v16, %v4174_v31  ;;  %v955_v40 = vsel %vm931_vm13, %v891_v54, %v943_v35  ;;  %v991_v41 = vsel %vm6642_vm11, %v989_v6, %v990_v33 }
 0x14e   : > { %v4177_v44 = vpop.f32.mrf.mxu0  ;;  %v967_v47 = vsel %vm6641_vm10, %v955_v40, 0.0  ;;  %vm6643_vm13 = vcmask 1046528   ;;  %vm6645_vm10 = vnez %v6581_v4 }
 0x14f   : > { %vm932_vm5 = vcmp.ge.f32.partialorder %v894_v37, 0.0  ;;  %v944_v49 = vmul.f32 0.1, %v894_v37  ;;  %v818_v51 = vadd.f32 %v4176_v38, %v5809_v55  ;;  %v1051_v57 = vrot.slane %v967_v47, 1  ;;  %vm6644_vm8 = vmmov %vm6643_vm13 }
 0x150   : > { %v4178_v58 = vpop.f32.mrf.mxu0  ;;  %v1095_v59 = vld [vmem:[#allocation2 + $0x68] sm:$0xff]  ;;  %v1050_v1 = vsel %vm6643_vm13, %v1048_v10, %v1049_v23  ;;  %v992_v12 = vrot.slane %v967_v47, 7 }
 0x151   : > { %v956_v60 = vsel %vm932_vm5, %v894_v37, %v944_v49  ;;  %v899_v61 = vadd.f32 %v898_v32, %v818_v51  ;;  %v4179_v62 = vadd.f32 %v4178_v58, %v4177_v44  ;;  %v1131_v46 = vpack.c.bf16 %v991_v41, %v1095_v59  ;;  %v5835_v0 = vpop.f32.mrf.mxu1 }
 0x152   : > { %v1052_v5 = vsel %vm6644_vm8, %v1049_v23, %v1051_v57  ;;  %v968_v2 = vsel %vm6645_vm10, %v956_v60, 0.0  ;;  %v4180_v11 = vpop.f32.mrf.mxu0  ;;  %v5000_v32 = vpack.c.bf16 %v956_v60, %v955_v40  ;;  %vm6646_vm5 = vnez %v6608_v9  ;;  %vm6647_vm8 = vmmov %vm6642_vm11 }
 0x153   : > { %v994_v13 = vrot.slane %v968_v2, 7  ;;  %vm933_vm0 = vcmp.ge.f32.partialorder %v899_v61, 0.0  ;;  %v945_v15 = vmul.f32 0.1, %v899_v61  ;;  %1379 = vmatmul.mubr.bf16.vlgmr.msra.gmra.mxu1 %v1131_v46  ;;  %v1053_v18 = vrot.slane %v968_v2, 1  ;;  %v914_v41 = vpop.f32.mrf.mxu1 }
 0x154   : > { %v821_v6 = vadd.f32 %v4179_v62, %v5809_v55  ;;  %v4181_v19 = vpop.f32.mrf.mxu0  ;;  %v1133_v21 = vpack.c.bf16 %v1052_v5, %v1050_v1  ;;  %5001 = vmatprep.mubr.msk.bf16.mxu1 %vm6646_vm5, %v5000_v32  ;;  %v993_v37 = vsel %vm6647_vm8, %v990_v33, %v992_v12 }
 0x155   : > { %v957_v25 = vsel %vm933_vm0, %v899_v61, %v945_v15  ;;  %v4182_v26 = vadd.f32 %v4181_v19, %v4180_v11  ;;  %v995_v27 = vsel %vm6642_vm11, %v992_v12, %v994_v13  ;;  %vm6648_vm0 = vmmov %vm6643_vm13  ;;  %v4569_v12 = vpop.f32.mrf.mxu1 }
 0x156   : > { %v969_v28 = vsel %vm5563_vm3, %v957_v25, 0.0  ;;  %v902_v54 = vadd.f32 %v901_v3, %v821_v6  ;;  %v4183_v31 = vpop.f32.mrf.mxu0  ;;  %4586 = vmatprep.mubr.bf16.mxu0 %v1133_v21  ;;  %v1054_v38 = vsel %vm6648_vm0, %v1051_v57, %v1053_v18  ;;  %vm6649_vm11 = vmmov %vm6648_vm0  ;;  %v1134_v51 = vpack.c.bf16 %v995_v27, %v993_v37 }
 0x157   : > { %v1055_v35 = vrot.slane %v969_v28, 1  ;;  %v826_v16 = vadd.f32 %v4182_v26, %v5809_v55  ;;  %v996_v60 = vrot.slane %v969_v28, 7 }
 0x158   : > { %vm934_vm13 = vcmp.ge.f32.partialorder %v902_v54, 0.0  ;;  %v946_v36 = vmul.f32 0.1, %v902_v54  ;;  %v4184_v23 = vpop.f32.mrf.mxu0 }
 0x159   : > { %v1056_v44 = vsel %vm6649_vm11, %v1053_v18, %v1055_v35  ;;  %v907_v47 = vadd.f32 %v5815_v20, %v826_v16  ;;  %v4185_v49 = vadd.f32 %v4184_v23, %v4183_v31  ;;  %v917_v16 = vpop.f32.mrf.mxu1 }
 0x15a   : > { %v958_v40 = vsel %vm934_vm13, %v902_v54, %v946_v36  ;;  %v4186_v10 = vpop.f32.mrf.mxu0  ;;  %v1136_v58 = vpack.c.bf16 %v1056_v44, %v1054_v38  ;;  %vm6650_vm13 = vmmov %vm6647_vm8 }
 0x15b   : > { %v970_v59 = vsel %vm5615_vm2, %v958_v40, 0.0  ;;  %vm935_vm3 = vcmp.ge.f32.partialorder %v907_v47, 0.0  ;;  %v947_v33 = vmul.f32 0.1, %v907_v47  ;;  %v829_v57 = vadd.f32 %v4185_v49, %v5809_v55  ;;  %1387 = vmatmul.mubr.bf16.gmra.mxu1 %v1134_v51 }
 0x15c   : > { %v998_v61 = vrot.slane %v970_v59, 7  ;;  %v1057_v62 = vrot.slane %v970_v59, 1  ;;  %v4187_v46 = vpop.f32.mrf.mxu0  ;;  %4587 = vmatmul.mubr.bf16.vlgmr.msra.gmra.mxu0 %v1136_v58  ;;  %v5003_v3 = vpack.c.bf16 %v958_v40, %v957_v25  ;;  %v997_v19 = vsel %vm6650_vm13, %v994_v13, %v996_v60 }
 0x15d   : > { %v959_v20 = vsel %vm935_vm3, %v907_v47, %v947_v33  ;;  %v910_v1 = vadd.f32 %v4565_v53, %v829_v57  ;;  %v4188_v5 = vadd.f32 %v4187_v46, %v4186_v10  ;;  %vm6651_vm3 = vmmov %vm6649_vm11 }
 0x15e   : > { %v999_v2 = vsel %vm6647_vm8, %v996_v60, %v998_v61  ;;  %v971_v11 = vsel %vm5628_vm7, %v959_v20, 0.0  ;;  %v4189_v15 = vpop.f32.mrf.mxu0  ;;  %5004 = vmatprep.mubr.msk.bf16.mxu1 %vm5751_vm4, %v5003_v3  ;;  %v1058_v21 = vsel %vm6649_vm11, %v1055_v35, %v1057_v62 }
 0x15f   : > { %v1059_v18 = vrot.slane %v971_v11, 1  ;;  %vm936_vm0 = vcmp.ge.f32.partialorder %v910_v1, 0.0  ;;  %v948_v6 = vmul.f32 0.1, %v910_v1  ;;  %v834_v53 = vadd.f32 %v4188_v5, %v5809_v55 }
 0x160   : > { %v4190_v26 = vpop.f32.mrf.mxu0  ;;  %v1137_v31 = vpack.c.bf16 %v999_v2, %v997_v19  ;;  %v1000_v35 = vrot.slane %v971_v11, 7 }
 0x161   : > { %v1060_v27 = vsel %vm6651_vm3, %v1057_v62, %v1059_v18  ;;  %v960_v28 = vsel %vm936_vm0, %v910_v1, %v948_v6  ;;  %v4191_v54 = vadd.f32 %v4190_v26, %v4189_v15  ;;  %v915_v32 = vadd.f32 %v914_v41, %v834_v53  ;;  %vm6652_vm0 = vmmov %vm6650_vm13 }
 0x162   : > { %v972_v25 = vsel %vm5660_vm12, %v960_v28, 0.0  ;;  %v4192_v37 = vpop.f32.mrf.mxu0  ;;  %v1139_v38 = vpack.c.bf16 %v1060_v27, %v1058_v21  ;;  %v5006_v51 = vpack.c.bf16 %v960_v28, %v959_v20  ;;  %vm6653_vm11 = vmmov %vm6652_vm0 }
 0x163   : > { %v1002_v36 = vrot.slane %v972_v25, 7  ;;  %v837_v13 = vadd.f32 %v4191_v54, %v5809_v55  ;;  %1395 = vmatmul.mubr.bf16.gmra.mxu1 %v1137_v31  ;;  %vm937_vm8 = vcmp.ge.f32.partialorder %v915_v32, 0.0  ;;  %v949_v23 = vmul.f32 0.1, %v915_v32 }
 0x164   : > { %v4193_v44 = vpop.f32.mrf.mxu0  ;;  %4590 = vmatprep.mubr.bf16.mxu0 %v1139_v38  ;;  %5007 = vmatprep.mubr.msk.bf16.mxu1 %vm5770_vm1, %v5006_v51  ;;  %v1061_v10 = vrot.slane %v972_v25, 1  ;;  %v1001_v60 = vsel %vm6653_vm11, %v998_v61, %v1000_v35 }
 0x165   : > { %v918_v47 = vadd.f32 %v917_v16, %v837_v13  ;;  %v4194_v49 = vadd.f32 %v4193_v44, %v4192_v37  ;;  %v1003_v40 = vsel %vm6652_vm0, %v1000_v35, %v1002_v36  ;;  %v961_v41 = vsel %vm937_vm8, %v915_v32, %v949_v23  ;;  %vm6654_vm8 = vmmov %vm6651_vm3 }
 0x166   : > { %v4195_v58 = vpop.f32.mrf.mxu0  ;;  %v973_v59 = vsel %vm5669_vm14, %v961_v41, 0.0  ;;  %v1140_v2 = vpack.c.bf16 %v1003_v40, %v1001_v60  ;;  %v1062_v3 = vsel %vm6654_vm8, %v1059_v18, %v1061_v10  ;;  %v4873_v60 = vld [vmem:[#allocation6 + $0x1b0] sm:$0xff]  }
 0x167   : > { %vm938_vm13 = vcmp.ge.f32.partialorder %v918_v47, 0.0  ;;  %v950_v33 = vmul.f32 0.1, %v918_v47  ;;  %v842_v57 = vadd.f32 %v4194_v49, %v5809_v55  ;;  %v1063_v62 = vrot.slane %v973_v59, 1 }
 0x168   : > { %v4196_v46 = vpop.f32.mrf.mxu0  ;;  %v1004_v21 = vrot.slane %v973_v59, 7  ;;  %v4870_v59 = vld [vmem:[#allocation6 + $0x1b8] sm:$0xff]  }
 0x169   : > { %v962_v20 = vsel %vm938_vm13, %v918_v47, %v950_v33  ;;  %v923_v1 = vadd.f32 %v5835_v0, %v842_v57  ;;  %v4197_v5 = vadd.f32 %v4196_v46, %v4195_v58  ;;  %v1064_v11 = vsel %vm6651_vm3, %v1061_v10, %v1063_v62  ;;  %vm6655_vm13 = vmmov %vm6653_vm11  ;;  %v4869_v58 = vld [vmem:[#allocation6 + $0x1f8] sm:$0xff]   ;;  %v4872_v57 = vld [vmem:[#allocation6 + $0x1f0] sm:$0xff]  }
 0x16a   : > { %v974_v15 = vsel %vm5718_vm9, %v962_v20, 0.0  ;;  %v1142_v53 = vpack.c.bf16 %v1064_v11, %v1062_v3  ;;  %v5009_v31 = vpack.c.bf16 %v962_v20, %v961_v41  ;;  %vm6656_vm11 = vnez %v6632_v45  ;;  %vm6657_vm3 = vmmov %vm6655_vm13  ;;  %4278 = vmatprep.subr.bf16.mxu0 %v4869_v58  ;;  %v4868_v33 = vld [vmem:[#allocation6 + $0x238] sm:$0xff]   ;;  %v4875_v46 = vld [vmem:[#allocation6 + $0x1e8] sm:$0xff]  }
 0x16b   : > { %v1006_v6 = vrot.slane %v974_v15, 7  ;;  %vm939_vm0 = vcmp.ge.f32.partialorder %v923_v1, 0.0  ;;  %v951_v19 = vmul.f32 0.1, %v923_v1  ;;  %1403 = vmatmul.mubr.bf16.gmra.mxu1 %v1140_v2  ;;  %v845_v61 = vadd.f32 %v4197_v5, %v5809_v55  ;;  %4279 = vmatpush3.bf16.msra.mxu0 %v4870_v59  ;;  %v4876_v20 = vld [vmem:[#allocation6 + $0x1a8] sm:$0xff]   ;;  %v4878_v5 = vld [vmem:[#allocation6 + $0x1a0] sm:$0xff]  }
 0x16c   : > { %v1065_v26 = vrot.slane %v974_v15, 1  ;;  %4591 = vmatmul.mubr.bf16.gmra.mxu0 %v1142_v53  ;;  %5010 = vmatprep.mubr.msk.bf16.mxu1 %vm6656_vm11, %v5009_v31  ;;  %v1005_v25 = vsel %vm6657_vm3, %v1002_v36, %v1004_v21  ;;  %vm6658_vm9 = vcmask 1046528   ;;  %v4880_v2 = vld [vmem:[#allocation6 + $0x1d8] sm:$0xff]   ;;  %v4874_v11 = vld [vmem:[#allocation6 + $0x228] sm:$0xff]   ;;  %v4883_v3 = vld [vmem:[#allocation6 + $0x1d0] sm:$0xff]  }
 0x16d   : > { %v963_v27 = vsel %vm939_vm0, %v923_v1, %v951_v19  ;;  %v1007_v0 = vsel %vm6655_vm13, %v1004_v21, %v1006_v6  ;;  %v926_v54 = vadd.f32 %v4569_v12, %v845_v61  ;;  %vm6659_vm14 = vmmov %vm6658_vm9  ;;  %vm6661_vm13 = vnez %v6636_v14  ;;  %4598 = vmatprep.subr.bf16.mxu1 %v4868_v33  ;;  %v4877_v1 = vld [vmem:[#allocation6 + $0x1e0] sm:$0xff]   ;;  %v4881_v15 = vld [vmem:[#allocation6 + $0x198] sm:$0xff]  }
 0x16e   : > { %v975_v28 = vsel %vm5727_vm6, %v963_v27, 0.0  ;;  %v1066_v55 = vsel %vm6658_vm9, %v1063_v62, %v1065_v26  ;;  %v1143_v37 = vpack.c.bf16 %v1007_v0, %v1005_v25  ;;  %vm6660_vm0 = vmmov %vm6657_vm3  ;;  %4599 = vmatpush3.bf16.msra.mxu1 %v4868_v33  ;;  %4280 = vmatprep.subr.bf16.mxu0 %v4872_v57  ;;  %v4871_v62 = vld [vmem:[#allocation6 + $0x230] sm:$0xff]   ;;  %v4885_v21 = vld [vmem:[#allocation6 + $0x1c8] sm:$0xff]  }
 0x16f   : > { %v1067_v18 = vrot.slane %v975_v28, 1  ;;  %vm940_vm8 = vcmp.ge.f32.partialorder %v926_v54, 0.0  ;;  %v952_v32 = vmul.f32 0.1, %v926_v54  ;;  %v1008_v35 = vrot.slane %v975_v28, 7  ;;  %vm6662_vm9 = vmmov %vm6660_vm0  ;;  %4281 = vmatpush3.bf16.msra.mxu0 %v4873_v60  ;;  %4600 = vmatprep.subr.bf16.mxu1 %v4871_v62  ;;  %v4884_v19 = vld [vmem:[#allocation6 + $0x190] sm:$0xff]  }
 0x170   : > { %4282 = vmatprep.subr.bf16.mxu0 %v4875_v46  ;;  %v4882_v61 = vld [vmem:[#allocation6 + $0x218] sm:$0xff]   ;;  %v4886_v53 = vld [vmem:[#allocation6 + $0x188] sm:$0xff]   ;;  %v4889_v0 = vld [vmem:[#allocation6 + $0x180] sm:$0xff]  }
 0x171   : > { %v1068_v16 = vsel %vm6659_vm14, %v1065_v26, %v1067_v18  ;;  %v964_v38 = vsel %vm940_vm8, %v926_v54, %v952_v32  ;;  %v1009_v49 = vsel %vm6662_vm9, %v1006_v6, %v1008_v35  ;;  %v4879_v6 = vld [vmem:[#allocation6 + $0x220] sm:$0xff]   ;;  %v4887_v26 = vld [vmem:[#allocation6 + $0x210] sm:$0xff]   ;;  %v4890_v28 = vld [vmem:[#allocation6 + $0x208] sm:$0xff]   ;;  %v1200_v32 = vsub.s32 1, %v5456_v8 }
 0x172   : > { %v1145_v13 = vpack.c.bf16 %v1068_v16, %v1066_v55  ;;  %v976_v12 = vsel %vm5735_vm15, %v964_v38, 0.0  ;;  %v5012_v36 = vpack.c.bf16 %v964_v38, %v963_v27  ;;  %4601 = vmatpush3.bf16.msra.mxu1 %v4871_v62  ;;  %v4888_v27 = vld [vmem:[#allocation6 + $0x1c0] sm:$0xff]   ;;  %v5887_v31 = vld [vmem:[#allocation6 + $0x2f8] sm:$0xff]  }
 0x173   : > { %1411 = vmatmul.mubr.bf16.gmra.mxu1 %v1143_v37  ;;  %v1010_v23 = vrot.slane %v976_v12, 7  ;;  %v1069_v44 = vrot.slane %v976_v12, 1  ;;  %4283 = vmatpush3.bf16.msra.mxu0 %v4876_v20  ;;  %v4891_v54 = vld [vmem:[#allocation6 + $0x200] sm:$0xff]   ;;  %v5892_v38 = vrot.slane %v5806_v50, %v1200_v32 }
 0x174   : > { %4594 = vmatprep.mubr.bf16.mxu0 %v1145_v13  ;;  %5013 = vmatprep.mubr.msk.bf16.mxu1 %vm6661_vm13, %v5012_v36  ;;  %v4964_v58 = vld [vmem:[%s5445_s5] sm:$0xff] }
 0x175   : > { %v1011_v47 = vsel %vm6660_vm0, %v1008_v35, %v1010_v23  ;;  %1094 = vst [vmem:[#allocation2 + $0xd8] sm:$0x7f] %v1069_v44  ;;  %v1070_v40 = vsel %vm6659_vm14, %v1067_v18, %v1069_v44  ;;  %4284 = vmatprep.subr.bf16.mxu0 %v4877_v1  ;;  %4602 = vmatprep.subr.bf16.mxu1 %v4874_v11  ;;  %v4965_v1 = vld [vmem:[%s5445_s5 + $0x10] sm:$0xff]  ;;  %vm6663_vm0 = vnez %v6575_v43 }
 0x176   : > { %v1146_v51 = vpack.c.bf16 %v1011_v47, %v1009_v49  ;;  %4603 = vmatpush3.bf16.msra.mxu1 %v4874_v11  ;;  %vm6664_vm14 = vnez %v6579_v63 }
 0x177   : > { %4285 = vmatpush3.bf16.msra.mxu0 %v4878_v5  ;;  %4604 = vmatprep.subr.bf16.mxu1 %v4879_v6 }
 0x178   : > { %4286 = vmatprep.subr.bf16.mxu0 %v4880_v2 }
 0x17a   : > { %4605 = vmatpush3.bf16.msra.mxu1 %v4879_v6 }
 0x17b   : > { %1419 = vmatmul.mubr.bf16.gmra.mxu1 %v1146_v51  ;;  %4287 = vmatpush3.bf16.msra.mxu0 %v4881_v15 }
 0x17c   : > { %v1130_v10 = vld [vmem:[#allocation2 + $0xd8] sm:$0xff]  ;;  %4288 = vmatprep.subr.bf16.mxu0 %v4883_v3  ;;  %4606 = vmatprep.subr.bf16.mxu1 %v4882_v61  ;;  %v4966_v3 = vld [vmem:[%s5445_s5 + $0x8] sm:$0xff] }
 0x17d   : > { %v1148_v41 = vpack.c.bf16 %v1130_v10, %v1070_v40 }
 0x17e   : > { %4607 = vmatpush3.bf16.msra.mxu1 %v4882_v61 }
 0x17f   : > { %4595 = vmatmul.mubr.bf16.gmra.mxu0 %v1148_v41  ;;  %4608 = vmatprep.subr.bf16.mxu1 %v4887_v26 }
 0x180   : > { %4289 = vmatpush3.bf16.msra.mxu0 %v4884_v19 }
 0x181   : > { %4290 = vmatprep.subr.bf16.mxu0 %v4885_v21 }
 0x182   : > { %4609 = vmatpush3.bf16.msra.mxu1 %v4887_v26 }
 0x183   : > { %4610 = vmatprep.subr.bf16.mxu1 %v4890_v28 }
 0x184   : > { %4291 = vmatpush3.bf16.msra.mxu0 %v4886_v53 }
 0x185   : > { %4292 = vmatprep.subr.bf16.mxu0 %v4888_v27 }
 0x186   : > { %4611 = vmatpush3.bf16.msra.mxu1 %v4890_v28 }
 0x187   : > { %4612 = vmatprep.subr.bf16.mxu1 %v4891_v54 }
 0x188   : > { %4293 = vmatpush3.bf16.msra.mxu0 %v4889_v0  ;;  %v4967_v0 = vld [vmem:[%s5445_s5 + $0x18] sm:$0xff] }
 0x189   : > { %4626 = vmatprep.subr.bf16.mxu0 %v5887_v31 }
 0x18a   : > { %4613 = vmatpush3.bf16.msra.mxu1 %v4891_v54 }
 0x213   : > { %v4228_v18 = vpop.f32.mrf.mxu1 }
 0x215   : > { %v4229_v25 = vpop.f32.mrf.mxu1 }
 0x216   : > { %v4230_v16 = vadd.f32 %v4229_v25, %v4228_v18 }
 0x217   : > { %v4231_v55 = vpop.f32.mrf.mxu1 }
 0x218   : > { %v1381_v44 = vadd.f32 %v4230_v16, %v5892_v38 }
 0x219   : > { %v4232_v37 = vpop.f32.mrf.mxu1 }
 0x21a   : > { %v4233_v35 = vadd.f32 %v4232_v37, %v4231_v55 }
 0x21b   : > { %v4234_v13 = vpop.f32.mrf.mxu1 }
 0x21c   : > { %v4588_v12 = vpop.f32.mrf.mxu0  ;;  %v1384_v50 = vadd.f32 %v4233_v35, %v5892_v38 }
 0x21d   : > { %v4235_v23 = vpop.f32.mrf.mxu1 }
 0x21e   : > { %v4236_v47 = vadd.f32 %v4235_v23, %v4234_v13  ;;  %v1461_v36 = vpop.f32.mrf.mxu0 }
 0x21f   : > { %v4237_v49 = vpop.f32.mrf.mxu1  ;;  %v1462_v51 = vadd.f32 %v1461_v36, %v1381_v44 }
 0x220   : > { %v1389_v40 = vadd.f32 %v4236_v47, %v5892_v38  ;;  %v4589_v10 = vpop.f32.mrf.mxu0 }
 0x221   : > { %v4238_v41 = vpop.f32.mrf.mxu1  ;;  %v5897_v59 = vadd.f32 %v4964_v58, %v1462_v51 }
 0x222   : > { %v1470_v33 = vadd.f32 %v4588_v12, %v1389_v40  ;;  %v4239_v57 = vadd.f32 %v4238_v41, %v4237_v49  ;;  %v1464_v60 = vpop.f32.mrf.mxu0 }
 0x223   : > { %vm1520_vm3 = vcmp.ge.f32.partialorder %v5897_v59, 0.0  ;;  %v1532_v62 = vmul.f32 0.1, %v5897_v59  ;;  %v4240_v46 = vpop.f32.mrf.mxu1  ;;  %v1465_v20 = vadd.f32 %v1464_v60, %v1384_v50 }
 0x224   : > { %v5903_v5 = vadd.f32 %v4965_v1, %v1470_v33  ;;  %v1392_v2 = vadd.f32 %v4239_v57, %v5892_v38 }
 0x225   : > { %v1544_v11 = vsel %vm1520_vm3, %v5897_v59, %v1532_v62  ;;  %v4241_v15 = vpop.f32.mrf.mxu1  ;;  %v5908_v6 = vadd.f32 %v4966_v3, %v1465_v20 }
 0x226   : > { %vm1522_vm8 = vcmp.ge.f32.partialorder %v5903_v5, 0.0  ;;  %v1534_v19 = vmul.f32 0.1, %v5903_v5  ;;  %v1556_v21 = vsel %vm6663_vm0, %v1544_v11, 0.0  ;;  %v1473_v61 = vadd.f32 %v4589_v10, %v1392_v2 }
 0x227   : > { %v1581_v53 = vrot.slane %v1556_v21, 5  ;;  %v4243_v26 = vpop.f32.mrf.mxu1  ;;  %vm1521_vm9 = vcmp.ge.f32.partialorder %v5908_v6, 0.0  ;;  %v1533_v54 = vmul.f32 0.1, %v5908_v6  ;;  %v4242_v55 = vadd.f32 %v4241_v15, %v4240_v46 }
 0x228   : > { %v1546_v27 = vsel %vm1522_vm8, %v5903_v5, %v1534_v19  ;;  %v5916_v28 = vadd.f32 %v4967_v0, %v1473_v61  ;;  %vm6533_vm8 = vcmask 1044480   ;;  %vm6665_vm0 = vnez %v6577_v48 }
 0x229   : > { %v5922_v18 = vsel %vm6664_vm14, %v1546_v27, 0.0  ;;  %1616 = vst [vmem:[#allocation2 + $0x68] sm:$0xf8] %v1581_v53  ;;  %v4244_v25 = vpop.f32.mrf.mxu1  ;;  %v1545_v37 = vsel %vm1521_vm9, %v5908_v6, %v1533_v54  ;;  %v1641_v23 = vrot.slane %v1556_v21, 3  ;;  %vm6535_vm14 = vcmask 1042432  }
 0x22a   : > { %vm1523_vm3 = vcmp.ge.f32.partialorder %v5916_v28, 0.0  ;;  %v1535_v32 = vmul.f32 0.1, %v5916_v28  ;;  %v1644_v16 = vrot.slane %v5922_v18, 3  ;;  %v1557_v35 = vsel %vm6665_vm0, %v1545_v37, 0.0 }
 0x22b   : > { %v4246_v13 = vpop.f32.mrf.mxu1  ;;  %v1582_v44 = vrot.slane %v1557_v35, 5  ;;  %v1642_v47 = vrot.slane %v1557_v35, 3  ;;  %v1397_v40 = vadd.f32 %v4242_v55, %v5892_v38  ;;  %v4245_v50 = vadd.f32 %v4244_v25, %v4243_v26 }
 0x22c   : > { %v1547_v12 = vsel %vm1523_vm3, %v5916_v28, %v1535_v32  ;;  %v4592_v51 = vpop.f32.mrf.mxu0  ;;  %v5015_v46 = vpack.c.bf16 %v1545_v37, %v1544_v11  ;;  %vm6666_vm9 = vnez %v6585_v17  ;;  %v1584_v25 = vrot.slane %v5922_v18, 5  ;;  %v4969_v32 = vld [vmem:[%s5445_s5 + $0x30] sm:$0xff] }
 0x22d   : > { %v4247_v36 = vpop.f32.mrf.mxu1  ;;  %v5934_v10 = vsel %vm6645_vm10, %v1547_v12, 0.0  ;;  %v1643_v41 = vsel %vm6533_vm8, %v1641_v23, %v1642_v47  ;;  %v1645_v58 = vsel %vm6533_vm8, %v1642_v47, %v1644_v16  ;;  %v1583_v57 = vsel %vm6535_vm14, %v1581_v53, %v1582_v44  ;;  %v4968_v53 = vld [vmem:[%s5445_s5 + $0x20] sm:$0xff] }
 0x22e   : > { %v4248_v49 = vadd.f32 %v4247_v36, %v4246_v13  ;;  %v1477_v62 = vpop.f32.mrf.mxu0  ;;  %5016 = vmatprep.mubr.msk.bf16.mxu0 %vm6666_vm9, %v5015_v46  ;;  %v1726_v1 = vpack.c.bf16 %v1645_v58, %v1643_v41  ;;  %v1586_v19 = vrot.slane %v5934_v10, 5  ;;  %v1400_v11 = vadd.f32 %v4245_v50, %v5892_v38 }
 0x22f   : > { %v4249_v33 = vpop.f32.mrf.mxu1  ;;  %v1478_v15 = vadd.f32 %v1477_v62, %v1397_v40  ;;  %v5018_v35 = vpack.c.bf16 %v1547_v12, %v1546_v27  ;;  %v4970_v40 = vld [vmem:[%s5445_s5 + $0x28] sm:$0xff]  ;;  %v1585_v50 = vsel %vm6535_vm14, %v1582_v44, %v1584_v25 }
 0x230   : > { %v1405_v60 = vadd.f32 %v4248_v49, %v5892_v38  ;;  %v1688_v20 = vld [vmem:[#allocation2 + $0x68] sm:$0xff]  ;;  %v4593_v26 = vpop.f32.mrf.mxu0  ;;  %4614 = vmatprep.mubr.bf16.mxu1 %v1726_v1  ;;  %v1587_v49 = vsel %vm6535_vm14, %v1584_v25, %v1586_v19 }
 0x231   : > { %v4250_v2 = vpop.f32.mrf.mxu1  ;;  %v1724_v3 = vpack.c.bf16 %v1583_v57, %v1688_v20  ;;  %v5946_v0 = vadd.f32 %v4968_v53, %v1478_v15  ;;  %v1727_v1 = vpack.c.bf16 %v1587_v49, %v1585_v50 }
 0x232   : > { %v1486_v21 = vadd.f32 %v4592_v51, %v1405_v60  ;;  %v4251_v61 = vadd.f32 %v4250_v2, %v4249_v33  ;;  %v1480_v13 = vpop.f32.mrf.mxu0  ;;  %v1646_v51 = vrot.slane %v5934_v10, 3  ;;  %v4971_v60 = vld [vmem:[%s5445_s5 + $0x38] sm:$0xff] }
 0x233   : > { %v4252_v54 = vpop.f32.mrf.mxu1  ;;  %1972 = vmatmul.mubr.bf16.vlgmr.msra.gmra.mxu0 %v1724_v3  ;;  %vm1524_vm3 = vcmp.ge.f32.partialorder %v5946_v0, 0.0  ;;  %v1536_v23 = vmul.f32 0.1, %v5946_v0  ;;  %v1481_v36 = vadd.f32 %v1480_v13, %v1400_v11 }
 0x234   : > { %v5951_v55 = vadd.f32 %v4969_v32, %v1486_v21  ;;  %v1408_v37 = vadd.f32 %v4251_v61, %v5892_v38  ;;  %5019 = vmatprep.mubr.msk.bf16.mxu0 %vm6646_vm5, %v5018_v35  ;;  %4627 = vmatpush3.bf16.msra.mxu0 %v5887_v31  ;;  %vm6667_vm5 = vnez %v6583_v7 }
 0x235   : > { %v4253_v47 = vpop.f32.mrf.mxu1  ;;  %v1548_v31 = vsel %vm1524_vm3, %v5946_v0, %v1536_v23  ;;  %v5967_v41 = vadd.f32 %v4970_v40, %v1481_v36 }
 0x236   : > { %vm1526_vm8 = vcmp.ge.f32.partialorder %v5951_v55, 0.0  ;;  %v1538_v27 = vmul.f32 0.1, %v5951_v55  ;;  %v1489_v12 = vadd.f32 %v4593_v26, %v1408_v37  ;;  %v1560_v57 = vsel %vm6667_vm5, %v1548_v31, 0.0 }
 0x237   : > { %v4255_v58 = vpop.f32.mrf.mxu1  ;;  %v1648_v46 = vrot.slane %v1560_v57, 3  ;;  %vm1525_vm14 = vcmp.ge.f32.partialorder %v5967_v41, 0.0  ;;  %v1537_v21 = vmul.f32 0.1, %v5967_v41  ;;  %v1588_v26 = vrot.slane %v1560_v57, 5 }
 0x238   : > { %v1550_v33 = vsel %vm1526_vm8, %v5951_v55, %v1538_v27  ;;  %v5974_v62 = vadd.f32 %v4971_v60, %v1489_v12  ;;  %vm6668_vm8 = vcmask 1044480   ;;  %v4254_v11 = vadd.f32 %v4253_v47, %v4252_v54 }
 0x239   : > { %v4256_v20 = vpop.f32.mrf.mxu1  ;;  %v5978_v2 = vsel %vm5628_vm7, %v1550_v33, 0.0  ;;  %v1647_v44 = vsel %vm6668_vm8, %v1644_v16, %v1646_v51  ;;  %vm6669_vm5 = vmmov %vm6668_vm8  ;;  %v1549_v37 = vsel %vm1525_vm14, %v5967_v41, %v1537_v21 }
 0x23a   : > { %vm1527_vm3 = vcmp.ge.f32.partialorder %v5974_v62, 0.0  ;;  %v1539_v15 = vmul.f32 0.1, %v5974_v62  ;;  %v1649_v3 = vsel %vm6669_vm5, %v1646_v51, %v1648_v46  ;;  %v1652_v32 = vrot.slane %v5978_v2, 3 }
 0x23b   : > { %v4258_v61 = vpop.f32.mrf.mxu1  ;;  %1980 = vmatmul.mubr.bf16.gmra.mxu0 %v1727_v1  ;;  %v1729_v25 = vpack.c.bf16 %v1649_v3, %v1647_v44  ;;  %v1561_v16 = vsel %vm5615_vm2, %v1549_v37, 0.0  ;;  %vm6670_vm5 = vcmask 1042432   ;;  %v4257_v47 = vadd.f32 %v4256_v20, %v4255_v58 }
 0x23c   : > { %v1551_v53 = vsel %vm1527_vm3, %v5974_v62, %v1539_v15  ;;  %v1590_v23 = vrot.slane %v1561_v16, 5  ;;  %v1650_v36 = vrot.slane %v1561_v16, 3  ;;  %v1589_v54 = vsel %vm6670_vm5, %v1586_v19, %v1588_v26  ;;  %vm6671_vm14 = vmmov %vm6670_vm5 }
 0x23d   : > { %v4259_v13 = vpop.f32.mrf.mxu1  ;;  %v5993_v18 = vsel %vm5660_vm12, %v1551_v53, 0.0  ;;  %4615 = vmatmul.mubr.bf16.vlgmr.msra.gmra.mxu1 %v1729_v25  ;;  %v1413_v51 = vadd.f32 %v4254_v11, %v5892_v38  ;;  %vm6672_vm3 = vmmov %vm6668_vm8  ;;  %v5021_v19 = vpack.c.bf16 %v1549_v37, %v1548_v31  ;;  %v1592_v21 = vrot.slane %v5978_v2, 5  ;;  %v4973_v31 = vld [vmem:[%s5445_s5 + $0x40] sm:$0xff] }
 0x23e   : > { %v4260_v35 = vadd.f32 %v4259_v13, %v4258_v61  ;;  %v1594_v40 = vrot.slane %v5993_v18, 5  ;;  %v1591_v50 = vsel %vm6671_vm14, %v1588_v26, %v1590_v23  ;;  %v1651_v57 = vsel %vm6672_vm3, %v1648_v46, %v1650_v36  ;;  %vm6673_vm8 = vmmov %vm6672_vm3  ;;  %v4972_v61 = vld [vmem:[%s5445_s5 + $0x50] sm:$0xff] }
 0x23f   : > { %v4261_v49 = vpop.f32.mrf.mxu1  ;;  %v4596_v27 = vpop.f32.mrf.mxu0  ;;  %v1653_v60 = vsel %vm6673_vm8, %v1650_v36, %v1652_v32  ;;  %5022 = vmatprep.mubr.msk.bf16.mxu0 %vm5751_vm4, %v5021_v19  ;;  %v1730_v15 = vpack.c.bf16 %v1591_v50, %v1589_v54  ;;  %v1416_v37 = vadd.f32 %v4257_v47, %v5892_v38  ;;  %v5024_v13 = vpack.c.bf16 %v1551_v53, %v1550_v33  ;;  %v4974_v47 = vld [vmem:[%s5445_s5 + $0x58] sm:$0xff]  ;;  %vm6676_vm8 = vmmov %vm6670_vm5 }
 0x240   : > { %v1421_v12 = vadd.f32 %v4260_v35, %v5892_v38  ;;  %v1732_v44 = vpack.c.bf16 %v1653_v60, %v1651_v57  ;;  %v1595_v16 = vsel %vm6670_vm5, %v1592_v21, %v1594_v40  ;;  %v1654_v53 = vrot.slane %v5993_v18, 3 }
 0x241   : > { %v4262_v10 = vpop.f32.mrf.mxu1  ;;  %v1493_v20 = vpop.f32.mrf.mxu0  ;;  %vm6677_vm5 = vnez %v6602_v56 }
 0x242   : > { %v1502_v58 = vadd.f32 %v4596_v27, %v1421_v12  ;;  %v4263_v1 = vadd.f32 %v4262_v10, %v4261_v49  ;;  %v1494_v3 = vadd.f32 %v1493_v20, %v1413_v51  ;;  %4618 = vmatprep.mubr.bf16.mxu1 %v1732_v44  ;;  %v1593_v27 = vsel %vm6676_vm8, %v1590_v23, %v1592_v21  ;;  %v4975_v51 = vld [vmem:[%s5445_s5 + $0x48] sm:$0xff] }
 0x243   : > { %v4597_v26 = vpop.f32.mrf.mxu0  ;;  %1988 = vmatmul.mubr.bf16.gmra.mxu0 %v1730_v15  ;;  %v1733_v10 = vpack.c.bf16 %v1595_v16, %v1593_v27  ;;  %vm6680_vm8 = vnez %v6612_v22 }
 0x244   : > { %v6012_v46 = vadd.f32 %v4972_v61, %v1502_v58  ;;  %v1424_v11 = vadd.f32 %v4263_v1, %v5892_v38  ;;  %v6016_v25 = vadd.f32 %v4973_v31, %v1494_v3  ;;  %5025 = vmatprep.mubr.msk.bf16.mxu0 %vm5770_vm1, %v5024_v13 }
 0x245   : > { %v1496_v49 = vpop.f32.mrf.mxu0 }
 0x246   : > { %6674 = vst [vmem:[#allocation17_spill] sm:$0xff] %v6012_v46  ;;  %v1542_v35 = vmul.f32 0.1, %v6012_v46  ;;  %v1505_v36 = vadd.f32 %v4597_v26, %v1424_v11  ;;  %vm1530_vm14 = vcmp.ge.f32.partialorder %v6012_v46, 0.0  ;;  %vm1528_vm3 = vcmp.ge.f32.partialorder %v6016_v25, 0.0 }
 0x247   : > { %v1540_v54 = vmul.f32 0.1, %v6016_v25  ;;  %v1497_v38 = vadd.f32 %v1496_v49, %v1416_v37 }
 0x248   : > { %v6029_v33 = vadd.f32 %v4974_v47, %v1505_v36  ;;  %v1554_v57 = vsel %vm1530_vm14, %v6012_v46, %v1542_v35 }
 0x249   : > { %v1552_v12 = vsel %vm1528_vm3, %v6016_v25, %v1540_v54  ;;  %v6035_v50 = vadd.f32 %v4975_v51, %v1497_v38  ;;  %vm6678_vm3 = vcmask 1044480   ;;  %v1566_v1 = vsel %vm5727_vm6, %v1554_v57, 0.0 }
 0x24a   : > { %6675 = vst [vmem:[#allocation18_spill] sm:$0xff] %v6029_v33  ;;  %v1564_v60 = vsel %vm6677_vm5, %v1552_v12, 0.0  ;;  %vm1531_vm1 = vcmp.ge.f32.partialorder %v6029_v33, 0.0  ;;  %v1543_v58 = vmul.f32 0.1, %v6029_v33  ;;  %v1655_v20 = vsel %vm6678_vm3, %v1652_v32, %v1654_v53  ;;  %vm6679_vm14 = vmmov %vm6678_vm3 }
 0x24b   : > { %v1656_v19 = vrot.slane %v1564_v60, 3  ;;  %vm1529_vm4 = vcmp.ge.f32.partialorder %v6035_v50, 0.0  ;;  %v1541_v23 = vmul.f32 0.1, %v6035_v50  ;;  %1996 = vmatmul.mubr.bf16.gmra.mxu0 %v1733_v10  ;;  %v1596_v3 = vrot.slane %v1564_v60, 5 }
 0x24c   : > { %v1555_v44 = vsel %vm1531_vm1, %v6029_v33, %v1543_v58  ;;  %v1660_v31 = vrot.slane %v1566_v1, 3  ;;  %vm6681_vm3 = vcmask 1042432   ;;  %v4895_v58 = vld [vmem:[#allocation6 + $0x278] sm:$0xff]  }
 0x24d   : > { %v1657_v15 = vsel %vm6679_vm14, %v1654_v53, %v1656_v19  ;;  %v1567_v21 = vsel %vm5735_vm15, %v1555_v44, 0.0  ;;  %v1553_v61 = vsel %vm1529_vm4, %v6035_v50, %v1541_v23  ;;  %v1597_v13 = vsel %vm6681_vm3, %v1594_v40, %v1596_v3  ;;  %vm6682_vm1 = vmmov %vm6681_vm3  ;;  %v4893_v23 = vld [vmem:[#allocation6 + $0x2f0] sm:$0xff]  }
 0x24e   : > { %v1735_v26 = vpack.c.bf16 %v1657_v15, %v1655_v20  ;;  %v1662_v11 = vrot.slane %v1567_v21, 3  ;;  %v1565_v2 = vsel %vm6680_vm8, %v1553_v61, 0.0  ;;  %vm6683_vm15 = vmmov %vm6679_vm14  ;;  %v5027_v49 = vpack.c.bf16 %v1553_v61, %v1552_v12  ;;  %4628 = vmatprep.subr.bf16.mxu0 %v4893_v23  ;;  %v4898_v20 = vld [vmem:[#allocation6 + $0x270] sm:$0xff]   ;;  %v4899_v15 = vld [vmem:[#allocation6 + $0x2a8] sm:$0xff]  }
 0x24f   : > { %v1598_v32 = vrot.slane %v1565_v2, 5  ;;  %v1658_v37 = vrot.slane %v1565_v2, 3  ;;  %v1602_v47 = vrot.slane %v1567_v21, 5  ;;  %v1600_v53 = vrot.slane %v1566_v1, 5  ;;  %vm6684_vm4 = vmmov %vm6682_vm1  ;;  %4629 = vmatpush3.bf16.msra.mxu0 %v4893_v23  ;;  %v4896_v1 = vld [vmem:[#allocation6 + $0x2e8] sm:$0xff]   ;;  %v4903_v21 = vld [vmem:[#allocation6 + $0x260] sm:$0xff]  }
 0x250   : > { %4619 = vmatmul.mubr.bf16.gmra.mxu1 %v1735_v26  ;;  %1687 = vst [vmem:[#allocation2 + $0xd8] sm:$0x1f] %v1662_v11  ;;  %5028 = vmatprep.mubr.msk.bf16.mxu0 %vm6656_vm11, %v5027_v49  ;;  %v5030_v27 = vpack.c.bf16 %v1555_v44, %v1554_v57  ;;  %vm6685_vm3 = vmmov %vm6679_vm14  ;;  %v4897_v57 = vld [vmem:[#allocation6 + $0x2b0] sm:$0xff]   ;;  %v4900_v44 = vld [vmem:[#allocation6 + $0x268] sm:$0xff]  }
 0x251   : > { %v1599_v16 = vsel %vm6682_vm1, %v1596_v3, %v1598_v32  ;;  %v1659_v35 = vsel %vm6679_vm14, %v1656_v19, %v1658_v37  ;;  %v1661_v36 = vsel %vm6683_vm15, %v1658_v37, %v1660_v31  ;;  %v1603_v18 = vsel %vm6684_vm4, %v1600_v53, %v1602_v47  ;;  %v4894_v19 = vld [vmem:[#allocation6 + $0x2b8] sm:$0xff]   ;;  %4630 = vmatprep.subr.bf16.mxu0 %v4896_v1  ;;  %v4902_v3 = vld [vmem:[#allocation6 + $0x2a0] sm:$0xff]   ;;  %v4908_v2 = vld [vmem:[#allocation6 + $0x250] sm:$0xff]  }
 0x252   : > { %v1738_v54 = vpack.c.bf16 %v1661_v36, %v1659_v35  ;;  %v1736_v38 = vpack.c.bf16 %v1599_v16, %v1597_v13  ;;  %v1663_v40 = vsel %vm6685_vm3, %v1660_v31, %v1662_v11  ;;  %v1601_v51 = vsel %vm6682_vm1, %v1598_v32, %v1600_v53  ;;  %4344 = vmatprep.subr.bf16.mxu1 %v4894_v19  ;;  %v4905_v61 = vld [vmem:[#allocation6 + $0x298] sm:$0xff]   ;;  %v4907_v11 = vld [vmem:[#allocation6 + $0x290] sm:$0xff]   ;;  %v4901_v31 = vld [vmem:[#allocation6 + $0x2e0] sm:$0xff]  }
 0x253   : > { %v1739_v10 = vpack.c.bf16 %v1603_v18, %v1601_v51  ;;  %4345 = vmatpush3.bf16.msra.mxu1 %v4895_v58  ;;  %4631 = vmatpush3.bf16.msra.mxu0 %v4896_v1  ;;  %v4906_v26 = vld [vmem:[#allocation6 + $0x258] sm:$0xff]   ;;  %v4910_v32 = vld [vmem:[#allocation6 + $0x288] sm:$0xff]   ;;  %v4913_v16 = vld [vmem:[#allocation6 + $0x280] sm:$0xff]   ;;  %v1793_v18 = vsub.s32 2, %v5456_v8  ;;  %vm6686_vm4 = vnez %v6575_v43  ;;  %vm6687_vm3 = vnez %v6579_v63 }
 0x254   : > { %4622 = vmatprep.mubr.bf16.mxu1 %v1738_v54  ;;  %2004 = vmatmul.mubr.bf16.gmra.mxu0 %v1736_v38  ;;  %v4911_v37 = vld [vmem:[#allocation6 + $0x248] sm:$0xff]   ;;  %v4904_v13 = vld [vmem:[#allocation6 + $0x2d8] sm:$0xff]   ;;  %v4914_v35 = vld [vmem:[#allocation6 + $0x240] sm:$0xff]  }
 0x255   : > { %5031 = vmatprep.mubr.msk.bf16.mxu0 %vm6661_vm13, %v5030_v27  ;;  %4346 = vmatprep.subr.bf16.mxu1 %v4897_v57  ;;  %v4909_v36 = vld [vmem:[#allocation6 + $0x2d0] sm:$0xff]   ;;  %v4912_v49 = vld [vmem:[#allocation6 + $0x2c8] sm:$0xff]   ;;  %v4915_v54 = vld [vmem:[#allocation6 + $0x2c0] sm:$0xff]  }
 0x256   : > { %4632 = vmatprep.subr.bf16.mxu0 %v4901_v31  ;;  %v6069_v38 = vld [vmem:[#allocation6 + $0x3b8] sm:$0xff]  }
 0x257   : > { %v1723_v12 = vld [vmem:[#allocation2 + $0xd8] sm:$0xff]  ;;  %4347 = vmatpush3.bf16.msra.mxu1 %v4898_v20  ;;  %4633 = vmatpush3.bf16.msra.mxu0 %v4901_v31 }
 0x258   : > { %v1741_v60 = vpack.c.bf16 %v1723_v12, %v1663_v40  ;;  %4348 = vmatprep.subr.bf16.mxu1 %v4899_v15  ;;  %4634 = vmatprep.subr.bf16.mxu0 %v4904_v13 }
 0x25a   : > { %4623 = vmatmul.mubr.bf16.gmra.mxu1 %v1741_v60  ;;  %v6073_v60 = vld [vmem:[#allocation8] sm:$0x3f] }
 0x25b   : > { %4349 = vmatpush3.bf16.msra.mxu1 %v4900_v44  ;;  %4635 = vmatpush3.bf16.msra.mxu0 %v4904_v13 }
 0x25c   : > { %2012 = vmatmul.mubr.bf16.gmra.mxu0 %v1739_v10  ;;  %4350 = vmatprep.subr.bf16.mxu1 %v4902_v3  ;;  %v6076_v10 = vrot.slane %v6073_v60, %v1793_v18 }
 0x25d   : > { %4636 = vmatprep.subr.bf16.mxu0 %v4909_v36 }
 0x25f   : > { %4351 = vmatpush3.bf16.msra.mxu1 %v4903_v21  ;;  %4637 = vmatpush3.bf16.msra.mxu0 %v4909_v36 }
 0x260   : > { %4352 = vmatprep.subr.bf16.mxu1 %v4905_v61  ;;  %4638 = vmatprep.subr.bf16.mxu0 %v4912_v49 }
 0x263   : > { %4353 = vmatpush3.bf16.msra.mxu1 %v4906_v26  ;;  %4639 = vmatpush3.bf16.msra.mxu0 %v4912_v49 }
 0x264   : > { %4354 = vmatprep.subr.bf16.mxu1 %v4907_v11  ;;  %4640 = vmatprep.subr.bf16.mxu0 %v4915_v54 }
 0x267   : > { %4355 = vmatpush3.bf16.msra.mxu1 %v4908_v2  ;;  %4641 = vmatpush3.bf16.msra.mxu0 %v4915_v54 }
 0x268   : > { %4356 = vmatprep.subr.bf16.mxu1 %v4910_v32 }
 0x26b   : > { %4357 = vmatpush3.bf16.msra.mxu1 %v4911_v37 }
 0x26c   : > { %4358 = vmatprep.subr.bf16.mxu1 %v4913_v16 }
 0x26f   : > { %4359 = vmatpush3.bf16.msra.mxu1 %v4914_v35 }
 0x270   : > { %4654 = vmatprep.subr.bf16.mxu1 %v6069_v38 }
 0x2f3   : > { %v4294_v47 = vpop.f32.mrf.mxu0 }
 0x2f5   : > { %v4295_v53 = vpop.f32.mrf.mxu0 }
 0x2f6   : > { %v4296_v51 = vadd.f32 %v4295_v53, %v4294_v47 }
 0x2f7   : > { %v4297_v27 = vpop.f32.mrf.mxu0 }
 0x2f8   : > { %v1974_v1 = vadd.f32 %v4296_v51, %v6076_v10 }
 0x2f9   : > { %v4298_v40 = vpop.f32.mrf.mxu0 }
 0x2fa   : > { %v4299_v57 = vadd.f32 %v4298_v40, %v4297_v27 }
 0x2fb   : > { %v4300_v12 = vpop.f32.mrf.mxu0 }
 0x2fc   : > { %v1977_v31 = vadd.f32 %v4299_v57, %v6076_v10 }
 0x2fd   : > { %v4301_v19 = vpop.f32.mrf.mxu0  ;;  %v4616_v23 = vpop.f32.mrf.mxu1 }
 0x2fe   : > { %v4302_v58 = vadd.f32 %v4301_v19, %v4300_v12 }
 0x2ff   : > { %v4303_v20 = vpop.f32.mrf.mxu0  ;;  %v2054_v44 = vpop.f32.mrf.mxu1 }
 0x300   : > { %v1982_v15 = vadd.f32 %v4302_v58, %v6076_v10  ;;  %v2055_v21 = vadd.f32 %v2054_v44, %v1974_v1 }
 0x301   : > { %v4304_v3 = vpop.f32.mrf.mxu0  ;;  %v4617_v11 = vpop.f32.mrf.mxu1 }
 0x302   : > { %v2063_v61 = vadd.f32 %v4616_v23, %v1982_v15  ;;  %v4305_v26 = vadd.f32 %v4304_v3, %v4303_v20  ;;  %vm2101_vm15 = vcmp.ge.f32.partialorder %v2055_v21, 0.0  ;;  %v2113_v2 = vmul.f32 0.1, %v2055_v21 }
 0x303   : > { %v4306_v37 = vpop.f32.mrf.mxu0  ;;  %v2057_v16 = vpop.f32.mrf.mxu1 }
 0x304   : > { %vm2103_vm14 = vcmp.ge.f32.partialorder %v2063_v61, 0.0  ;;  %v2115_v32 = vmul.f32 0.1, %v2063_v61  ;;  %v1985_v13 = vadd.f32 %v4305_v26, %v6076_v10  ;;  %v2125_v35 = vsel %vm2101_vm15, %v2055_v21, %v2113_v2 }
 0x305   : > { %v2058_v36 = vadd.f32 %v2057_v16, %v1977_v31  ;;  %v2137_v54 = vsel %vm6686_vm4, %v2125_v35, 0.0  ;;  %v4307_v53 = vpop.f32.mrf.mxu0  ;;  %vm6688_vm15 = vcmask 1046528  }
 0x306   : > { %v2127_v49 = vsel %vm2103_vm14, %v2063_v61, %v2115_v32  ;;  %v2066_v47 = vadd.f32 %v4617_v11, %v1985_v13  ;;  %v2161_v27 = vrot.slane %v2137_v54, 7  ;;  %v2220_v57 = vrot.slane %v2137_v54, 1  ;;  %vm6689_vm14 = vmmov %vm6688_vm15 }
 0x307   : > { %v6086_v18 = vsel %vm6687_vm3, %v2127_v49, 0.0  ;;  %v4309_v51 = vpop.f32.mrf.mxu0  ;;  %vm2102_vm13 = vcmp.ge.f32.partialorder %v2058_v36, 0.0  ;;  %v2114_v12 = vmul.f32 0.1, %v2058_v36  ;;  %v4308_v44 = vadd.f32 %v4307_v53, %v4306_v37 }
 0x308   : > { %v2116_v40 = vmul.f32 0.1, %v2066_v47  ;;  %2196 = vst [vmem:[#allocation2 + $0x68] sm:$0xfe] %v2161_v27  ;;  %vm2104_vm1 = vcmp.ge.f32.partialorder %v2066_v47, 0.0  ;;  %v2223_v58 = vrot.slane %v6086_v18, 1 }
 0x309   : > { %v4310_v19 = vpop.f32.mrf.mxu0  ;;  %v2126_v23 = vsel %vm2102_vm13, %v2058_v36, %v2114_v12  ;;  %vm6690_vm13 = vcmask 1040384   ;;  %v1990_v53 = vadd.f32 %v4308_v44, %v6076_v10 }
 0x30a   : > { %v2128_v20 = vsel %vm2104_vm1, %v2066_v47, %v2116_v40  ;;  %v2138_v1 = vsel %vm6665_vm0, %v2126_v23, 0.0  ;;  %v5033_v31 = vpack.c.bf16 %v2126_v23, %v2125_v35  ;;  %v4311_v47 = vadd.f32 %v4310_v19, %v4309_v51 }
 0x30b   : > { %v4312_v15 = vpop.f32.mrf.mxu0  ;;  %v2162_v3 = vrot.slane %v2138_v1, 7  ;;  %v2221_v21 = vrot.slane %v2138_v1, 1  ;;  %v6093_v26 = vsel %vm6645_vm10, %v2128_v20, 0.0  ;;  %vm6691_vm1 = vnez %v6608_v9 }
 0x30c   : > { %5034 = vmatprep.mubr.msk.bf16.mxu1 %vm6666_vm9, %v5033_v31  ;;  %v2166_v12 = vrot.slane %v6093_v26, 7  ;;  %v5036_v31 = vpack.c.bf16 %v2128_v20, %v2127_v49  ;;  %v1993_v44 = vadd.f32 %v4311_v47, %v6076_v10  ;;  %vm6694_vm9 = vnez %v6583_v7 }
 0x30d   : > { %v4313_v61 = vpop.f32.mrf.mxu0  ;;  %v2222_v11 = vsel %vm6688_vm15, %v2220_v57, %v2221_v21  ;;  %v2224_v2 = vsel %vm6689_vm14, %v2221_v21, %v2223_v58  ;;  %v2163_v32 = vsel %vm6690_vm13, %v2161_v27, %v2162_v3  ;;  %v2164_v27 = vrot.slane %v6086_v18, 7  ;;  %vm6692_vm14 = vmmov %vm6690_vm13 }
 0x30e   : > { %v4314_v16 = vadd.f32 %v4313_v61, %v4312_v15  ;;  %v2305_v54 = vpack.c.bf16 %v2224_v2, %v2222_v11  ;;  %v2225_v18 = vrot.slane %v6093_v26, 1 }
 0x30f   : > { %v4315_v37 = vpop.f32.mrf.mxu0  ;;  %v2267_v36 = vld [vmem:[#allocation2 + $0x68] sm:$0xff]  ;;  %v2167_v2 = vsel %vm6692_vm14, %v2164_v27, %v2166_v12 }
 0x310   : > { %v4620_v13 = vpop.f32.mrf.mxu1  ;;  %v2303_v40 = vpack.c.bf16 %v2163_v32, %v2267_v36  ;;  %v1998_v57 = vadd.f32 %v4314_v16, %v6076_v10  ;;  %4642 = vmatprep.mubr.bf16.mxu0 %v2305_v54 }
 0x311   : > { %v4316_v35 = vpop.f32.mrf.mxu0 }
 0x312   : > { %v2070_v1 = vpop.f32.mrf.mxu1  ;;  %v4317_v21 = vadd.f32 %v4316_v35, %v4315_v37  ;;  %2551 = vmatmul.mubr.bf16.vlgmr.msra.gmra.mxu1 %v2303_v40  ;;  %v2079_v15 = vadd.f32 %v4620_v13, %v1998_v57 }
 0x313   : > { %v2071_v23 = vadd.f32 %v2070_v1, %v1990_v53  ;;  %5037 = vmatprep.mubr.msk.bf16.mxu1 %vm6691_vm1, %v5036_v31  ;;  %4655 = vmatpush3.bf16.msra.mxu1 %v6069_v38  ;;  %vm6693_vm1 = vmmov %vm6692_vm14  ;;  %vm6695_vm14 = vcmask 1046528  }
 0x314   : > { %v4621_v61 = vpop.f32.mrf.mxu1  ;;  %v2001_v19 = vadd.f32 %v4317_v21, %v6076_v10  ;;  %v4318_v11 = vpop.f32.mrf.mxu0  ;;  %vm2107_vm13 = vcmp.ge.f32.partialorder %v2079_v15, 0.0  ;;  %v2119_v49 = vmul.f32 0.1, %v2079_v15  ;;  %v2165_v37 = vsel %vm6693_vm1, %v2162_v3, %v2164_v27  ;;  %vm6696_vm1 = vmmov %vm6695_vm14 }
 0x315   : > { %vm2105_vm15 = vcmp.ge.f32.partialorder %v2071_v23, 0.0  ;;  %v2117_v51 = vmul.f32 0.1, %v2071_v23  ;;  %v2306_v57 = vpack.c.bf16 %v2167_v2, %v2165_v37  ;;  %v2226_v1 = vsel %vm6695_vm14, %v2223_v58, %v2225_v18  ;;  %vm6700_vm14 = vmmov %vm6696_vm1 }
 0x316   : > { %v2073_v20 = vpop.f32.mrf.mxu1  ;;  %v2082_v13 = vadd.f32 %v4621_v61, %v2001_v19  ;;  %v4319_v38 = vpop.f32.mrf.mxu0  ;;  %v6114_v36 = vsel %vm2107_vm13, %v2079_v15, %v2119_v49  ;;  %vm6699_vm13 = vmmov %vm6696_vm1 }
 0x317   : > { %v2129_v32 = vsel %vm2105_vm15, %v2071_v23, %v2117_v51  ;;  %v2074_v16 = vadd.f32 %v2073_v20, %v1993_v44  ;;  %v4320_v47 = vadd.f32 %v4319_v38, %v4318_v11  ;;  %v6122_v23 = vsel %vm5628_vm7, %v6114_v36, 0.0 }
 0x318   : > { %v2141_v54 = vsel %vm6694_vm9, %v2129_v32, 0.0  ;;  %vm2108_vm10 = vcmp.ge.f32.partialorder %v2082_v13, 0.0  ;;  %v4321_v40 = vpop.f32.mrf.mxu0  ;;  %v2120_v35 = vmul.f32 0.1, %v2082_v13  ;;  %v2231_v38 = vrot.slane %v6122_v23, 1 }
 0x319   : > { %v2227_v53 = vrot.slane %v2141_v54, 1  ;;  %vm2106_vm0 = vcmp.ge.f32.partialorder %v2074_v16, 0.0  ;;  %v2168_v3 = vrot.slane %v2141_v54, 7  ;;  %v2118_v27 = vmul.f32 0.1, %v2074_v16 }
 0x31a   : > { %v4624_v15 = vpop.f32.mrf.mxu1  ;;  %v4322_v61 = vpop.f32.mrf.mxu0  ;;  %2559 = vmatmul.mubr.bf16.gmra.mxu1 %v2306_v57  ;;  %v2132_v31 = vsel %vm2108_vm10, %v2082_v13, %v2120_v35  ;;  %v2006_v51 = vadd.f32 %v4320_v47, %v6076_v10  ;;  %vm6697_vm10 = vcmask 1040384  }
 0x31b   : > { %v2228_v21 = vsel %vm6696_vm1, %v2225_v18, %v2227_v53  ;;  %v4323_v19 = vadd.f32 %v4322_v61, %v4321_v40  ;;  %v2130_v58 = vsel %vm2106_vm0, %v2074_v16, %v2118_v27  ;;  %v6128_v49 = vsel %vm5660_vm12, %v2132_v31, 0.0  ;;  %vm6698_vm15 = vmmov %vm6697_vm10 }
 0x31c   : > { %v2308_v44 = vpack.c.bf16 %v2228_v21, %v2226_v1  ;;  %v2086_v11 = vpop.f32.mrf.mxu1  ;;  %v4324_v2 = vpop.f32.mrf.mxu0  ;;  %v2142_v20 = vsel %vm5615_vm2, %v2130_v58, 0.0  ;;  %v2169_v16 = vsel %vm6697_vm10, %v2166_v12, %v2168_v3  ;;  %v2233_v1 = vrot.slane %v6128_v49, 1 }
 0x31d   : > { %v2087_v18 = vadd.f32 %v2086_v11, %v2006_v51  ;;  %v2170_v37 = vrot.slane %v2142_v20, 7  ;;  %v2229_v13 = vrot.slane %v2142_v20, 1  ;;  %v2009_v57 = vadd.f32 %v4323_v19, %v6076_v10 }
 0x31e   : > { %4643 = vmatmul.mubr.bf16.vlgmr.msra.gmra.mxu0 %v2308_v44  ;;  %v4625_v54 = vpop.f32.mrf.mxu1  ;;  %v4325_v47 = vpop.f32.mrf.mxu0  ;;  %v5039_v44 = vpack.c.bf16 %v2130_v58, %v2129_v32  ;;  %vm6701_vm1 = vnez %v6623_v39  ;;  %v2174_v19 = vrot.slane %v6128_v49, 7 }
 0x31f   : > { %vm2109_vm0 = vcmp.ge.f32.partialorder %v2087_v18, 0.0  ;;  %v2121_v40 = vmul.f32 0.1, %v2087_v18  ;;  %v2171_v35 = vsel %vm6698_vm15, %v2168_v3, %v2170_v37  ;;  %v2230_v21 = vsel %vm6699_vm13, %v2227_v53, %v2229_v13 }
 0x320   : > { %v2232_v27 = vsel %vm6700_vm14, %v2229_v13, %v2231_v38  ;;  %v2089_v61 = vpop.f32.mrf.mxu1  ;;  %v4327_v51 = vpop.f32.mrf.mxu0  ;;  %5040 = vmatprep.mubr.msk.bf16.mxu1 %vm6701_vm1, %v5039_v44  ;;  %v4326_v11 = vadd.f32 %v4325_v47, %v4324_v2  ;;  %v2309_v46 = vpack.c.bf16 %v2171_v35, %v2169_v16  ;;  %vm6705_vm14 = vcmask 1040384  }
 0x321   : > { %v2133_v26 = vsel %vm2109_vm0, %v2087_v18, %v2121_v40  ;;  %v2090_v12 = vadd.f32 %v2089_v61, %v2009_v57  ;;  %v2311_v20 = vpack.c.bf16 %v2232_v27, %v2230_v21  ;;  %v2172_v18 = vrot.slane %v6122_v23, 7  ;;  %vm6702_vm0 = vmmov %vm6699_vm13 }
 0x322   : > { %v2145_v33 = vsel %vm6677_vm5, %v2133_v26, 0.0  ;;  %v4328_v3 = vpop.f32.mrf.mxu0  ;;  %v2014_v32 = vadd.f32 %v4326_v11, %v6076_v10  ;;  %2567 = vmatmul.mubr.bf16.gmra.mxu1 %v2309_v46  ;;  %v2234_v2 = vsel %vm6702_vm0, %v2231_v38, %v2233_v1  ;;  %vm6703_vm15 = vmmov %vm6702_vm0  ;;  %v5042_v40 = vpack.c.bf16 %v2132_v31, %v6114_v36 }
 0x323   : > { %v2235_v53 = vrot.slane %v2145_v33, 1  ;;  %vm2110_vm10 = vcmp.ge.f32.partialorder %v2090_v12, 0.0  ;;  %v2122_v13 = vmul.f32 0.1, %v2090_v12  ;;  %4646 = vmatprep.mubr.bf16.mxu0 %v2311_v20  ;;  %v4329_v58 = vadd.f32 %v4328_v3, %v4327_v51  ;;  %vm6706_vm5 = vmmov %vm6705_vm14 }
 0x324   : > { %vm6704_vm13 = vnez %v6628_v42  ;;  %v2095_v57 = vadd.f32 %v4624_v15, %v2014_v32  ;;  %v2175_v46 = vsel %vm6705_vm14, %v2172_v18, %v2174_v19  ;;  %v2173_v23 = vsel %vm6706_vm5, %v2170_v37, %v2172_v18  ;;  %vm6708_vm14 = vmmov %vm6703_vm15 }
 0x325   : > { %v2236_v47 = vsel %vm6703_vm15, %v2233_v1, %v2235_v53  ;;  %v2134_v49 = vsel %vm2110_vm10, %v2090_v12, %v2122_v13  ;;  %5043 = vmatprep.mubr.msk.bf16.mxu1 %vm6704_vm13, %v5042_v40  ;;  %v2017_v35 = vadd.f32 %v4329_v58, %v6076_v10  ;;  %v2312_v61 = vpack.c.bf16 %v2175_v46, %v2173_v23  ;;  %v4920_v46 = vld [vmem:[#allocation6 + $0x3a8] sm:$0xff]   ;;  %v4921_v23 = vld [vmem:[#allocation6 + $0x370] sm:$0xff]  }
 0x326   : > { %v2146_v16 = vsel %vm6680_vm8, %v2134_v49, 0.0  ;;  %v2314_v21 = vpack.c.bf16 %v2236_v47, %v2234_v2  ;;  %vm2111_vm0 = vcmp.ge.f32.partialorder %v2095_v57, 0.0  ;;  %v2123_v1 = vmul.f32 0.1, %v2095_v57 }
 0x327   : > { %v2237_v38 = vrot.slane %v2146_v16, 1  ;;  %v2098_v27 = vadd.f32 %v4625_v54, %v2017_v35  ;;  %v2178_v51 = vrot.slane %v2146_v16, 7  ;;  %v2176_v11 = vrot.slane %v2145_v33, 7  ;;  %v4918_v35 = vld [vmem:[#allocation6 + $0x378] sm:$0xff]  }
 0x328   : > { %4647 = vmatmul.mubr.bf16.gmra.mxu0 %v2314_v21  ;;  %v2135_v36 = vsel %vm2111_vm0, %v2095_v57, %v2123_v1  ;;  %vm6707_vm5 = vnez %v6620_v29  ;;  %v5045_v20 = vpack.c.bf16 %v2134_v49, %v2133_v26  ;;  %vm6709_vm0 = vcmask 1040384   ;;  %v4919_v21 = vld [vmem:[#allocation6 + $0x338] sm:$0xff]   ;;  %4410 = vmatprep.subr.bf16.mxu0 %v4918_v35  ;;  %v4923_v1 = vld [vmem:[#allocation6 + $0x368] sm:$0xff]  }
 0x329   : > { %vm2112_vm10 = vcmp.ge.f32.partialorder %v2098_v27, 0.0  ;;  %v2124_v31 = vmul.f32 0.1, %v2098_v27  ;;  %v2147_v15 = vsel %vm5727_vm6, %v2135_v36, 0.0  ;;  %v2238_v10 = vsel %vm6703_vm15, %v2235_v53, %v2237_v38  ;;  %vm6710_vm6 = vmmov %vm6709_vm0  ;;  %4411 = vmatpush3.bf16.msra.mxu0 %v4919_v21 }
 0x32a   : > { %v2239_v44 = vrot.slane %v2147_v15, 1  ;;  %2575 = vmatmul.mubr.bf16.gmra.mxu1 %v2312_v61  ;;  %v2179_v13 = vsel %vm6709_vm0, %v2176_v11, %v2178_v51  ;;  %v2177_v53 = vsel %vm6710_vm6, %v2174_v19, %v2176_v11  ;;  %v2180_v33 = vrot.slane %v2147_v15, 7  ;;  %vm6712_vm15 = vmmov %vm6709_vm0  ;;  %v4917_v19 = vld [vmem:[#allocation6 + $0x3b0] sm:$0xff]   ;;  %4412 = vmatprep.subr.bf16.mxu0 %v4921_v23  ;;  %v4925_v61 = vld [vmem:[#allocation6 + $0x3a0] sm:$0xff]  }
 0x32b   : > { %v2136_v12 = vsel %vm2112_vm10, %v2098_v27, %v2124_v31  ;;  %5046 = vmatprep.mubr.msk.bf16.mxu1 %vm6656_vm11, %v5045_v20  ;;  %v2315_v58 = vpack.c.bf16 %v2179_v13, %v2177_v53  ;;  %vm6711_vm10 = vnez %v6636_v14  ;;  %4656 = vmatprep.subr.bf16.mxu1 %v4917_v19  ;;  %v4924_v27 = vld [vmem:[#allocation6 + $0x328] sm:$0xff]   ;;  %v4927_v31 = vld [vmem:[#allocation6 + $0x320] sm:$0xff]   ;;  %v4930_v15 = vld [vmem:[#allocation6 + $0x318] sm:$0xff]  }
 0x32c   : > { %v2148_v37 = vsel %vm6707_vm5, %v2136_v12, 0.0  ;;  %v2240_v54 = vsel %vm6708_vm14, %v2237_v38, %v2239_v44  ;;  %v5048_v2 = vpack.c.bf16 %v2136_v12, %v2135_v36  ;;  %vm6713_vm5 = vmmov %vm6708_vm14  ;;  %4657 = vmatpush3.bf16.msra.mxu1 %v4917_v19  ;;  %v4922_v38 = vld [vmem:[#allocation6 + $0x330] sm:$0xff]   ;;  %v4926_v36 = vld [vmem:[#allocation6 + $0x360] sm:$0xff]  }
 0x32d   : > { %v2241_v3 = vrot.slane %v2148_v37, 1  ;;  %v2317_v32 = vpack.c.bf16 %v2240_v54, %v2238_v10  ;;  %v2182_v18 = vrot.slane %v2148_v37, 7  ;;  %vm6714_vm14 = vmmov %vm6709_vm0  ;;  %4658 = vmatprep.subr.bf16.mxu1 %v4920_v46  ;;  %4413 = vmatpush3.bf16.msra.mxu0 %v4922_v38  ;;  %v4928_v10 = vld [vmem:[#allocation6 + $0x398] sm:$0xff]   ;;  %v4932_v12 = vld [vmem:[#allocation6 + $0x310] sm:$0xff]  }
 0x32e   : > { %v2181_v16 = vsel %vm6714_vm14, %v2178_v51, %v2180_v33  ;;  %4414 = vmatprep.subr.bf16.mxu0 %v4923_v1  ;;  %v4929_v51 = vld [vmem:[#allocation6 + $0x358] sm:$0xff]   ;;  %v4933_v11 = vld [vmem:[#allocation6 + $0x390] sm:$0xff]   ;;  %v4934_v37 = vld [vmem:[#allocation6 + $0x348] sm:$0xff]   ;;  %vm6715_vm14 = vnez %v6577_v48 }
 0x32f   : > { %2266 = vst [vmem:[#allocation2 + $0xd8] sm:$0x7f] %v2241_v3  ;;  %4650 = vmatprep.mubr.bf16.mxu0 %v2317_v32  ;;  %v2183_v26 = vsel %vm6712_vm15, %v2180_v33, %v2182_v18  ;;  %v2242_v47 = vsel %vm6713_vm5, %v2239_v44, %v2241_v3  ;;  %v4931_v44 = vld [vmem:[#allocation6 + $0x350] sm:$0xff]   ;;  %v4935_v20 = vld [vmem:[#allocation6 + $0x308] sm:$0xff]   ;;  %v4937_v3 = vld [vmem:[#allocation6 + $0x340] sm:$0xff]   ;;  %v2372_v33 = vsub.s32 3, %v5456_v8 }
 0x330   : > { %v2318_v57 = vpack.c.bf16 %v2183_v26, %v2181_v16  ;;  %4659 = vmatpush3.bf16.msra.mxu1 %v4920_v46  ;;  %v4936_v54 = vld [vmem:[#allocation6 + $0x388] sm:$0xff]   ;;  %v4938_v13 = vld [vmem:[#allocation6 + $0x300] sm:$0xff]  }
 0x331   : > { %4415 = vmatpush3.bf16.msra.mxu0 %v4924_v27  ;;  %4660 = vmatprep.subr.bf16.mxu1 %v4925_v61  ;;  %v4939_v32 = vld [vmem:[#allocation6 + $0x380] sm:$0xff]  }
 0x332   : > { %2583 = vmatmul.mubr.bf16.gmra.mxu1 %v2315_v58  ;;  %4416 = vmatprep.subr.bf16.mxu0 %v4926_v36 }
 0x333   : > { %5049 = vmatprep.mubr.msk.bf16.mxu1 %vm6711_vm10, %v5048_v2 }
 0x334   : > { %4661 = vmatpush3.bf16.msra.mxu1 %v4925_v61 }
 0x335   : > { %4417 = vmatpush3.bf16.msra.mxu0 %v4927_v31  ;;  %4662 = vmatprep.subr.bf16.mxu1 %v4928_v10 }
 0x336   : > { %v2302_v49 = vld [vmem:[#allocation2 + $0xd8] sm:$0xff]  ;;  %4418 = vmatprep.subr.bf16.mxu0 %v4929_v51 }
 0x337   : > { %v2320_v40 = vpack.c.bf16 %v2302_v49, %v2242_v47  ;;  %v6175_v49 = vrot.slane %v6073_v60, %v2372_v33 }
 0x338   : > { %4663 = vmatpush3.bf16.msra.mxu1 %v4928_v10 }
 0x339   : > { %4651 = vmatmul.mubr.bf16.gmra.mxu0 %v2320_v40  ;;  %4664 = vmatprep.subr.bf16.mxu1 %v4933_v11 }
 0x33a   : > { %2591 = vmatmul.mubr.bf16.gmra.mxu1 %v2318_v57  ;;  %4419 = vmatpush3.bf16.msra.mxu0 %v4930_v15 }
 0x33b   : > { %4420 = vmatprep.subr.bf16.mxu0 %v4931_v44 }
 0x33c   : > { %4665 = vmatpush3.bf16.msra.mxu1 %v4933_v11 }
 0x33d   : > { %4666 = vmatprep.subr.bf16.mxu1 %v4936_v54 }
 0x33e   : > { %4421 = vmatpush3.bf16.msra.mxu0 %v4932_v12 }
 0x33f   : > { %4422 = vmatprep.subr.bf16.mxu0 %v4934_v37 }
 0x340   : > { %4667 = vmatpush3.bf16.msra.mxu1 %v4936_v54 }
 0x341   : > { %4668 = vmatprep.subr.bf16.mxu1 %v4939_v32 }
 0x342   : > { %4423 = vmatpush3.bf16.msra.mxu0 %v4935_v20 }
 0x343   : > { %4424 = vmatprep.subr.bf16.mxu0 %v4937_v3 }
 0x344   : > { %4669 = vmatpush3.bf16.msra.mxu1 %v4939_v32 }
 0x346   : > { %4425 = vmatpush3.bf16.msra.mxu0 %v4938_v13 }
 0x3d2   : > { %v4360_v53 = vpop.f32.mrf.mxu1 }
 0x3d4   : > { %v4361_v58 = vpop.f32.mrf.mxu1 }
 0x3d5   : > { %v4362_v26 = vadd.f32 %v4361_v58, %v4360_v53 }
 0x3d6   : > { %v4363_v18 = vpop.f32.mrf.mxu1 }
 0x3d7   : > { %v2553_v35 = vadd.f32 %v4362_v26, %v6175_v49 }
 0x3d8   : > { %v4364_v2 = vpop.f32.mrf.mxu1 }
 0x3d9   : > { %v4365_v19 = vadd.f32 %v4364_v2, %v4363_v18 }
 0x3da   : > { %v4366_v47 = vpop.f32.mrf.mxu1 }
 0x3db   : > { %v2556_v60 = vadd.f32 %v4365_v19, %v6175_v49 }
 0x3dc   : > { %v4367_v40 = vpop.f32.mrf.mxu1 }
 0x3dd   : > { %v4368_v57 = vadd.f32 %v4367_v40, %v4366_v47 }
 0x3de   : > { %v4644_v16 = vpop.f32.mrf.mxu0  ;;  %v4369_v21 = vpop.f32.mrf.mxu1 }
 0x3df   : > { %v2561_v46 = vadd.f32 %v4368_v57, %v6175_v49 }
 0x3e0   : > { %v2633_v23 = vpop.f32.mrf.mxu0  ;;  %v4370_v1 = vpop.f32.mrf.mxu1 }
 0x3e1   : > { %v2634_v38 = vadd.f32 %v2633_v23, %v2553_v35  ;;  %v2642_v27 = vadd.f32 %v4644_v16, %v2561_v46  ;;  %v4371_v31 = vadd.f32 %v4370_v1, %v4369_v21 }
 0x3e2   : > { %v4645_v36 = vpop.f32.mrf.mxu0  ;;  %v4372_v11 = vpop.f32.mrf.mxu1 }
 0x3e3   : > { %v2680_v61 = vadd.f32 %v2634_v38, %v5897_v59  ;;  %v6182_v51 = vadd.f32 %v2642_v27, %v5903_v5  ;;  %v2564_v15 = vadd.f32 %v4371_v31, %v6175_v49 }
 0x3e4   : > { %v2636_v10 = vpop.f32.mrf.mxu0  ;;  %v4373_v3 = vpop.f32.mrf.mxu1 }
 0x3e5   : > { %vm2692_vm6 = vcmp.ge.f32.partialorder %v2680_v61, 0.0  ;;  %v2704_v44 = vmul.f32 0.1, %v2680_v61  ;;  %v2637_v12 = vadd.f32 %v2636_v10, %v2556_v60  ;;  %vm2694_vm5 = vcmp.ge.f32.partialorder %v6182_v51, 0.0 }
 0x3e6   : > { %v2706_v37 = vmul.f32 0.1, %v6182_v51  ;;  %v2645_v20 = vadd.f32 %v4645_v36, %v2564_v15  ;;  %v4374_v53 = vadd.f32 %v4373_v3, %v4372_v11  ;;  %v4375_v18 = vpop.f32.mrf.mxu1 }
 0x3e7   : > { %v2716_v54 = vsel %vm2692_vm6, %v2680_v61, %v2704_v44  ;;  %v2681_v59 = vadd.f32 %v2637_v12, %v5908_v6  ;;  %vm6716_vm6 = vnez %v6581_v4 }
 0x3e8   : > { %v6189_v13 = vsel %vm2694_vm5, %v6182_v51, %v2706_v37  ;;  %v2728_v5 = vsel %vm6686_vm4, %v2716_v54, 0.0  ;;  %v6194_v32 = vadd.f32 %v2645_v20, %v5916_v28  ;;  %v4648_v33 = vpop.f32.mrf.mxu0  ;;  %v4376_v47 = vpop.f32.mrf.mxu1  ;;  %v2569_v28 = vadd.f32 %v4374_v53, %v6175_v49 }
 0x3e9   : > { %v2752_v58 = vrot.slane %v2728_v5, 3  ;;  %vm2693_vm15 = vcmp.ge.f32.partialorder %v2681_v59, 0.0  ;;  %v6201_v6 = vsel %vm6687_vm3, %v6189_v13, 0.0  ;;  %v2705_v26 = vmul.f32 0.1, %v2681_v59 }
 0x3ea   : > { %vm2695_vm0 = vcmp.ge.f32.partialorder %v6194_v32, 0.0  ;;  %v2707_v2 = vmul.f32 0.1, %v6194_v32  ;;  %v2649_v40 = vpop.f32.mrf.mxu0  ;;  %v4377_v16 = vadd.f32 %v4376_v47, %v4375_v18  ;;  %v4378_v21 = vpop.f32.mrf.mxu1  ;;  %v2814_v23 = vrot.slane %v6201_v6, 5 }
 0x3eb   : > { %2787 = vst [vmem:[#allocation2 + $0x68] sm:$0xe0] %v2752_v58  ;;  %v2717_v19 = vsel %vm2693_vm15, %v2681_v59, %v2705_v26  ;;  %v2650_v35 = vadd.f32 %v2649_v40, %v2569_v28  ;;  %v2811_v38 = vrot.slane %v2728_v5, 5  ;;  %vm6717_vm5 = vcmask 1044480  }
 0x3ec   : > { %v2719_v57 = vsel %vm2695_vm0, %v6194_v32, %v2707_v2  ;;  %v4649_v46 = vpop.f32.mrf.mxu0  ;;  %v2729_v1 = vsel %vm6715_vm14, %v2717_v19, 0.0  ;;  %v2572_v27 = vadd.f32 %v4377_v16, %v6175_v49  ;;  %v4379_v60 = vpop.f32.mrf.mxu1  ;;  %vm6718_vm0 = vcmask 1042432  }
 0x3ed   : > { %v2753_v36 = vrot.slane %v2729_v1, 3  ;;  %v2812_v31 = vrot.slane %v2729_v1, 5  ;;  %v6210_v61 = vadd.f32 %v2650_v35, %v5946_v0  ;;  %v6214_v10 = vsel %vm6716_vm6, %v2719_v57, 0.0  ;;  %vm6719_vm15 = vmmov %vm6718_vm0 }
 0x3ee   : > { %v2652_v15 = vpop.f32.mrf.mxu0  ;;  %v4380_v44 = vadd.f32 %v4379_v60, %v4378_v21  ;;  %v4381_v59 = vpop.f32.mrf.mxu1  ;;  %v5051_v3 = vpack.c.bf16 %v2717_v19, %v2716_v54  ;;  %vm6720_vm3 = vnez %v6585_v17  ;;  %v2755_v16 = vrot.slane %v6201_v6, 3 }
 0x3ef   : > { %v2653_v12 = vadd.f32 %v2652_v15, %v2572_v27  ;;  %v2754_v11 = vsel %vm6717_vm5, %v2752_v58, %v2753_v36  ;;  %v2813_v37 = vsel %vm6718_vm0, %v2811_v38, %v2812_v31  ;;  %v2815_v20 = vsel %vm6719_vm15, %v2812_v31, %v2814_v23 }
 0x3f0   : > { %5052 = vmatprep.mubr.msk.bf16.mxu0 %vm6720_vm3, %v5051_v3  ;;  %vm2696_vm14 = vcmp.ge.f32.partialorder %v6210_v61, 0.0  ;;  %v2708_v0 = vmul.f32 0.1, %v6210_v61  ;;  %v2577_v5 = vadd.f32 %v4380_v44, %v6175_v49  ;;  %v2757_v58 = vrot.slane %v6214_v10, 3  ;;  %v4382_v2 = vpop.f32.mrf.mxu1 }
 0x3f1   : > { %v6225_v53 = vadd.f32 %v2653_v12, %v5967_v41  ;;  %v2896_v47 = vpack.c.bf16 %v2815_v20, %v2813_v37  ;;  %v2816_v19 = vrot.slane %v6214_v10, 5  ;;  %v4383_v35 = vadd.f32 %v4382_v2, %v4381_v59 }
 0x3f2   : > { %v2858_v18 = vld [vmem:[#allocation2 + $0x68] sm:$0xff]  ;;  %v2720_v54 = vsel %vm2696_vm14, %v6210_v61, %v2708_v0  ;;  %v2658_v28 = vadd.f32 %v4648_v33, %v2577_v5  ;;  %v4384_v21 = vpop.f32.mrf.mxu1  ;;  %v5054_v27 = vpack.c.bf16 %v2719_v57, %v6189_v13  ;;  %vm6721_vm14 = vnez %v6608_v9 }
 0x3f3   : > { %v2894_v26 = vpack.c.bf16 %v2754_v11, %v2858_v18  ;;  %vm2697_vm5 = vcmp.ge.f32.partialorder %v6225_v53, 0.0  ;;  %v2709_v40 = vmul.f32 0.1, %v6225_v53  ;;  %v2732_v41 = vsel %vm6694_vm9, %v2720_v54, 0.0  ;;  %4670 = vmatprep.mubr.bf16.mxu1 %v2896_v47 }
 0x3f4   : > { %v2818_v38 = vrot.slane %v2732_v41, 5  ;;  %v6236_v1 = vadd.f32 %v2658_v28, %v5951_v55  ;;  %vm6722_vm0 = vcmask 1044480   ;;  %v2580_v55 = vadd.f32 %v4383_v35, %v6175_v49  ;;  %v4385_v15 = vpop.f32.mrf.mxu1 }
 0x3f5   : > { %3142 = vmatmul.mubr.bf16.vlgmr.msra.gmra.mxu0 %v2894_v26  ;;  %v2721_v33 = vsel %vm2697_vm5, %v6225_v53, %v2709_v40  ;;  %v2758_v6 = vsel %vm6722_vm0, %v2755_v16, %v2757_v58  ;;  %vm6723_vm15 = vmmov %vm6722_vm0  ;;  %vm6724_vm9 = vcmask 1042432   ;;  %v4386_v37 = vadd.f32 %v4385_v15, %v4384_v21 }
 0x3f6   : > { %5055 = vmatprep.mubr.msk.bf16.mxu0 %vm6721_vm14, %v5054_v27  ;;  %v2756_v31 = vsel %vm6723_vm15, %v2753_v36, %v2755_v16  ;;  %v6248_v60 = vsel %vm5615_vm2, %v2721_v33, 0.0  ;;  %v2819_v44 = vsel %vm6724_vm9, %v2816_v19, %v2818_v38  ;;  %vm2698_vm5 = vcmp.ge.f32.partialorder %v6236_v1, 0.0  ;;  %vm6725_vm14 = vmmov %vm6724_vm9  ;;  %v4387_v36 = vpop.f32.mrf.mxu1 }
 0x3f7   : > { %v2710_v13 = vmul.f32 0.1, %v6236_v1  ;;  %v2817_v57 = vsel %vm6725_vm14, %v2814_v23, %v2816_v19  ;;  %v2820_v12 = vrot.slane %v6248_v60, 5  ;;  %v2661_v11 = vadd.f32 %v4649_v46, %v2580_v55  ;;  %vm6726_vm0 = vmmov %vm6724_vm9 }
 0x3f8   : > { %v2897_v59 = vpack.c.bf16 %v2758_v6, %v2756_v31  ;;  %v2899_v3 = vpack.c.bf16 %v2819_v44, %v2817_v57  ;;  %v2761_v5 = vrot.slane %v6248_v60, 3  ;;  %v4388_v23 = vpop.f32.mrf.mxu1  ;;  %v2585_v47 = vadd.f32 %v4386_v37, %v6175_v49 }
 0x3f9   : > { %v2722_v20 = vsel %vm2698_vm5, %v6236_v1, %v2710_v13  ;;  %v6263_v18 = vadd.f32 %v2661_v11, %v5974_v62  ;;  %v4652_v2 = vpop.f32.mrf.mxu0  ;;  %v2821_v46 = vsel %vm6724_vm9, %v2818_v38, %v2820_v12  ;;  %v4389_v28 = vadd.f32 %v4388_v23, %v4387_v36  ;;  %vm6727_vm5 = vmmov %vm6723_vm15 }
 0x3fa   : > { %v6259_v0 = vsel %vm5628_vm7, %v2722_v20, 0.0  ;;  %4671 = vmatmul.mubr.bf16.vlgmr.msra.gmra.mxu1 %v2899_v3  ;;  %v2759_v40 = vrot.slane %v2732_v41, 3  ;;  %v4390_v35 = vpop.f32.mrf.mxu1  ;;  %v5057_v27 = vpack.c.bf16 %v2721_v33, %v2720_v54 }
 0x3fb   : > { %v2822_v26 = vrot.slane %v6259_v0, 5  ;;  %vm2699_vm14 = vcmp.ge.f32.partialorder %v6263_v18, 0.0  ;;  %v2711_v16 = vmul.f32 0.1, %v6263_v18  ;;  %v2665_v19 = vpop.f32.mrf.mxu0  ;;  %v2588_v54 = vadd.f32 %v4389_v28, %v6175_v49 }
 0x3fc   : > { %v2666_v21 = vadd.f32 %v2665_v19, %v2585_v47  ;;  %v2762_v38 = vsel %vm6723_vm15, %v2759_v40, %v2761_v5  ;;  %v4391_v31 = vpop.f32.mrf.mxu1  ;;  %v2760_v13 = vsel %vm6727_vm5, %v2757_v58, %v2759_v40  ;;  %v2763_v40 = vrot.slane %v6259_v0, 3  ;;  %vm6730_vm15 = vmmov %vm6727_vm5 }
 0x3fd   : > { %3150 = vmatmul.mubr.bf16.gmra.mxu0 %v2897_v59  ;;  %v2823_v62 = vsel %vm6726_vm0, %v2820_v12, %v2822_v26  ;;  %v2723_v41 = vsel %vm2699_vm14, %v6263_v18, %v2711_v16  ;;  %v4653_v6 = vpop.f32.mrf.mxu0  ;;  %v4392_v33 = vadd.f32 %v4391_v31, %v4390_v35  ;;  %v2900_v23 = vpack.c.bf16 %v2762_v38, %v2760_v13 }
 0x3fe   : > { %5058 = vmatprep.mubr.msk.bf16.mxu0 %vm6701_vm1, %v5057_v27  ;;  %v2902_v55 = vpack.c.bf16 %v2823_v62, %v2821_v46  ;;  %v6279_v15 = vsel %vm5660_vm12, %v2723_v41, 0.0  ;;  %v6282_v44 = vadd.f32 %v2666_v21, %v6016_v25  ;;  %v4393_v12 = vpop.f32.mrf.mxu1  ;;  %vm6728_vm14 = vnez %v6602_v56  ;;  %v6729_v62 = vld [vmem:[#allocation17_spill] sm:$0xff] }
 0x3ff   : > { %v2668_v57 = vpop.f32.mrf.mxu0  ;;  %v2593_v36 = vadd.f32 %v4392_v33, %v6175_v49  ;;  %v2765_v25 = vrot.slane %v6279_v15, 3  ;;  %v2824_v59 = vrot.slane %v6279_v15, 5  ;;  %v5060_v35 = vpack.c.bf16 %v2723_v41, %v2722_v20  ;;  %v6734_v33 = vld [vmem:[#allocation18_spill] sm:$0xff] }
 0x400   : > { %4674 = vmatprep.mubr.bf16.mxu1 %v2902_v55  ;;  %vm2700_vm9 = vcmp.ge.f32.partialorder %v6282_v44, 0.0  ;;  %v2712_v11 = vmul.f32 0.1, %v6282_v44  ;;  %v2669_v37 = vadd.f32 %v2668_v57, %v2588_v54  ;;  %v4394_v3 = vpop.f32.mrf.mxu1  ;;  %vm6731_vm5 = vcmask 1042432  }
 0x401   : > { %v2674_v46 = vadd.f32 %v4652_v2, %v2593_v36  ;;  %v4395_v47 = vadd.f32 %v4394_v3, %v4393_v12  ;;  %v2766_v21 = vsel %vm6730_vm15, %v2763_v40, %v2765_v25  ;;  %v2825_v27 = vsel %vm6731_vm5, %v2822_v26, %v2824_v59 }
 0x402   : > { %v2724_v10 = vsel %vm2700_vm9, %v6282_v44, %v2712_v11  ;;  %v6295_v58 = vadd.f32 %v2669_v37, %v6035_v50  ;;  %vm6732_vm9 = vmmov %vm6731_vm5 }
 0x403   : > { %v2736_v28 = vsel %vm6728_vm14, %v2724_v10, 0.0  ;;  %v2690_v50 = vadd.f32 %v2674_v46, %v6729_v62  ;;  %v2596_v2 = vadd.f32 %v4395_v47, %v6175_v49 }
 0x404   : > { %v2826_v16 = vrot.slane %v2736_v28, 5  ;;  %vm2701_vm0 = vcmp.ge.f32.partialorder %v6295_v58, 0.0  ;;  %v2713_v19 = vmul.f32 0.1, %v6295_v58  ;;  %v2767_v60 = vrot.slane %v2736_v28, 3 }
 0x405   : > { %3158 = vmatmul.mubr.bf16.gmra.mxu0 %v2900_v23  ;;  %vm2702_vm14 = vcmp.ge.f32.partialorder %v2690_v50, 0.0  ;;  %v2714_v20 = vmul.f32 0.1, %v2690_v50  ;;  %v2677_v41 = vadd.f32 %v4653_v6, %v2596_v2 }
 0x406   : > { %5061 = vmatprep.mubr.msk.bf16.mxu0 %vm6704_vm13, %v5060_v35  ;;  %v2827_v38 = vsel %vm6732_vm9, %v2824_v59, %v2826_v16  ;;  %v2725_v0 = vsel %vm2701_vm0, %v6295_v58, %v2713_v19  ;;  %vm6733_vm13 = vmmov %vm6730_vm15  ;;  %vm6735_vm15 = vnez %v6616_v24  ;;  %vm6739_vm9 = vnez %v6620_v29 }
 0x407   : > { %v2737_v31 = vsel %vm6680_vm8, %v2725_v0, 0.0  ;;  %v2764_v55 = vsel %vm6733_vm13, %v2761_v5, %v2763_v40  ;;  %v2905_v49 = vpack.c.bf16 %v2827_v38, %v2825_v27  ;;  %v2726_v54 = vsel %vm2702_vm14, %v2690_v50, %v2714_v20  ;;  %vm6736_vm0 = vmmov %vm6731_vm5  ;;  %v4941_v38 = vld [vmem:[#allocation6 + $0x3f8] sm:$0xff]  }
 0x408   : > { %v2828_v15 = vrot.slane %v2737_v31, 5  ;;  %v2691_v13 = vadd.f32 %v2677_v41, %v6734_v33  ;;  %v2903_v26 = vpack.c.bf16 %v2766_v21, %v2764_v55  ;;  %v2769_v57 = vrot.slane %v2737_v31, 3  ;;  %vm6737_vm13 = vmmov %vm6736_vm0  ;;  %v4944_v31 = vld [vmem:[#allocation6 + $0x3f0] sm:$0xff]   ;;  %v4942_v20 = vld [vmem:[#allocation6 + $0x478] sm:$0xff]  }
 0x409   : > { %v2738_v12 = vsel %vm6735_vm15, %v2726_v54, 0.0  ;;  %4675 = vmatmul.mubr.bf16.gmra.mxu1 %v2905_v49  ;;  %v5063_v36 = vpack.c.bf16 %v2725_v0, %v2724_v10  ;;  %vm6738_vm14 = vcmask 1044480   ;;  %v4943_v0 = vld [vmem:[#allocation6 + $0x430] sm:$0xff]   ;;  %v4945_v41 = vld [vmem:[#allocation6 + $0x428] sm:$0xff]   ;;  %4682 = vmatprep.subr.bf16.mxu0 %v4942_v20  ;;  %v4951_v33 = vld [vmem:[#allocation6 + $0x418] sm:$0xff]  }
 0x40a   : > { %v2829_v11 = vsel %vm6736_vm0, %v2826_v16, %v2828_v15  ;;  %v2830_v37 = vrot.slane %v2738_v12, 5  ;;  %vm2703_vm5 = vcmp.ge.f32.partialorder %v2691_v13, 0.0  ;;  %v2715_v6 = vmul.f32 0.1, %v2691_v13  ;;  %vm6740_vm0 = vmmov %vm6738_vm14  ;;  %v4946_v55 = vld [vmem:[#allocation6 + $0x3e8] sm:$0xff]   ;;  %4683 = vmatpush3.bf16.msra.mxu0 %v4942_v20  ;;  %v4947_v49 = vld [vmem:[#allocation6 + $0x470] sm:$0xff]  }
 0x40b   : > { %v2770_v3 = vsel %vm6738_vm14, %v2767_v60, %v2769_v57  ;;  %v2768_v40 = vsel %vm6740_vm0, %v2765_v25, %v2767_v60  ;;  %v2771_v10 = vrot.slane %v2738_v12, 3  ;;  %vm6743_vm14 = vcmask 1042432   ;;  %v4940_v25 = vld [vmem:[#allocation6 + $0x438] sm:$0xff]   ;;  %4684 = vmatprep.subr.bf16.mxu0 %v4947_v49  ;;  %v4954_v12 = vld [vmem:[#allocation6 + $0x3d0] sm:$0xff]  }
 0x40c   : > { %v2831_v5 = vsel %vm6737_vm13, %v2828_v15, %v2830_v37  ;;  %v2727_v59 = vsel %vm2703_vm5, %v2691_v13, %v2715_v6  ;;  %v2906_v16 = vpack.c.bf16 %v2770_v3, %v2768_v40  ;;  %vm6741_vm5 = vmmov %vm6740_vm0  ;;  %4476 = vmatprep.subr.bf16.mxu1 %v4940_v25  ;;  %v4948_v15 = vld [vmem:[#allocation6 + $0x420] sm:$0xff]   ;;  %v4950_v13 = vld [vmem:[#allocation6 + $0x468] sm:$0xff]  }
 0x40d   : > { %3166 = vmatmul.mubr.bf16.gmra.mxu0 %v2903_v26  ;;  %v2739_v23 = vsel %vm6739_vm9, %v2727_v59, 0.0  ;;  %v2908_v46 = vpack.c.bf16 %v2831_v5, %v2829_v11  ;;  %v5066_v19 = vpack.c.bf16 %v2727_v59, %v2726_v54  ;;  %vm6742_vm13 = vmmov %vm6740_vm0  ;;  %4477 = vmatpush3.bf16.msra.mxu1 %v4941_v38  ;;  %v4949_v54 = vld [vmem:[#allocation6 + $0x3e0] sm:$0xff]   ;;  %v4952_v26 = vld [vmem:[#allocation6 + $0x3d8] sm:$0xff]  }
 0x40e   : > { %5064 = vmatprep.mubr.msk.bf16.mxu0 %vm6656_vm11, %v5063_v36  ;;  %v2832_v47 = vrot.slane %v2739_v23, 5  ;;  %v2773_v28 = vrot.slane %v2739_v23, 3  ;;  %v2772_v62 = vsel %vm6742_vm13, %v2769_v57, %v2771_v10  ;;  %4478 = vmatprep.subr.bf16.mxu1 %v4943_v0  ;;  %v4953_v57 = vld [vmem:[#allocation6 + $0x410] sm:$0xff]   ;;  %v4955_v11 = vld [vmem:[#allocation6 + $0x460] sm:$0xff]   ;;  %v4957_v6 = vld [vmem:[#allocation6 + $0x3c8] sm:$0xff]  }
 0x40f   : > { %4678 = vmatprep.mubr.bf16.mxu1 %v2908_v46  ;;  %4685 = vmatpush3.bf16.msra.mxu0 %v4947_v49  ;;  %v4958_v60 = vld [vmem:[#allocation6 + $0x458] sm:$0xff]   ;;  %v4959_v36 = vld [vmem:[#allocation6 + $0x400] sm:$0xff]   ;;  %v4961_v59 = vld [vmem:[#allocation6 + $0x450] sm:$0xff]   ;;  %v2963_v46 = vsub.s32 4, %v5456_v8 }
 0x410   : > { %2857 = vst [vmem:[#allocation2 + $0xd8] sm:$0x7] %v2832_v47  ;;  %v2774_v35 = vsel %vm6741_vm5, %v2771_v10, %v2773_v28  ;;  %v2833_v50 = vsel %vm6743_vm14, %v2830_v37, %v2832_v47  ;;  %4686 = vmatprep.subr.bf16.mxu0 %v4950_v13  ;;  %v4956_v37 = vld [vmem:[#allocation6 + $0x408] sm:$0xff]   ;;  %v4960_v5 = vld [vmem:[#allocation6 + $0x3c0] sm:$0xff]   ;;  %vm6744_vm14 = vnez %v6577_v48 }
 0x411   : > { %v2909_v27 = vpack.c.bf16 %v2774_v35, %v2772_v62  ;;  %4479 = vmatpush3.bf16.msra.mxu1 %v4944_v31  ;;  %v4962_v3 = vld [vmem:[#allocation6 + $0x448] sm:$0xff]   ;;  %v4963_v23 = vld [vmem:[#allocation6 + $0x440] sm:$0xff]  }
 0x412   : > { %4480 = vmatprep.subr.bf16.mxu1 %v4945_v41 }
 0x413   : > { %4687 = vmatpush3.bf16.msra.mxu0 %v4950_v13 }
 0x414   : > { %4688 = vmatprep.subr.bf16.mxu0 %v4955_v11 }
 0x415   : > { %3174 = vmatmul.mubr.bf16.gmra.mxu0 %v2906_v16  ;;  %4481 = vmatpush3.bf16.msra.mxu1 %v4946_v55  ;;  %v6332_v16 = vld [vmem:[#allocation8] sm:$0x3f] }
 0x416   : > { %5067 = vmatprep.mubr.msk.bf16.mxu0 %vm6711_vm10, %v5066_v19  ;;  %4482 = vmatprep.subr.bf16.mxu1 %v4948_v15  ;;  %v6335_v28 = vrot.slane %v6332_v16, %v2963_v46  ;;  %vm6746_vm10 = vcmask 1040384  }
 0x417   : > { %v2893_v2 = vld [vmem:[#allocation2 + $0xd8] sm:$0xff]  ;;  %4689 = vmatpush3.bf16.msra.mxu0 %v4955_v11 }
 0x418   : > { %v2911_v21 = vpack.c.bf16 %v2893_v2, %v2833_v50  ;;  %4690 = vmatprep.subr.bf16.mxu0 %v4958_v60 }
 0x419   : > { %4483 = vmatpush3.bf16.msra.mxu1 %v4949_v54 }
 0x41a   : > { %4679 = vmatmul.mubr.bf16.gmra.mxu1 %v2911_v21  ;;  %4484 = vmatprep.subr.bf16.mxu1 %v4951_v33 }
 0x41b   : > { %4691 = vmatpush3.bf16.msra.mxu0 %v4958_v60 }
 0x41c   : > { %4692 = vmatprep.subr.bf16.mxu0 %v4961_v59 }
 0x41d   : > { %3182 = vmatmul.mubr.bf16.gmra.mxu0 %v2909_v27  ;;  %4485 = vmatpush3.bf16.msra.mxu1 %v4952_v26 }
 0x41e   : > { %4486 = vmatprep.subr.bf16.mxu1 %v4953_v57 }
 0x41f   : > { %4693 = vmatpush3.bf16.msra.mxu0 %v4961_v59 }
 0x420   : > { %4694 = vmatprep.subr.bf16.mxu0 %v4962_v3 }
 0x421   : > { %4487 = vmatpush3.bf16.msra.mxu1 %v4954_v12 }
 0x422   : > { %4488 = vmatprep.subr.bf16.mxu1 %v4956_v37 }
 0x423   : > { %4695 = vmatpush3.bf16.msra.mxu0 %v4962_v3 }
 0x424   : > { %4696 = vmatprep.subr.bf16.mxu0 %v4963_v23 }
 0x425   : > { %4489 = vmatpush3.bf16.msra.mxu1 %v4957_v6 }
 0x426   : > { %4490 = vmatprep.subr.bf16.mxu1 %v4959_v36 }
 0x427   : > { %4697 = vmatpush3.bf16.msra.mxu0 %v4963_v23 }
 0x429   : > { %4491 = vmatpush3.bf16.msra.mxu1 %v4960_v5 }
 0x4b5   : > { %v4426_v47 = vpop.f32.mrf.mxu0 }
 0x4b7   : > { %v4427_v40 = vpop.f32.mrf.mxu0 }
 0x4b8   : > { %v4428_v10 = vadd.f32 %v4427_v40, %v4426_v47 }
 0x4b9   : > { %v4429_v19 = vpop.f32.mrf.mxu0 }
 0x4ba   : > { %v3144_v62 = vadd.f32 %v4428_v10, %v6335_v28  ;;  %v4672_v2 = vpop.f32.mrf.mxu1 }
 0x4bb   : > { %v4430_v35 = vpop.f32.mrf.mxu0 }
 0x4bc   : > { %v4431_v50 = vadd.f32 %v4430_v35, %v4429_v19  ;;  %v3224_v27 = vpop.f32.mrf.mxu1 }
 0x4bd   : > { %v4432_v21 = vpop.f32.mrf.mxu0  ;;  %v3225_v38 = vadd.f32 %v3224_v27, %v3144_v62 }
 0x4be   : > { %v3147_v0 = vadd.f32 %v4431_v50, %v6335_v28  ;;  %v4673_v20 = vpop.f32.mrf.mxu1 }
 0x4bf   : > { %v4433_v25 = vpop.f32.mrf.mxu0  ;;  %vm3271_vm0 = vcmp.ge.f32.partialorder %v3225_v38, 0.0  ;;  %v3283_v41 = vmul.f32 0.1, %v3225_v38 }
 0x4c0   : > { %v4434_v31 = vadd.f32 %v4433_v25, %v4432_v21  ;;  %v3227_v49 = vpop.f32.mrf.mxu1 }
 0x4c1   : > { %v4435_v55 = vpop.f32.mrf.mxu0  ;;  %v3295_v54 = vsel %vm3271_vm0, %v3225_v38, %v3283_v41  ;;  %v3228_v13 = vadd.f32 %v3227_v49, %v3147_v0 }
 0x4c2   : > { %v3152_v15 = vadd.f32 %v4434_v31, %v6335_v28  ;;  %v3307_v57 = vsel %vm6686_vm4, %v3295_v54, 0.0  ;;  %vm6745_vm4 = vnez %v6579_v63 }
 0x4c3   : > { %v4436_v33 = vpop.f32.mrf.mxu0  ;;  %v3331_v11 = vrot.slane %v3307_v57, 7  ;;  %vm3272_vm5 = vcmp.ge.f32.partialorder %v3228_v13, 0.0  ;;  %v3284_v37 = vmul.f32 0.1, %v3228_v13  ;;  %v3390_v5 = vrot.slane %v3307_v57, 1 }
 0x4c4   : > { %v3233_v26 = vadd.f32 %v4672_v2, %v3152_v15  ;;  %v4437_v12 = vadd.f32 %v4436_v33, %v4435_v55 }
 0x4c5   : > { %v4438_v6 = vpop.f32.mrf.mxu0  ;;  %3366 = vst [vmem:[#allocation2 + $0x68] sm:$0xfe] %v3331_v11  ;;  %v3296_v59 = vsel %vm3272_vm5, %v3228_v13, %v3284_v37  ;;  %vm6747_vm5 = vcmask 1046528  }
 0x4c6   : > { %vm3273_vm13 = vcmp.ge.f32.partialorder %v3233_v26, 0.0  ;;  %v3285_v60 = vmul.f32 0.1, %v3233_v26  ;;  %v3155_v36 = vadd.f32 %v4437_v12, %v6335_v28  ;;  %v3308_v47 = vsel %vm6744_vm14, %v3296_v59, 0.0  ;;  %vm6749_vm14 = vmmov %vm6747_vm5 }
 0x4c7   : > { %v4439_v3 = vpop.f32.mrf.mxu0  ;;  %v3332_v10 = vrot.slane %v3308_v47, 7  ;;  %v3391_v19 = vrot.slane %v3308_v47, 1  ;;  %v5069_v48 = vpack.c.bf16 %v3296_v59, %v3295_v54 }
 0x4c8   : > { %v3297_v23 = vsel %vm3273_vm13, %v3233_v26, %v3285_v60  ;;  %v3236_v46 = vadd.f32 %v4673_v20, %v3155_v36  ;;  %v4440_v43 = vadd.f32 %v4439_v3, %v4438_v6  ;;  %vm6748_vm13 = vmmov %vm6746_vm10 }
 0x4c9   : > { %v3309_v40 = vsel %vm6745_vm4, %v3297_v23, 0.0  ;;  %v4441_v35 = vpop.f32.mrf.mxu0  ;;  %v3333_v21 = vsel %vm6746_vm10, %v3331_v11, %v3332_v10  ;;  %v3392_v27 = vsel %vm6747_vm5, %v3390_v5, %v3391_v19  ;;  %5070 = vmatprep.mubr.msk.bf16.mxu1 %vm6720_vm3, %v5069_v48  ;;  %v4676_v41 = vpop.f32.mrf.mxu1  ;;  %vm6750_vm3 = vmmov %vm6746_vm10 }
 0x4ca   : > { %v3334_v62 = vrot.slane %v3309_v40, 7  ;;  %v3393_v50 = vrot.slane %v3309_v40, 1  ;;  %vm3274_vm0 = vcmp.ge.f32.partialorder %v3236_v46, 0.0  ;;  %v3286_v2 = vmul.f32 0.1, %v3236_v46  ;;  %vm6751_vm10 = vmmov %vm6747_vm5 }
 0x4cb   : > { %v4442_v25 = vpop.f32.mrf.mxu0  ;;  %v3160_v38 = vadd.f32 %v4440_v43, %v6335_v28  ;;  %v3240_v26 = vpop.f32.mrf.mxu1 }
 0x4cc   : > { %v3298_v63 = vsel %vm3274_vm0, %v3236_v46, %v3286_v2  ;;  %v3335_v0 = vsel %vm6748_vm13, %v3332_v10, %v3334_v62  ;;  %v3394_v31 = vsel %vm6749_vm14, %v3391_v19, %v3393_v50  ;;  %v4443_v20 = vadd.f32 %v4442_v25, %v4441_v35  ;;  %v3437_v57 = vld [vmem:[#allocation2 + $0x68] sm:$0xff]  ;;  %vm6754_vm14 = vmmov %vm6750_vm3 }
 0x4cd   : > { %v3310_v55 = vsel %vm6716_vm6, %v3298_v63, 0.0  ;;  %v4444_v15 = vpop.f32.mrf.mxu0  ;;  %v3475_v49 = vpack.c.bf16 %v3394_v31, %v3392_v27  ;;  %v3241_v12 = vadd.f32 %v3240_v26, %v3160_v38  ;;  %v3473_v11 = vpack.c.bf16 %v3333_v21, %v3437_v57  ;;  %v4677_v36 = vpop.f32.mrf.mxu1 }
 0x4ce   : > { %v3336_v33 = vrot.slane %v3310_v55, 7  ;;  %v3395_v13 = vrot.slane %v3310_v55, 1  ;;  %v3163_v17 = vadd.f32 %v4443_v20, %v6335_v28  ;;  %v5072_v46 = vpack.c.bf16 %v3298_v63, %v3297_v23 }
 0x4cf   : > { %v4445_v54 = vpop.f32.mrf.mxu0  ;;  %4698 = vmatprep.mubr.bf16.mxu0 %v3475_v49  ;;  %vm3275_vm4 = vcmp.ge.f32.partialorder %v3241_v12, 0.0  ;;  %v3287_v4 = vmul.f32 0.1, %v3241_v12  ;;  %3721 = vmatmul.mubr.bf16.vlgmr.msra.gmra.mxu1 %v3473_v11  ;;  %v3243_v3 = vpop.f32.mrf.mxu1  ;;  %vm6752_vm6 = vnez %v6608_v9  ;;  %vm6753_vm0 = vnez %v6583_v7 }
 0x4d0   : > { %v3337_v37 = vsel %vm6750_vm3, %v3334_v62, %v3336_v33  ;;  %v3396_v6 = vsel %vm6751_vm10, %v3393_v50, %v3395_v13  ;;  %v4446_v60 = vadd.f32 %v4445_v54, %v4444_v15  ;;  %5073 = vmatprep.mubr.msk.bf16.mxu1 %vm6752_vm6, %v5072_v46  ;;  %v3244_v40 = vadd.f32 %v3243_v3, %v3163_v17  ;;  %vm6755_vm3 = vmmov %vm6751_vm10 }
 0x4d1   : > { %v4447_v5 = vpop.f32.mrf.mxu0  ;;  %v3299_v47 = vsel %vm3275_vm4, %v3241_v12, %v3287_v4  ;;  %v3476_v63 = vpack.c.bf16 %v3337_v37, %v3335_v0  ;;  %vm6756_vm4 = vmmov %vm6754_vm14 }
 0x4d2   : > { %v3168_v59 = vadd.f32 %v4446_v60, %v6335_v28  ;;  %v3311_v19 = vsel %vm6753_vm0, %v3299_v47, 0.0  ;;  %vm3276_vm5 = vcmp.ge.f32.partialorder %v3244_v40, 0.0  ;;  %v3288_v2 = vmul.f32 0.1, %v3244_v40  ;;  %vm6757_vm6 = vmmov %vm6755_vm3 }
 0x4d3   : > { %v4448_v43 = vpop.f32.mrf.mxu0  ;;  %v3338_v62 = vrot.slane %v3311_v19, 7  ;;  %v3397_v50 = vrot.slane %v3311_v19, 1 }
 0x4d4   : > { %v3249_v10 = vadd.f32 %v4676_v41, %v3168_v59  ;;  %v4449_v35 = vadd.f32 %v4448_v43, %v4447_v5  ;;  %v3300_v38 = vsel %vm3276_vm5, %v3244_v40, %v3288_v2  ;;  %vm6761_vm5 = vmmov %vm6755_vm3 }
 0x4d5   : > { %v4450_v21 = vpop.f32.mrf.mxu0  ;;  %v3339_v9 = vsel %vm6754_vm14, %v3336_v33, %v3338_v62  ;;  %v3398_v25 = vsel %vm6755_vm3, %v3395_v13, %v3397_v50  ;;  %v3312_v20 = vsel %vm5615_vm2, %v3300_v38, 0.0  ;;  %vm6758_vm2 = vmmov %vm6756_vm4  ;;  %v5075_v5 = vpack.c.bf16 %v3300_v38, %v3299_v47 }
 0x4d6   : > { %vm3277_vm13 = vcmp.ge.f32.partialorder %v3249_v10, 0.0  ;;  %v3289_v27 = vmul.f32 0.1, %v3249_v10  ;;  %v3171_v23 = vadd.f32 %v4449_v35, %v6335_v28  ;;  %v3340_v15 = vrot.slane %v3312_v20, 7  ;;  %vm6760_vm0 = vmmov %vm6758_vm2 }
 0x4d7   : > { %v4451_v48 = vpop.f32.mrf.mxu0  ;;  %v3399_v49 = vrot.slane %v3312_v20, 1  ;;  %3727 = vmatmul.mubr.bf16.gmra.mxu1 %v3476_v63  ;;  %v3478_v57 = vpack.c.bf16 %v3398_v25, %v3396_v6 }
 0x4d8   : > { %v3301_v31 = vsel %vm3277_vm13, %v3249_v10, %v3289_v27  ;;  %v3252_v7 = vadd.f32 %v4677_v36, %v3171_v23  ;;  %v4452_v41 = vadd.f32 %v4451_v48, %v4450_v21  ;;  %v3341_v0 = vsel %vm6756_vm4, %v3338_v62, %v3340_v15  ;;  %5076 = vmatprep.mubr.msk.bf16.mxu1 %vm6701_vm1, %v5075_v5  ;;  %vm6765_vm4 = vmmov %vm6761_vm5 }
 0x4d9   : > { %v3313_v55 = vsel %vm5628_vm7, %v3301_v31, 0.0  ;;  %v4453_v26 = vpop.f32.mrf.mxu0  ;;  %v3400_v12 = vsel %vm6757_vm6, %v3397_v50, %v3399_v49  ;;  %4699 = vmatmul.mubr.bf16.vlgmr.msra.gmra.mxu0 %v3478_v57  ;;  %vm6759_vm7 = vmmov %vm6755_vm3  ;;  %v3479_v19 = vpack.c.bf16 %v3341_v0, %v3339_v9  ;;  %vm6762_vm1 = vnez %v6628_v42 }
 0x4da   : > { %v3342_v33 = vrot.slane %v3313_v55, 7  ;;  %v3401_v54 = vrot.slane %v3313_v55, 1  ;;  %vm3278_vm10 = vcmp.ge.f32.partialorder %v3252_v7, 0.0  ;;  %v3290_v13 = vmul.f32 0.1, %v3252_v7  ;;  %v4680_v36 = vpop.f32.mrf.mxu1 }
 0x4db   : > { %v4454_v17 = vpop.f32.mrf.mxu0  ;;  %v3176_v30 = vadd.f32 %v4452_v41, %v6335_v28  ;;  %vm6763_vm13 = vnez %v6602_v56 }
 0x4dc   : > { %v3302_v11 = vsel %vm3278_vm10, %v3252_v7, %v3290_v13  ;;  %v3343_v34 = vsel %vm6758_vm2, %v3340_v15, %v3342_v33  ;;  %v3402_v37 = vsel %vm6759_vm7, %v3399_v49, %v3401_v54  ;;  %v4455_v60 = vadd.f32 %v4454_v17, %v4453_v26  ;;  %v3256_v43 = vpop.f32.mrf.mxu1  ;;  %vm6764_vm10 = vmmov %vm6760_vm0 }
 0x4dd   : > { %v3314_v6 = vsel %vm5660_vm12, %v3302_v11, 0.0  ;;  %v4456_v4 = vpop.f32.mrf.mxu0  ;;  %v3481_v59 = vpack.c.bf16 %v3402_v37, %v3400_v12  ;;  %v3257_v62 = vadd.f32 %v3256_v43, %v3176_v30  ;;  %v5078_v27 = vpack.c.bf16 %v3302_v11, %v3301_v31  ;;  %vm6766_vm2 = vmmov %vm6760_vm0 }
 0x4de   : > { %v3344_v3 = vrot.slane %v3314_v6, 7  ;;  %v3403_v46 = vrot.slane %v3314_v6, 1  ;;  %v3179_v10 = vadd.f32 %v4455_v60, %v6335_v28  ;;  %v4681_v2 = vpop.f32.mrf.mxu1  ;;  %vm6767_vm7 = vmmov %vm6760_vm0 }
 0x4df   : > { %v4457_v40 = vpop.f32.mrf.mxu0  ;;  %4702 = vmatprep.mubr.bf16.mxu0 %v3481_v59  ;;  %3735 = vmatmul.mubr.bf16.gmra.mxu1 %v3479_v19  ;;  %vm3279_vm12 = vcmp.ge.f32.partialorder %v3257_v62, 0.0  ;;  %v3291_v39 = vmul.f32 0.1, %v3257_v62 }
 0x4e0   : > { %v3345_v35 = vsel %vm6760_vm0, %v3342_v33, %v3344_v3  ;;  %v3404_v52 = vsel %vm6761_vm5, %v3401_v54, %v3403_v46  ;;  %v4458_v50 = vadd.f32 %v4457_v40, %v4456_v4  ;;  %5079 = vmatprep.mubr.msk.bf16.mxu1 %vm6762_vm1, %v5078_v27  ;;  %v3259_v23 = vpop.f32.mrf.mxu1  ;;  %vm6768_vm0 = vmmov %vm6765_vm4 }
 0x4e1   : > { %v4459_v47 = vpop.f32.mrf.mxu0  ;;  %v3303_v25 = vsel %vm3279_vm12, %v3257_v62, %v3291_v39  ;;  %v3260_v48 = vadd.f32 %v3259_v23, %v3179_v10  ;;  %v3482_v49 = vpack.c.bf16 %v3345_v35, %v3343_v34  ;;  %vm6771_vm5 = vmmov %vm6768_vm0  ;;  %vm6772_vm12 = vnez %v6636_v14 }
 0x4e2   : > { %v3184_v21 = vadd.f32 %v4458_v50, %v6335_v28  ;;  %v3315_v7 = vsel %vm6763_vm13, %v3303_v25, 0.0  ;;  %v3542_v62 = vsub.s32 5, %v5456_v8 }
 0x4e3   : > { %v4460_v9 = vpop.f32.mrf.mxu0  ;;  %v3346_v20 = vrot.slane %v3315_v7, 7  ;;  %v3405_v41 = vrot.slane %v3315_v7, 1  ;;  %vm3280_vm3 = vcmp.ge.f32.partialorder %v3260_v48, 0.0  ;;  %v3292_v15 = vmul.f32 0.1, %v3260_v48 }
 0x4e4   : > { %v3265_v38 = vadd.f32 %v4680_v36, %v3184_v21  ;;  %v4461_v63 = vadd.f32 %v4460_v9, %v4459_v47  ;;  %v6409_v47 = vrot.slane %v6332_v16, %v3542_v62 }
 0x4e5   : > { %v3347_v42 = vsel %vm6764_vm10, %v3344_v3, %v3346_v20  ;;  %v3406_v26 = vsel %vm6765_vm4, %v3403_v46, %v3405_v41  ;;  %v3304_v54 = vsel %vm3280_vm3, %v3260_v48, %v3292_v15 }
 0x4e6   : > { %vm3281_vm14 = vcmp.ge.f32.partialorder %v3265_v38, 0.0  ;;  %v3293_v55 = vmul.f32 0.1, %v3265_v38  ;;  %v3187_v31 = vadd.f32 %v4461_v63, %v6335_v28  ;;  %v3484_v13 = vpack.c.bf16 %v3406_v26, %v3404_v52 }
 0x4e7   : > { %3743 = vmatmul.mubr.bf16.gmra.mxu1 %v3482_v49  ;;  %v3316_v17 = vsel %vm6680_vm8, %v3304_v54, 0.0  ;;  %v5081_v36 = vpack.c.bf16 %v3304_v54, %v3303_v25  ;;  %vm6770_vm8 = vmmov %vm6766_vm2 }
 0x4e8   : > { %v3305_v57 = vsel %vm3281_vm14, %v3265_v38, %v3293_v55  ;;  %v3268_v56 = vadd.f32 %v4681_v2, %v3187_v31  ;;  %v3348_v30 = vrot.slane %v3316_v17, 7  ;;  %v3407_v28 = vrot.slane %v3316_v17, 1  ;;  %4703 = vmatmul.mubr.bf16.gmra.mxu0 %v3484_v13 }
 0x4e9   : > { %v3317_v33 = vsel %vm6735_vm15, %v3305_v57, 0.0  ;;  %vm6769_vm15 = vmmov %vm6768_vm0  ;;  %5082 = vmatprep.mubr.msk.bf16.mxu1 %vm6656_vm11, %v5081_v36 }
 0x4ea   : > { %v3350_v0 = vrot.slane %v3317_v33, 7  ;;  %v3409_v12 = vrot.slane %v3317_v33, 1  ;;  %vm3282_vm6 = vcmp.ge.f32.partialorder %v3268_v56, 0.0  ;;  %v3294_v11 = vmul.f32 0.1, %v3268_v56 }
 0x4eb   : > { %v3349_v34 = vsel %vm6766_vm2, %v3346_v20, %v3348_v30  ;;  %v3408_v24 = vsel %vm6768_vm0, %v3405_v41, %v3407_v28 }
 0x4ec   : > { %v3351_v37 = vsel %vm6767_vm7, %v3348_v30, %v3350_v0  ;;  %v3410_v60 = vsel %vm6769_vm15, %v3407_v28, %v3409_v12  ;;  %v3306_v6 = vsel %vm3282_vm6, %v3268_v56, %v3294_v11  ;;  %v3485_v5 = vpack.c.bf16 %v3349_v34, %v3347_v42 }
 0x4ed   : > { %v3487_v22 = vpack.c.bf16 %v3410_v60, %v3408_v24  ;;  %v3318_v4 = vsel %vm6739_vm9, %v3306_v6, 0.0  ;;  %v5084_v40 = vpack.c.bf16 %v3306_v6, %v3305_v57 }
 0x4ee   : > { %v3352_v59 = vrot.slane %v3318_v4, 7  ;;  %v3411_v3 = vrot.slane %v3318_v4, 1 }
 0x4ef   : > { %4706 = vmatprep.mubr.bf16.mxu0 %v3487_v22  ;;  %3751 = vmatmul.mubr.bf16.gmra.mxu1 %v3485_v5 }
 0x4f0   : > { %v3353_v46 = vsel %vm6770_vm8, %v3350_v0, %v3352_v59  ;;  %v3412_v43 = vsel %vm6771_vm5, %v3409_v12, %v3411_v3  ;;  %3436 = vst [vmem:[#allocation2 + $0xd8] sm:$0x7f] %v3411_v3  ;;  %5085 = vmatprep.mubr.msk.bf16.mxu1 %vm6772_vm12, %v5084_v40 }
 0x4f1   : > { %v3488_v45 = vpack.c.bf16 %v3353_v46, %v3351_v37 }
 0x4f7   : > { %v3472_v10 = vld [vmem:[#allocation2 + $0xd8] sm:$0xff]  ;;  %3759 = vmatmul.mubr.bf16.gmra.mxu1 %v3488_v45 }
 0x4f8   : > { %v3490_v29 = vpack.c.bf16 %v3472_v10, %v3412_v43 }
 0x4fa   : > { %4707 = vmatmul.mubr.bf16.gmra.mxu0 %v3490_v29 }
 0x58f   : > { %v4492_v19 = vpop.f32.mrf.mxu1 }
 0x591   : > { %v4493_v35 = vpop.f32.mrf.mxu1 }
 0x593   : > { %v4495_v52 = vpop.f32.mrf.mxu1 }
 0x595   : > { %v4496_v50 = vpop.f32.mrf.mxu1 }
 0x597   : > { %v4498_v2 = vpop.f32.mrf.mxu1 }
 0x599   : > { %v4499_v39 = vpop.f32.mrf.mxu1  ;;  %v4700_v21 = vpop.f32.mrf.mxu0 }
 0x59a   : > { %v4500_v14 = vadd.f32 %v4499_v39, %v4498_v2 }
 0x59b   : > { %v4501_v27 = vpop.f32.mrf.mxu1  ;;  %v3799_v23 = vpop.f32.mrf.mxu0 }
 0x59c   : > { %v3729_v9 = vadd.f32 %v4500_v14, %v6409_v47 }
 0x59d   : > { %v4502_v25 = vpop.f32.mrf.mxu1  ;;  %v4701_v38 = vpop.f32.mrf.mxu0 }
 0x59e   : > { %v3806_v48 = vadd.f32 %v4700_v21, %v3729_v9  ;;  %v4503_v63 = vadd.f32 %v4502_v25, %v4501_v27 }
 0x59f   : > { %v4504_v7 = vpop.f32.mrf.mxu1  ;;  %v3801_v20 = vpop.f32.mrf.mxu0 }
 0x5a0   : > { %v3842_v8 = vadd.f32 %v3806_v48, %v6182_v51  ;;  %v3732_v41 = vadd.f32 %v4503_v63, %v6409_v47 }
 0x5a1   : > { %v4505_v16 = vpop.f32.mrf.mxu1 }
 0x5a2   : > { %3850 = vst [vmem:[%s6415_s27] sm:$0xff] %v3842_v8  ;;  %v3809_v55 = vadd.f32 %v4701_v38, %v3732_v41  ;;  %v4506_v42 = vadd.f32 %v4505_v16, %v4504_v7 }
 0x5a3   : > { %v4507_v15 = vpop.f32.mrf.mxu1 }
 0x5a4   : > { %v3843_v31 = vadd.f32 %v3809_v55, %v6194_v32  ;;  %v3737_v56 = vadd.f32 %v4506_v42, %v6409_v47 }
 0x5a5   : > { %v4508_v49 = vpop.f32.mrf.mxu1 }
 0x5a6   : > { %3851 = vst [vmem:[%s6415_s27 + $0x8] sm:$0xff] %v3843_v31  ;;  %v4509_v54 = vadd.f32 %v4508_v49, %v4507_v15 }
 0x5a7   : > { %v4510_v26 = vpop.f32.mrf.mxu1 }
 0x5a8   : > { %v4704_v57 = vpop.f32.mrf.mxu0  ;;  %v3740_v37 = vadd.f32 %v4509_v54, %v6409_v47 }
 0x5a9   : > { %v4511_v33 = vpop.f32.mrf.mxu1 }
 0x5aa   : > { %v4512_v51 = vadd.f32 %v4511_v33, %v4510_v26  ;;  %v3813_v13 = vpop.f32.mrf.mxu0 }
 0x5ab   : > { %v4513_v0 = vpop.f32.mrf.mxu1  ;;  %v3814_v17 = vadd.f32 %v3813_v13, %v3737_v56 }
 0x5ac   : > { %v3745_v12 = vadd.f32 %v4512_v51, %v6409_v47  ;;  %v4705_v30 = vpop.f32.mrf.mxu0 }
 0x5ad   : > { %v4514_v28 = vpop.f32.mrf.mxu1  ;;  %v3844_v11 = vadd.f32 %v3814_v17, %v6210_v61 }
 0x5ae   : > { %v3822_v32 = vadd.f32 %v4704_v57, %v3745_v12  ;;  %v4515_v34 = vadd.f32 %v4514_v28, %v4513_v0  ;;  %v3816_v24 = vpop.f32.mrf.mxu0 }
 0x5af   : > { %v4516_v60 = vpop.f32.mrf.mxu1  ;;  %3852 = vst [vmem:[%s6415_s27 + $0x10] sm:$0xff] %v3844_v11  ;;  %v3817_v22 = vadd.f32 %v3816_v24, %v3740_v37 }
 0x5b0   : > { %v3846_v6 = vadd.f32 %v3822_v32, %v6236_v1  ;;  %v3748_v36 = vadd.f32 %v4515_v34, %v6409_v47 }
 0x5b1   : > { %v4517_v4 = vpop.f32.mrf.mxu1  ;;  %v3845_v59 = vadd.f32 %v3817_v22, %v6225_v53 }
 0x5b2   : > { %3854 = vst [vmem:[%s6415_s27 + $0x20] sm:$0xff] %v3846_v6  ;;  %v3825_v5 = vadd.f32 %v4705_v30, %v3748_v36  ;;  %v4518_v43 = vadd.f32 %v4517_v4, %v4516_v60 }
 0x5b3   : > { %v4519_v61 = vpop.f32.mrf.mxu1  ;;  %3853 = vst [vmem:[%s6415_s27 + $0x18] sm:$0xff] %v3845_v59 }
 0x5b4   : > { %v3847_v3 = vadd.f32 %v3825_v5, %v6263_v18  ;;  %v3753_v29 = vadd.f32 %v4518_v43, %v6409_v47 }
 0x5b5   : > { %v4520_v46 = vpop.f32.mrf.mxu1 }
 0x5b6   : > { %3855 = vst [vmem:[%s6415_s27 + $0x28] sm:$0xff] %v3847_v3  ;;  %v4521_v10 = vadd.f32 %v4520_v46, %v4519_v61 }
 0x5b7   : > { %v4522_v1 = vpop.f32.mrf.mxu1 }
 0x5b8   : > { %v3756_v50 = vadd.f32 %v4521_v10, %v6409_v47 }
 0x5b9   : > { %v4523_v40 = vpop.f32.mrf.mxu1 }
 0x5ba   : > { %v4708_v45 = vpop.f32.mrf.mxu0 }
 0x5bb   : > { %v4525_v19 = vpop.f32.mrf.mxu1 }
 0x5bc   : > { %v3829_v53 = vpop.f32.mrf.mxu0 }
 0x5bd   : > { %v3830_v35 = vadd.f32 %v3829_v53, %v3753_v29  ;;  %v4526_v18 = vpop.f32.mrf.mxu1 }
 0x5be   : > { %v4709_v52 = vpop.f32.mrf.mxu0 }
 0x5bf   : > { %v3848_v62 = vadd.f32 %v3830_v35, %v6282_v44 }
 0x5c0   : > { %v3832_v2 = vpop.f32.mrf.mxu0 }
 0x5c1   : > { %3856 = vst [vmem:[%s6415_s27 + $0x30] sm:$0xff] %v3848_v62  ;;  %v3833_v39 = vadd.f32 %v3832_v2, %v3756_v50 }
 0x5c3   : > { %v3849_v21 = vadd.f32 %v3833_v39, %v6295_v58 }
 0x5c5   : > { %3857 = vst [vmem:[%s6415_s27 + $0x38] sm:$0xff] %v3849_v21 }
 0x5c6   : > { %5179 = shalt.err (!%p5176_p0)
}
 0x5c7   : > { %s5180_s12 = scalar_lea.hbm %s6445_s29, 1024  ;;  %s5184_s5 = scalar_lea.hbm %s6502_s3, 8192 }
 0x5c8   : > { %p5181_p1 = scmp.ne.s32.totalorder %s6445_s29, %s5180_s12  ;;  %p5185_p11 = scmp.lt.s32.totalorder %s6445_s29, %s6502_s3 }
 0x5c9   : > { %p5186_p10 = scmp.lt.s32.totalorder %s5184_s5, %s5180_s12 }
 0x5ca   : > { %p5182_p4 = pnand %p5181_p1, %p5410_p5 }
 0x5cb   : > { %p5187_p7 = por %p5186_p10, %p5185_p11 }
 0x5cc   : > { %p5183_p6 = pneg %p5182_p4 }
 0x5ce   : > { %p5188_p8 = pnand %p5187_p7, %p5183_p6 }
 0x5d0   : > { %5191 = shalt.err (!%p5188_p8)
}
 0x5d1   : > { %s5277_s22 = smov 128   ;;  %s5278_s27 = smov 8  }
 0x5d2   : > { %4724 = dma.vmem_to_hbm [thread:$0]  (%p5410_p5), %s6438_s20, 1024, %s6445_s29, %s3859_s6, %s5277_s22, %s5277_s22, %s5278_s27  }
 0x5d3 PF: > { %s6773_s8 = sld [smem:[#allocation13_spill]]  ;;  %p4746_p9 = scmp.ge.s32.totalorder %s5266_s19, 2 }
 0x5d4   : > { %s6774_s10 = sld [smem:[#allocation14_spill]] }
 0x5d9   : > { %s3889_s11 = sand.u32 1, %s6773_s8  }
 0x5da   : > { %p6775_p12 = scmp.ne.s32.totalorder %s6774_s10, 0  ;;  %s3890_s15 = scalar_lea.sflag [#allocation5], %s3889_s11 }
 0x5dc   : > { %p4738_p2 = pnand %p4746_p9, %p6775_p12 }
 0x5de   : > { %p4739_p13 = pneg %p4738_p2 }
 0x5e0   : > { %5233 = dma.done.wait (%p4739_p13), %s3890_s15, 1024  }
 0x5e1   : > { %5235 = vsyncadd (%p4739_p13), %s3890_s15, 4294966272  ;;  %s20_s19 = sadd.s32 1, %s5266_s19   ;;  %s6776_s4 = sld [smem:[#allocation15_spill]] }
 0x5e2   : > { %p17_p3 = scmp.ge.s32.totalorder %s20_s19, 10   ;;  %s6777_s25 = sld [smem:[#allocation16_spill]] }
 0x5e3   : > { %s6778_s12 = smov %s5242_s13  ;;  %s6779_s13 = smov %s5246_s14 }
 0x5e4   : > { %s6780_s14 = smov %s5429_s1  ;;  %s6781_s15 = smov %s5258_s17 }
 0x5e5   : > { %s6782_s16 = smov %s5262_s18  ;;  %19 = sbr.rel (!%p17_p3) target bundleno = 11 (0xb), region = 90 }
 0x5e7   : > { %s6783_s17 = smov %s6776_s4 }
 0x5e8   : > { %s6784_s18 = smov %s6777_s25 }
 0x5ea   :  { %3895 = vsyncpa [#allocation4], 1 }
 0x5eb   :  { %3897 = vsyncpa [#allocation4 + $0x1], 1 }
 0x5ec   :  { %3898 = vsyncpa [#allocation7], 1 }
 0x5ed   :  { %3899 = vsyncpa [#allocation5], 1 }
 0x5ee   :  { %3901 = vsyncpa [#allocation5 + $0x1], 1 }

</bundles_post_ra>
